<compile_context>
chip_gen: v5e
topology: v5e:2x2
jax: 0.10.0
libtpu: 0.0.40
codegen_flags: <defaults>
</compile_context>

<pallas_src>
import functools

import jax
import jax.numpy as jnp
from jax.experimental import pallas as pl
from jax.experimental.pallas import tpu as pltpu


def edge_mlp_kernel(batch_ref, src_ref, dest_ref, edge_ref, u_ref,
                    w1s_ref, w1d_ref, w1e_ref, w1u_ref, b1_ref,
                    w2_ref, b2_ref, w3_ref, b3_ref,
                    o_ref, *, compute_dtype):
    f32 = jnp.float32
    tile_m = src_ref.shape[0]
    n_graphs = u_ref.shape[0]

    # Per-edge gather of global features u[batch] as a one-hot matmul.
    # Exact (pure row selection) and essentially free: MXU has huge slack here.
    onehot = (batch_ref[...] ==
              jax.lax.broadcasted_iota(jnp.int32, (tile_m, n_graphs), 1)
              ).astype(compute_dtype)
    ug = jnp.dot(onehot, u_ref[...],
                 preferred_element_type=f32).astype(compute_dtype)

    # Layer 1:  cat([src, dest, edge, u[batch]], -1) @ W1 + b1
    # implemented as the equivalent sum of per-block matmuls (f32 accumulation).
    h1 = (jnp.dot(src_ref[...], w1s_ref[...], preferred_element_type=f32)
          + jnp.dot(dest_ref[...], w1d_ref[...], preferred_element_type=f32)
          + jnp.dot(edge_ref[...], w1e_ref[...], preferred_element_type=f32)
          + jnp.dot(ug, w1u_ref[...], preferred_element_type=f32)
          + b1_ref[...])
    # ReLU in f32, then cast down for the next MXU pass.
    # TODO(synk): Dropout with p>0 in training mode would need pltpu.prng_random_bits;
    # here p=0.0 / eval => identity.
    h1 = jnp.maximum(h1, 0.0).astype(compute_dtype)

    # Layer 2
    h2 = jnp.dot(h1, w2_ref[...], preferred_element_type=f32) + b2_ref[...]
    h2 = jnp.maximum(h2, 0.0).astype(compute_dtype)

    # Output layer (b3 folded directly into the store expression).
    o_ref[...] = (jnp.dot(h2, w3_ref[...], preferred_element_type=f32)
                  + b3_ref[...]).astype(o_ref.dtype)


def edge_model_forward(src, dest, edge_attr, u, batch, params, *,
                       tile_m=512, compute_dtype=jnp.bfloat16, out_dtype=None):
    """Fused EdgeModel forward.

    src, dest: (E, Fn) f32; edge_attr: (E, Fe) f32; u: (G, Fg) f32; batch: (E,) int.
    params: dict with w1 (2*Fn+Fe+Fg, H), b1 (1, H), w2 (H, H), b2 (1, H),
            w3 (H, O), b3 (1, O), all f32.
    """
    if u is None:
        # TODO(synk): u=None path not implemented (the PyTorch module would shape-mismatch
        # anyway unless global_input_size == 0).
        raise NotImplementedError("EdgeModel Pallas kernel requires u (global features).")

    E, Fn = src.shape
    Fe = edge_attr.shape[1]
    Fg = u.shape[1]
    H = params["w2"].shape[0]
    O = params["w3"].shape[1]
    out_dtype = compute_dtype if out_dtype is None else out_dtype

    # Pad the edge dimension up to a multiple of tile_m (padded rows are sliced off).
    tile_m = int(tile_m)
    E_pad = -(-E // tile_m) * tile_m
    pad = E_pad - E
    if pad:
        rpad = lambda a: jnp.pad(a, ((0, pad), (0, 0)))
        src, dest, edge_attr = rpad(src), rpad(dest), rpad(edge_attr)
        batch = jnp.pad(batch, ((0, pad),))
    batch2d = batch.astype(jnp.int32).reshape(E_pad, 1)

    # Pad the (tiny) global table to >= 8 rows for friendlier MXU/one-hot shapes;
    # extra rows are zeros and never selected (batch < num_graphs).
    G = u.shape[0]
    G_pad = max(8, -(-G // 8) * 8)
    u_p = jnp.pad(u, ((0, G_pad - G), (0, 0)))

    # Split W1 so the concat never has to be materialized:
    # cat([src, dest, edge, u[batch]]) @ W1 == src@W1s + dest@W1d + edge@W1e + u[batch]@W1u
    w1 = params["w1"]
    w1s = w1[:Fn]
    w1d = w1[Fn:2 * Fn]
    w1e = w1[2 * Fn:2 * Fn + Fe]
    w1u = w1[2 * Fn + Fe:]

    cd = compute_dtype
    to_cd = lambda a: a.astype(cd)   # bf16 over HBM; biases stay f32 for exact f32 adds

    kernel = functools.partial(edge_mlp_kernel, compute_dtype=cd)
    row = lambda f: pl.BlockSpec((tile_m, f), lambda i: (i, 0))
    full = lambda r, c: pl.BlockSpec((r, c), lambda i: (0, 0))

    out = pl.pallas_call(
        kernel,
        out_shape=jax.ShapeDtypeStruct((E_pad, O), out_dtype),
        grid_spec=pltpu.PrefetchScalarGridSpec(
            num_scalar_prefetch=0,
            grid=(E_pad // tile_m,),
            in_specs=[
                row(1),                # batch ids (int32, per edge)
                row(Fn),               # src
                row(Fn),               # dest
                row(Fe),               # edge_attr
                full(G_pad, Fg),       # u table, fully resident in VMEM
                full(Fn, H), full(Fn, H), full(Fe, H), full(Fg, H),   # W1 blocks
                full(1, H),            # b1 (f32)
                full(H, H), full(1, H),                                # W2, b2
                full(H, O), full(1, O),                                # W3, b3
            ],
            out_specs=row(O),
        ),
        compiler_params=pltpu.CompilerParams(
            dimension_semantics=("parallel",),   # row tiles shard across TCs on v7x
        ),
    )(batch2d, to_cd(src), to_cd(dest), to_cd(edge_attr), to_cd(u_p),
      to_cd(w1s), to_cd(w1d), to_cd(w1e), to_cd(w1u), params["b1"],
      to_cd(params["w2"]), params["b2"], to_cd(params["w3"]), params["b3"])

    return out[:E] if pad else out


def init_params(key, in_size, hidden, out_size):
    """Deterministic PyTorch-Linear-style init: U(-1/sqrt(fan_in), 1/sqrt(fan_in))."""
    def linear(k, fan_in, fan_out):
        kw, kb = jax.random.split(k)
        bound = 1.0 / jnp.sqrt(fan_in)
        w = jax.random.uniform(kw, (fan_in, fan_out), jnp.float32, -bound, bound)
        b = jax.random.uniform(kb, (1, fan_out), jnp.float32, -bound, bound)
        return w, b

    k1, k2, k3 = jax.random.split(key, 3)
    w1, b1 = linear(k1, in_size, hidden)
    w2, b2 = linear(k2, hidden, hidden)
    w3, b3 = linear(k3, hidden, out_size)
    return dict(w1=w1, b1=b1, w2=w2, b2=b2, w3=w3, b3=b3)


if __name__ == "__main__":
    # Small synthetic graph-batch shapes consistent with the module.
    node_input_size = 8
    edge_input_size = 8
    global_input_size = 8
    hidden_size = 32
    edge_output_size = 16
    num_edges = 1024          # -> grid of 2 tiles at tile_m=512 (both TCs busy on v7x)
    num_graphs = 2

    in_size = 2 * node_input_size + edge_input_size + global_input_size  # 32

    key = jax.random.PRNGKey(0)
    k_src, k_dst, k_edge, k_u, k_batch, k_params = jax.random.split(key, 6)

    src = jax.random.normal(k_src, (num_edges, node_input_size), jnp.float32)
    dest = jax.random.normal(k_dst, (num_edges, node_input_size), jnp.float32)
    edge_attr = jax.random.normal(k_edge, (num_edges, edge_input_size), jnp.float32)
    u = jax.random.normal(k_u, (num_graphs, global_input_size), jnp.float32)
    batch = jax.random.randint(k_batch, (num_edges,), 0, num_graphs, jnp.int32)

    params = init_params(k_params, in_size, hidden_size, edge_output_size)

    out = edge_model_forward(src, dest, edge_attr, u, batch, params,
                             tile_m=512, compute_dtype=jnp.bfloat16)
    out = jax.block_until_ready(out)
    assert out.shape == (num_edges, edge_output_size)

    # Pure-JAX reference of the same forward (matching bf16-over-HBM / f32-accum math).
    cd = jnp.bfloat16
    x = jnp.concatenate([src, dest, edge_attr, u[batch]], axis=-1).astype(cd)
    h1 = jnp.maximum(jnp.dot(x, params["w1"].astype(cd),
                             preferred_element_type=jnp.float32) + params["b1"], 0.0).astype(cd)
    h2 = jnp.maximum(jnp.dot(h1, params["w2"].astype(cd),
                             preferred_element_type=jnp.float32) + params["b2"], 0.0).astype(cd)
    ref = jnp.dot(h2, params["w3"].astype(cd),
                  preferred_element_type=jnp.float32) + params["b3"]

    err = jnp.max(jnp.abs(out.astype(jnp.float32) - ref))
    assert jnp.allclose(out.astype(jnp.float32), ref, atol=3e-2, rtol=3e-2), float(err)

    print("KERNEL_OK")
</pallas_src>

<mosaic_0001>
module attributes {stable_mosaic.version = 11 : i64} {
  func.func @edge_mlp_kernel(%arg0: i32, %arg1: memref<512x1xi32, #tpu.memory_space<vmem>>, %arg2: memref<512x8xbf16, #tpu.memory_space<vmem>>, %arg3: memref<512x8xbf16, #tpu.memory_space<vmem>>, %arg4: memref<512x8xbf16, #tpu.memory_space<vmem>>, %arg5: memref<8x8xbf16, #tpu.memory_space<vmem>>, %arg6: memref<8x32xbf16, #tpu.memory_space<vmem>>, %arg7: memref<8x32xbf16, #tpu.memory_space<vmem>>, %arg8: memref<8x32xbf16, #tpu.memory_space<vmem>>, %arg9: memref<8x32xbf16, #tpu.memory_space<vmem>>, %arg10: memref<1x32xf32, #tpu.memory_space<vmem>>, %arg11: memref<32x32xbf16, #tpu.memory_space<vmem>>, %arg12: memref<1x32xf32, #tpu.memory_space<vmem>>, %arg13: memref<32x16xbf16, #tpu.memory_space<vmem>>, %arg14: memref<1x16xf32, #tpu.memory_space<vmem>>, %arg15: memref<512x16xbf16, #tpu.memory_space<vmem>>) attributes {dimension_semantics = [#tpu.dimension_semantics<parallel>], iteration_bounds = array<i64: 2>, scalar_prefetch = 0 : i64, scratch_operands = 0 : i64, tpu.core_type = #tpu.core_type<tc>, window_params = [{transform_indices = @transform_0, window_bounds = array<i64: 512, 1>}, {transform_indices = @transform_1, window_bounds = array<i64: 512, 8>}, {transform_indices = @transform_2, window_bounds = array<i64: 512, 8>}, {transform_indices = @transform_3, window_bounds = array<i64: 512, 8>}, {pipeline_mode = #tpu.pipeline_mode<synchronous>, transform_indices = @transform_4, window_bounds = array<i64: 8, 8>}, {pipeline_mode = #tpu.pipeline_mode<synchronous>, transform_indices = @transform_5, window_bounds = array<i64: 8, 32>}, {pipeline_mode = #tpu.pipeline_mode<synchronous>, transform_indices = @transform_6, window_bounds = array<i64: 8, 32>}, {pipeline_mode = #tpu.pipeline_mode<synchronous>, transform_indices = @transform_7, window_bounds = array<i64: 8, 32>}, {pipeline_mode = #tpu.pipeline_mode<synchronous>, transform_indices = @transform_8, window_bounds = array<i64: 8, 32>}, {pipeline_mode = #tpu.pipeline_mode<synchronous>, transform_indices = @transform_9, window_bounds = array<i64: 1, 32>}, {pipeline_mode = #tpu.pipeline_mode<synchronous>, transform_indices = @transform_10, window_bounds = array<i64: 32, 32>}, {pipeline_mode = #tpu.pipeline_mode<synchronous>, transform_indices = @transform_11, window_bounds = array<i64: 1, 32>}, {pipeline_mode = #tpu.pipeline_mode<synchronous>, transform_indices = @transform_12, window_bounds = array<i64: 32, 16>}, {pipeline_mode = #tpu.pipeline_mode<synchronous>, transform_indices = @transform_13, window_bounds = array<i64: 1, 16>}, {transform_indices = @transform_14, window_bounds = array<i64: 512, 16>}]} {
    %c0 = arith.constant 0 : index
    %c0_0 = arith.constant 0 : index
    %0 = vector.load %arg1[%c0, %c0_0] : memref<512x1xi32, #tpu.memory_space<vmem>>, vector<512x1xi32>
    %1 = tpu.iota {dimensions = array<i32: 1>} : vector<512x8xi32>
    %2 = vector.broadcast %0 : vector<512x1xi32> to vector<512x8xi32>
    %3 = arith.cmpi eq, %2, %1 : vector<512x8xi32>
    %4 = arith.extui %3 : vector<512x8xi1> to vector<512x8xi32>
    %5 = arith.sitofp %4 : vector<512x8xi32> to vector<512x8xf32>
    %6 = arith.truncf %5 : vector<512x8xf32> to vector<512x8xbf16>
    %c0_1 = arith.constant 0 : index
    %c0_2 = arith.constant 0 : index
    %7 = vector.load %arg5[%c0_1, %c0_2] : memref<8x8xbf16, #tpu.memory_space<vmem>>, vector<8x8xbf16>
    %cst = arith.constant dense<0.000000e+00> : vector<512x8xf32>
    %8 = tpu.matmul %6, %7, %cst {dimension_numbers = #tpu.dot_dimension_numbers<[1], [0], [0], [1], [0, 0, 1, 1], [], []>} : vector<512x8xbf16>, vector<8x8xbf16>, vector<512x8xf32> -> vector<512x8xf32>
    %9 = arith.truncf %8 : vector<512x8xf32> to vector<512x8xbf16>
    %c0_3 = arith.constant 0 : index
    %c0_4 = arith.constant 0 : index
    %10 = vector.load %arg2[%c0_3, %c0_4] : memref<512x8xbf16, #tpu.memory_space<vmem>>, vector<512x8xbf16>
    %c0_5 = arith.constant 0 : index
    %c0_6 = arith.constant 0 : index
    %11 = vector.load %arg6[%c0_5, %c0_6] : memref<8x32xbf16, #tpu.memory_space<vmem>>, vector<8x32xbf16>
    %cst_7 = arith.constant dense<0.000000e+00> : vector<512x32xf32>
    %12 = tpu.matmul %10, %11, %cst_7 {dimension_numbers = #tpu.dot_dimension_numbers<[1], [0], [0], [1], [0, 0, 1, 1], [], []>} : vector<512x8xbf16>, vector<8x32xbf16>, vector<512x32xf32> -> vector<512x32xf32>
    %c0_8 = arith.constant 0 : index
    %c0_9 = arith.constant 0 : index
    %13 = vector.load %arg3[%c0_8, %c0_9] : memref<512x8xbf16, #tpu.memory_space<vmem>>, vector<512x8xbf16>
    %c0_10 = arith.constant 0 : index
    %c0_11 = arith.constant 0 : index
    %14 = vector.load %arg7[%c0_10, %c0_11] : memref<8x32xbf16, #tpu.memory_space<vmem>>, vector<8x32xbf16>
    %cst_12 = arith.constant dense<0.000000e+00> : vector<512x32xf32>
    %15 = tpu.matmul %13, %14, %cst_12 {dimension_numbers = #tpu.dot_dimension_numbers<[1], [0], [0], [1], [0, 0, 1, 1], [], []>} : vector<512x8xbf16>, vector<8x32xbf16>, vector<512x32xf32> -> vector<512x32xf32>
    %16 = arith.addf %12, %15 : vector<512x32xf32>
    %c0_13 = arith.constant 0 : index
    %c0_14 = arith.constant 0 : index
    %17 = vector.load %arg4[%c0_13, %c0_14] : memref<512x8xbf16, #tpu.memory_space<vmem>>, vector<512x8xbf16>
    %c0_15 = arith.constant 0 : index
    %c0_16 = arith.constant 0 : index
    %18 = vector.load %arg8[%c0_15, %c0_16] : memref<8x32xbf16, #tpu.memory_space<vmem>>, vector<8x32xbf16>
    %cst_17 = arith.constant dense<0.000000e+00> : vector<512x32xf32>
    %19 = tpu.matmul %17, %18, %cst_17 {dimension_numbers = #tpu.dot_dimension_numbers<[1], [0], [0], [1], [0, 0, 1, 1], [], []>} : vector<512x8xbf16>, vector<8x32xbf16>, vector<512x32xf32> -> vector<512x32xf32>
    %20 = arith.addf %16, %19 : vector<512x32xf32>
    %c0_18 = arith.constant 0 : index
    %c0_19 = arith.constant 0 : index
    %21 = vector.load %arg9[%c0_18, %c0_19] : memref<8x32xbf16, #tpu.memory_space<vmem>>, vector<8x32xbf16>
    %cst_20 = arith.constant dense<0.000000e+00> : vector<512x32xf32>
    %22 = tpu.matmul %9, %21, %cst_20 {dimension_numbers = #tpu.dot_dimension_numbers<[1], [0], [0], [1], [0, 0, 1, 1], [], []>} : vector<512x8xbf16>, vector<8x32xbf16>, vector<512x32xf32> -> vector<512x32xf32>
    %23 = arith.addf %20, %22 : vector<512x32xf32>
    %c0_21 = arith.constant 0 : index
    %c0_22 = arith.constant 0 : index
    %24 = vector.load %arg10[%c0_21, %c0_22] : memref<1x32xf32, #tpu.memory_space<vmem>>, vector<1x32xf32>
    %25 = vector.broadcast %24 : vector<1x32xf32> to vector<512x32xf32>
    %26 = arith.addf %23, %25 : vector<512x32xf32>
    %cst_23 = arith.constant 0.000000e+00 : f32
    %27 = vector.broadcast %cst_23 : f32 to vector<512x32xf32>
    %28 = arith.maximumf %26, %27 : vector<512x32xf32>
    %29 = arith.truncf %28 : vector<512x32xf32> to vector<512x32xbf16>
    %c0_24 = arith.constant 0 : index
    %c0_25 = arith.constant 0 : index
    %30 = vector.load %arg11[%c0_24, %c0_25] : memref<32x32xbf16, #tpu.memory_space<vmem>>, vector<32x32xbf16>
    %cst_26 = arith.constant dense<0.000000e+00> : vector<512x32xf32>
    %31 = tpu.matmul %29, %30, %cst_26 {dimension_numbers = #tpu.dot_dimension_numbers<[1], [0], [0], [1], [0, 0, 1, 1], [], []>} : vector<512x32xbf16>, vector<32x32xbf16>, vector<512x32xf32> -> vector<512x32xf32>
    %c0_27 = arith.constant 0 : index
    %c0_28 = arith.constant 0 : index
    %32 = vector.load %arg12[%c0_27, %c0_28] : memref<1x32xf32, #tpu.memory_space<vmem>>, vector<1x32xf32>
    %33 = vector.broadcast %32 : vector<1x32xf32> to vector<512x32xf32>
    %34 = arith.addf %31, %33 : vector<512x32xf32>
    %cst_29 = arith.constant 0.000000e+00 : f32
    %35 = vector.broadcast %cst_29 : f32 to vector<512x32xf32>
    %36 = arith.maximumf %34, %35 : vector<512x32xf32>
    %37 = arith.truncf %36 : vector<512x32xf32> to vector<512x32xbf16>
    %c0_30 = arith.constant 0 : index
    %c0_31 = arith.constant 0 : index
    %38 = vector.load %arg13[%c0_30, %c0_31] : memref<32x16xbf16, #tpu.memory_space<vmem>>, vector<32x16xbf16>
    %cst_32 = arith.constant dense<0.000000e+00> : vector<512x16xf32>
    %39 = tpu.matmul %37, %38, %cst_32 {dimension_numbers = #tpu.dot_dimension_numbers<[1], [0], [0], [1], [0, 0, 1, 1], [], []>} : vector<512x32xbf16>, vector<32x16xbf16>, vector<512x16xf32> -> vector<512x16xf32>
    %c0_33 = arith.constant 0 : index
    %c0_34 = arith.constant 0 : index
    %40 = vector.load %arg14[%c0_33, %c0_34] : memref<1x16xf32, #tpu.memory_space<vmem>>, vector<1x16xf32>
    %41 = vector.broadcast %40 : vector<1x16xf32> to vector<512x16xf32>
    %42 = arith.addf %39, %41 : vector<512x16xf32>
    %43 = arith.truncf %42 : vector<512x16xf32> to vector<512x16xbf16>
    %c0_35 = arith.constant 0 : index
    %c0_36 = arith.constant 0 : index
    %44 = vector.load %arg15[%c0_35, %c0_36] : memref<512x16xbf16, #tpu.memory_space<vmem>>, vector<512x16xbf16>
    tpu.vector_store %arg15[%c0_35, %c0_36], %43 {strides = array<i32>} : memref<512x16xbf16, #tpu.memory_space<vmem>>, vector<512x16xbf16>,
    return
  }
  func.func @transform_0(%arg0: i32) -> (i32, i32) {
    %c0_i32 = arith.constant 0 : i32
    %c0_i32_0 = arith.constant 0 : i32
    return %arg0, %c0_i32 : i32, i32
  }
  func.func @transform_1(%arg0: i32) -> (i32, i32) {
    %c0_i32 = arith.constant 0 : i32
    %c0_i32_0 = arith.constant 0 : i32
    return %arg0, %c0_i32 : i32, i32
  }
  func.func @transform_2(%arg0: i32) -> (i32, i32) {
    %c0_i32 = arith.constant 0 : i32
    %c0_i32_0 = arith.constant 0 : i32
    return %arg0, %c0_i32 : i32, i32
  }
  func.func @transform_3(%arg0: i32) -> (i32, i32) {
    %c0_i32 = arith.constant 0 : i32
    %c0_i32_0 = arith.constant 0 : i32
    return %arg0, %c0_i32 : i32, i32
  }
  func.func @transform_4(%arg0: i32) -> (i32, i32) {
    %c0_i32 = arith.constant 0 : i32
    %c0_i32_0 = arith.constant 0 : i32
    %c0_i32_1 = arith.constant 0 : i32
    return %c0_i32, %c0_i32_0 : i32, i32
  }
  func.func @transform_5(%arg0: i32) -> (i32, i32) {
    %c0_i32 = arith.constant 0 : i32
    %c0_i32_0 = arith.constant 0 : i32
    %c0_i32_1 = arith.constant 0 : i32
    return %c0_i32, %c0_i32_0 : i32, i32
  }
  func.func @transform_6(%arg0: i32) -> (i32, i32) {
    %c0_i32 = arith.constant 0 : i32
    %c0_i32_0 = arith.constant 0 : i32
    %c0_i32_1 = arith.constant 0 : i32
    return %c0_i32, %c0_i32_0 : i32, i32
  }
  func.func @transform_7(%arg0: i32) -> (i32, i32) {
    %c0_i32 = arith.constant 0 : i32
    %c0_i32_0 = arith.constant 0 : i32
    %c0_i32_1 = arith.constant 0 : i32
    return %c0_i32, %c0_i32_0 : i32, i32
  }
  func.func @transform_8(%arg0: i32) -> (i32, i32) {
    %c0_i32 = arith.constant 0 : i32
    %c0_i32_0 = arith.constant 0 : i32
    %c0_i32_1 = arith.constant 0 : i32
    return %c0_i32, %c0_i32_0 : i32, i32
  }
  func.func @transform_9(%arg0: i32) -> (i32, i32) {
    %c0_i32 = arith.constant 0 : i32
    %c0_i32_0 = arith.constant 0 : i32
    %c0_i32_1 = arith.constant 0 : i32
    return %c0_i32, %c0_i32_0 : i32, i32
  }
  func.func @transform_10(%arg0: i32) -> (i32, i32) {
    %c0_i32 = arith.constant 0 : i32
    %c0_i32_0 = arith.constant 0 : i32
    %c0_i32_1 = arith.constant 0 : i32
    return %c0_i32, %c0_i32_0 : i32, i32
  }
  func.func @transform_11(%arg0: i32) -> (i32, i32) {
    %c0_i32 = arith.constant 0 : i32
    %c0_i32_0 = arith.constant 0 : i32
    %c0_i32_1 = arith.constant 0 : i32
    return %c0_i32, %c0_i32_0 : i32, i32
  }
  func.func @transform_12(%arg0: i32) -> (i32, i32) {
    %c0_i32 = arith.constant 0 : i32
    %c0_i32_0 = arith.constant 0 : i32
    %c0_i32_1 = arith.constant 0 : i32
    return %c0_i32, %c0_i32_0 : i32, i32
  }
  func.func @transform_13(%arg0: i32) -> (i32, i32) {
    %c0_i32 = arith.constant 0 : i32
    %c0_i32_0 = arith.constant 0 : i32
    %c0_i32_1 = arith.constant 0 : i32
    return %c0_i32, %c0_i32_0 : i32, i32
  }
  func.func @transform_14(%arg0: i32) -> (i32, i32) {
    %c0_i32 = arith.constant 0 : i32
    %c0_i32_0 = arith.constant 0 : i32
    return %arg0, %c0_i32 : i32, i32
  }
}

</mosaic_0001>

<bundles_post_ra>
// kernel: tpu_custom_call.1
= control target key start
LH: loop header
LB: loop body
LE: loop exit
PB: predicated region body
PF: predicated region fallthrough
CT: control target
= control target key end

     0   :  { %s5163_s29 = smov 0   ;;  %s6669_s0 = inlined_call_operand.vmem [shape: s32[1024,1], index: 0, kind: input, shape index: {}]   ;;  %s6670_s1 = inlined_call_operand.vmem [shape: bf16[1024,8], index: 1, kind: input, shape index: {}]   ;;  %s6671_s2 = inlined_call_operand.vmem [shape: bf16[1024,8], index: 2, kind: input, shape index: {}]   ;;  %s6672_s3 = inlined_call_operand.vmem [shape: bf16[1024,8], index: 3, kind: input, shape index: {}]   ;;  %s6673_s4 = inlined_call_operand.vmem [shape: bf16[8,8], index: 4, kind: input, shape index: {}]   ;;  %s6674_s5 = inlined_call_operand.vmem [shape: bf16[8,32], index: 5, kind: input, shape index: {}]   ;;  %s6675_s6 = inlined_call_operand.vmem [shape: bf16[8,32], index: 6, kind: input, shape index: {}]   ;;  %s6676_s7 = inlined_call_operand.vmem [shape: bf16[8,32], index: 7, kind: input, shape index: {}]   ;;  %s6677_s8 = inlined_call_operand.vmem [shape: bf16[8,32], index: 8, kind: input, shape index: {}]   ;;  %s6678_s9 = inlined_call_operand.vmem [shape: f32[1,32], index: 9, kind: input, shape index: {}]   ;;  %s6679_s10 = inlined_call_operand.vmem [shape: bf16[32,32], index: 10, kind: input, shape index: {}]   ;;  %s6680_s11 = inlined_call_operand.vmem [shape: f32[1,32], index: 11, kind: input, shape index: {}]   ;;  %s6681_s12 = inlined_call_operand.vmem [shape: bf16[32,16], index: 12, kind: input, shape index: {}]   ;;  %s6682_s13 = inlined_call_operand.vmem [shape: f32[1,16], index: 13, kind: input, shape index: {}]   ;;  %s6683_s14 = inlined_call_operand.vmem [shape: bf16[1024,16], index: 14, kind: output, shape index: {}]  }
   0x1 LB: > { %s4251_s30 = sadd.s32 4294967295, %s5084_s29   ;;  %p4255_p0 = scmp.ge.s32.totalorder %s5084_s29, 1  ;;  %s5084_s29 = sphi %s5163_s29, %s24_s29  }
   0x2   : > { %p446_p1 = scmp.lt.s32.totalorder %s5084_s29, 3 }
   0x4   : > { %p447_p2 = pnand %p4255_p0, %p446_p1 }
   0x6   : > { %450 = sbr.rel (%p447_p2) target bundleno = 1460 (0x5b4), region = 76 }
   0xb   : > { %s4256_s15 = sshll.u32 %s4251_s30, 6  ;;  %v5086_v0 = vmov 0   ;;  %v1020_v37 = vld [vmem:[%s6673_s4] sm:$0xf]  ;;  %vm1118_vm0 = vcmask 1043456   ;;  %v602_v52 = vlaneseq  ;;  %v6684_v61 = vmov 0.0  }
   0xc   : > { %5071 = vset.pattern.permute.xlu2 %v5086_v0  ;;  %5070 = vset.pattern.permute.xlu1 %v5086_v0  ;;  %p508_p3 = scmp.lt.s32.totalorder %s4256_s15, 127  ;;  %v1120_v38 = vsel %vm1118_vm0, %v1020_v37, 0  ;;  %v1452_v42 = vld [vmem:[%s6675_s6] sm:$0xf]  ;;  %vm1021_vm5 = vcmask 64512  }
   0xd   : > { %5069 = vset.pattern.permute.xlu0 %v5086_v0  ;;  %1129 = vmatpush.bf16.msra.mxu0 %v1120_v38  ;;  %v1710_v43 = vsel %vm1118_vm0, %v1452_v42, 0  ;;  %v2866_v47 = vld [vmem:[%s6677_s8] sm:$0xf]  ;;  %v5236_v55 = vand.u32 127, %v602_v52 }
   0xe   : > { %s6883_s15 = smov (!%p508_p3, %s4256_s15), 127  ;;  %5056 = vmatpush.bf16.msra.mxu3 %v1120_v38  ;;  %1719 = vmatpush.bf16.msra.mxu1 %v1710_v43  ;;  %v2964_v48 = vsel %vm1118_vm0, %v2866_v47, 0 }
   0xf   : > { %s4257_s16 = sshll.u32 %s6883_s15, 3  ;;  %s5332_s28 = sshll.u32 %s6883_s15, 2 }
  0x10   : > { %s5177_s19 = scalar_lea.vmem %s6669_s0, %s4257_s16  ;;  %s5338_s17 = scalar_lea.vmem %s6670_s1, %s5332_s28 }
  0x11   : > { %v588_v1 = vld [vmem:[%s5177_s19 + $0x190] sm:$0xff]  ;;  %v586_v2 = vld [vmem:[%s5177_s19 + $0x180] sm:$0xff]  ;;  %v589_v4 = vld [vmem:[%s5177_s19 + $0x198] sm:$0xff]  ;;  %2973 = vmatpush.bf16.msrb.mxu0 %v2964_v48  ;;  %s5764_s15 = scalar_lea.vmem %s6672_s3, %s5332_s28  ;;  %s6268_s27 = scalar_lea.vmem %s6683_s14, %s5332_s28 }
  0x12   : > { %v538_v3 = vld [vmem:[%s5177_s19] sm:$0xff]  ;;  %755 = vperm.xlu2 %5071, %v588_v1   ;;  %749 = vperm.xlu0 %5069, %v586_v2   ;;  %v587_v5 = vld [vmem:[%s5177_s19 + $0x188] sm:$0xff]  ;;  %v540_v8 = vld [vmem:[%s5177_s19 + $0x10] sm:$0xff] }
  0x13   : > { %605 = vperm.xlu1 %5070, %v538_v3   ;;  %v539_v6 = vld [vmem:[%s5177_s19 + $0x8] sm:$0xff]  ;;  %v590_v7 = vld [vmem:[%s5177_s19 + $0x1a0] sm:$0xff]  ;;  %v541_v9 = vld [vmem:[%s5177_s19 + $0x18] sm:$0xff]  ;;  %5057 = vmatpush.bf16.msrb.mxu3 %v1710_v43 }
  0x14   : > { %v543_v10 = vld [vmem:[%s5177_s19 + $0x28] sm:$0xff]  ;;  %v542_v12 = vld [vmem:[%s5177_s19 + $0x20] sm:$0xff]  ;;  %v544_v13 = vld [vmem:[%s5177_s19 + $0x30] sm:$0xff] }
  0x15   : > { %v591_v11 = vld [vmem:[%s5177_s19 + $0x1a8] sm:$0xff]  ;;  %v592_v14 = vld [vmem:[%s5177_s19 + $0x1b0] sm:$0xff]  ;;  %v593_v15 = vld [vmem:[%s5177_s19 + $0x1b8] sm:$0xff] }
  0x16   : > { %v595_v16 = vld [vmem:[%s5177_s19 + $0x1c8] sm:$0xff]  ;;  %v545_v17 = vld [vmem:[%s5177_s19 + $0x38] sm:$0xff]  ;;  %v594_v18 = vld [vmem:[%s5177_s19 + $0x1c0] sm:$0xff] }
  0x17   : > { %v596_v19 = vld [vmem:[%s5177_s19 + $0x1d0] sm:$0xff]  ;;  %v546_v20 = vld [vmem:[%s5177_s19 + $0x40] sm:$0xff]  ;;  %v547_v21 = vld [vmem:[%s5177_s19 + $0x48] sm:$0xff] }
  0x18   : > { %v549_v22 = vld [vmem:[%s5177_s19 + $0x58] sm:$0xff]  ;;  %v548_v24 = vld [vmem:[%s5177_s19 + $0x50] sm:$0xff]  ;;  %v550_v25 = vld [vmem:[%s5177_s19 + $0x60] sm:$0xff] }
  0x19   : > { %v597_v23 = vld [vmem:[%s5177_s19 + $0x1d8] sm:$0xff]  ;;  %v598_v26 = vld [vmem:[%s5177_s19 + $0x1e0] sm:$0xff]  ;;  %v599_v27 = vld [vmem:[%s5177_s19 + $0x1e8] sm:$0xff] }
  0x1a   : > { %758 = vperm.xlu2 %5071, %v589_v4   ;;  %752 = vperm.xlu0 %5069, %v587_v5   ;;  %v601_v28 = vld [vmem:[%s5177_s19 + $0x1f8] sm:$0xff]  ;;  %v551_v29 = vld [vmem:[%s5177_s19 + $0x68] sm:$0xff]  ;;  %v600_v30 = vld [vmem:[%s5177_s19 + $0x1f0] sm:$0xff] }
  0x1b   : > { %608 = vperm.xlu1 %5070, %v539_v6   ;;  %v554_v31 = vld [vmem:[%s5177_s19 + $0x80] sm:$0xff]  ;;  %v552_v32 = vld [vmem:[%s5177_s19 + $0x70] sm:$0xff]  ;;  %v553_v33 = vld [vmem:[%s5177_s19 + $0x78] sm:$0xff] }
  0x1c   : > { %v557_v34 = vld [vmem:[%s5177_s19 + $0x98] sm:$0xff]  ;;  %v555_v35 = vld [vmem:[%s5177_s19 + $0x88] sm:$0xff]  ;;  %v556_v36 = vld [vmem:[%s5177_s19 + $0x90] sm:$0xff] }
  0x1d   : > { %v560_v39 = vld [vmem:[%s5177_s19 + $0xb0] sm:$0xff]  ;;  %v558_v40 = vld [vmem:[%s5177_s19 + $0xa0] sm:$0xff]  ;;  %v559_v41 = vld [vmem:[%s5177_s19 + $0xa8] sm:$0xff] }
  0x1e   : > { %v563_v44 = vld [vmem:[%s5177_s19 + $0xc8] sm:$0xff]  ;;  %v561_v45 = vld [vmem:[%s5177_s19 + $0xb8] sm:$0xff]  ;;  %v562_v46 = vld [vmem:[%s5177_s19 + $0xc0] sm:$0xff] }
  0x1f   : > { %v566_v49 = vld [vmem:[%s5177_s19 + $0xe0] sm:$0xff]  ;;  %v564_v50 = vld [vmem:[%s5177_s19 + $0xd0] sm:$0xff]  ;;  %v565_v51 = vld [vmem:[%s5177_s19 + $0xd8] sm:$0xff] }
  0x20   : > { %v569_v56 = vld [vmem:[%s5177_s19 + $0xf8] sm:$0xff]  ;;  %v567_v57 = vld [vmem:[%s5177_s19 + $0xe8] sm:$0xff]  ;;  %v568_v58 = vld [vmem:[%s5177_s19 + $0xf0] sm:$0xff] }
  0x21   : > { %v572_v4 = vld [vmem:[%s5177_s19 + $0x110] sm:$0xff]  ;;  %v570_v6 = vld [vmem:[%s5177_s19 + $0x100] sm:$0xff]  ;;  %v585_v42 = vld [vmem:[%s5177_s19 + $0x178] sm:$0xff] }
  0x22   : > { %761 = vperm.xlu2 %5071, %v590_v7   ;;  %611 = vperm.xlu0 %5069, %v540_v8   ;;  %v571_v7 = vld [vmem:[%s5177_s19 + $0x108] sm:$0xff]  ;;  %v582_v38 = vld [vmem:[%s5177_s19 + $0x160] sm:$0xff] }
  0x23   : > { %614 = vperm.xlu1 %5070, %v541_v9  }
  0x2a   : > { %620 = vperm.xlu2 %5071, %v543_v10   ;;  %764 = vperm.xlu0 %5069, %v591_v11   ;;  %v575_v11 = vld [vmem:[%s5177_s19 + $0x128] sm:$0xff] }
  0x2b   : > { %617 = vperm.xlu1 %5070, %v542_v12   ;;  %v573_v12 = vld [vmem:[%s5177_s19 + $0x118] sm:$0xff] }
  0x32   : > { %623 = vperm.xlu2 %5071, %v544_v13   ;;  %767 = vperm.xlu0 %5069, %v592_v14   ;;  %v574_v13 = vld [vmem:[%s5177_s19 + $0x120] sm:$0xff] }
  0x33   : > { %770 = vperm.xlu1 %5070, %v593_v15  }
  0x3a   : > { %776 = vperm.xlu2 %5071, %v595_v16   ;;  %626 = vperm.xlu0 %5069, %v545_v17  }
  0x3b   : > { %773 = vperm.xlu1 %5070, %v594_v18  }
  0x42   : > { %779 = vperm.xlu2 %5071, %v596_v19   ;;  %629 = vperm.xlu0 %5069, %v546_v20   ;;  %v578_v19 = vld [vmem:[%s5177_s19 + $0x140] sm:$0xff] }
  0x43   : > { %632 = vperm.xlu1 %5070, %v547_v21   ;;  %v576_v21 = vld [vmem:[%s5177_s19 + $0x130] sm:$0xff] }
  0x4a   : > { %638 = vperm.xlu2 %5071, %v549_v22   ;;  %782 = vperm.xlu0 %5069, %v597_v23   ;;  %v577_v22 = vld [vmem:[%s5177_s19 + $0x138] sm:$0xff] }
  0x4b   : > { %635 = vperm.xlu1 %5070, %v548_v24  }
  0x52   : > { %641 = vperm.xlu2 %5071, %v550_v25   ;;  %785 = vperm.xlu0 %5069, %v598_v26   ;;  %v581_v26 = vld [vmem:[%s5177_s19 + $0x158] sm:$0xff] }
  0x53   : > { %788 = vperm.xlu1 %5070, %v599_v27   ;;  %v579_v27 = vld [vmem:[%s5177_s19 + $0x148] sm:$0xff] }
  0x5a   : > { %794 = vperm.xlu2 %5071, %v601_v28   ;;  %644 = vperm.xlu0 %5069, %v551_v29   ;;  %v580_v28 = vld [vmem:[%s5177_s19 + $0x150] sm:$0xff] }
  0x5b   : > { %791 = vperm.xlu1 %5070, %v600_v30  }
  0x62   : > { %653 = vperm.xlu2 %5071, %v554_v31   ;;  %647 = vperm.xlu0 %5069, %v552_v32  }
  0x63   : > { %650 = vperm.xlu1 %5070, %v553_v33  }
  0x6a   : > { %662 = vperm.xlu2 %5071, %v557_v34   ;;  %656 = vperm.xlu0 %5069, %v555_v35  }
  0x6b   : > { %659 = vperm.xlu1 %5070, %v556_v36   ;;  %v584_v36 = vld [vmem:[%s5177_s19 + $0x170] sm:$0xff] }
  0x6c   : > { %v756_v59 = vpop.permute.xlu2 %755 }
  0x6d   : > { %vm846_vm6 = vcmp.eq.s32.totalorder %v756_v59, %v5236_v55 }
  0x6e   : > { %v4316_v14 = vsel %vm846_vm6, 1.0, %v6684_v61 }
  0x72   : > { %671 = vperm.xlu2 %5071, %v560_v39   ;;  %665 = vperm.xlu0 %5069, %v558_v40   ;;  %v583_v39 = vld [vmem:[%s5177_s19 + $0x168] sm:$0xff]  ;;  %s5353_s19 = scalar_lea.vmem %s6671_s2, %s5332_s28 }
  0x73   : > { %668 = vperm.xlu1 %5070, %v559_v41  }
  0x74   : > { %v759_v8 = vpop.permute.xlu2 %758 }
  0x75   : > { %vm847_vm7 = vcmp.eq.s32.totalorder %v759_v8, %v5236_v55 }
  0x76   : > { %v4317_v15 = vsel %vm847_vm7, 1.0, %v6684_v61 }
  0x77   : > { %v1013_v18 = vpack.c.bf16 %v4317_v15, %v4316_v14 }
  0x7a   : > { %680 = vperm.xlu2 %5071, %v563_v44   ;;  %674 = vperm.xlu0 %5069, %v561_v45  }
  0x7b   : > { %677 = vperm.xlu1 %5070, %v562_v46  }
  0x7c   : > { %v762_v23 = vpop.permute.xlu2 %761 }
  0x7d   : > { %vm848_vm12 = vcmp.eq.s32.totalorder %v762_v23, %v5236_v55 }
  0x7e   : > { %v4318_v33 = vsel %vm848_vm12, 1.0, %v6684_v61 }
  0x82   : > { %689 = vperm.xlu2 %5071, %v566_v49   ;;  %683 = vperm.xlu0 %5069, %v564_v50  }
  0x83   : > { %686 = vperm.xlu1 %5070, %v565_v51  }
  0x84   : > { %v750_v53 = vpop.permute.xlu0 %749  ;;  %v621_v29 = vpop.permute.xlu2 %620 }
  0x85   : > { %v606_v54 = vpop.permute.xlu1 %605  ;;  %vm844_vm2 = vcmp.eq.s32.totalorder %v750_v53, %v5236_v55  ;;  %vm801_vm13 = vcmp.eq.s32.totalorder %v621_v29, %v5236_v55  ;;  %v4988_v29 = vld [vmem:[%s5353_s19] sm:$0xff] }
  0x86   : > { %vm796_vm1 = vcmp.eq.s32.totalorder %v606_v54, %v5236_v55  ;;  %v4314_v0 = vsel %vm844_vm2, 1.0, %v6684_v61  ;;  %v4271_v34 = vsel %vm801_vm13, 1.0, %v6684_v61  ;;  %4490 = vmatmul.msk.bf16.vlgmr.msra.gmra.mxu1 %vm1021_vm5, %v4988_v29 }
  0x87   : > { %v4266_v62 = vsel %vm796_vm1, 1.0, %v6684_v61 }
  0x8a   : > { %698 = vperm.xlu2 %5071, %v569_v56   ;;  %692 = vperm.xlu0 %5069, %v567_v57  }
  0x8b   : > { %695 = vperm.xlu1 %5070, %v568_v58  }
  0x8c   : > { %v753_v60 = vpop.permute.xlu0 %752  ;;  %v624_v43 = vpop.permute.xlu2 %623 }
  0x8d   : > { %vm845_vm3 = vcmp.eq.s32.totalorder %v753_v60, %v5236_v55  ;;  %v609_v63 = vpop.permute.xlu1 %608  ;;  %vm802_vm2 = vcmp.eq.s32.totalorder %v624_v43, %v5236_v55 }
  0x8e   : > { %v4315_v1 = vsel %vm845_vm3, 1.0, %v6684_v61  ;;  %vm797_vm4 = vcmp.eq.s32.totalorder %v609_v63, %v5236_v55  ;;  %v4272_v48 = vsel %vm802_vm2, 1.0, %v6684_v61 }
  0x8f   : > { %v1012_v2 = vpack.c.bf16 %v4315_v1, %v4314_v0  ;;  %v4267_v3 = vsel %vm797_vm4, 1.0, %v6684_v61 }
  0x90   : > { %v988_v5 = vpack.c.bf16 %v4267_v3, %v4266_v62 }
  0x91   : > { %4354 = vmatmul.msk.bf16.vlgmr.msra.gmra.mxu3 %vm1021_vm5, %v1012_v2 }
  0x92   : > { %4330 = vmatmul.msk.bf16.vlgmr.msra.gmra.mxu0 %vm1021_vm5, %v988_v5  ;;  %707 = vperm.xlu2 %5071, %v572_v4  }
  0x93   : > { %701 = vperm.xlu0 %5069, %v570_v6   ;;  %704 = vperm.xlu1 %5070, %v571_v7  }
  0x94   : > { %v612_v9 = vpop.permute.xlu0 %611  ;;  %v777_v51 = vpop.permute.xlu2 %776 }
  0x95   : > { %v615_v10 = vpop.permute.xlu1 %614  ;;  %vm798_vm8 = vcmp.eq.s32.totalorder %v612_v9, %v5236_v55  ;;  %vm853_vm7 = vcmp.eq.s32.totalorder %v777_v51, %v5236_v55  ;;  %v5013_v51 = vld [vmem:[%s5353_s19 + $0xc8] sm:$0xff] }
  0x96   : > { %vm799_vm9 = vcmp.eq.s32.totalorder %v615_v10, %v5236_v55  ;;  %v4268_v16 = vsel %vm798_vm8, 1.0, %v6684_v61  ;;  %v4323_v58 = vsel %vm853_vm7, 1.0, %v6684_v61 }
  0x97   : > { %v4269_v17 = vsel %vm799_vm9, 1.0, %v6684_v61 }
  0x98   : > { %v989_v20 = vpack.c.bf16 %v4269_v17, %v4268_v16 }
  0x9a   : > { %716 = vperm.xlu2 %5071, %v575_v11  }
  0x9b   : > { %710 = vperm.xlu0 %5069, %v573_v12   ;;  %713 = vperm.xlu1 %5070, %v574_v13  }
  0x9c   : > { %v765_v24 = vpop.permute.xlu0 %764  ;;  %v780_v59 = vpop.permute.xlu2 %779 }
  0x9d   : > { %v618_v25 = vpop.permute.xlu1 %617  ;;  %vm849_vm10 = vcmp.eq.s32.totalorder %v765_v24, %v5236_v55  ;;  %v4956_v24 = vld [vmem:[%s5338_s17] sm:$0xff] }
  0x9e   : > { %vm800_vm11 = vcmp.eq.s32.totalorder %v618_v25, %v5236_v55  ;;  %v4319_v30 = vsel %vm849_vm10, 1.0, %v6684_v61  ;;  %vm854_vm10 = vcmp.eq.s32.totalorder %v780_v59, %v5236_v55 }
  0x9f   : > { %v4270_v31 = vsel %vm800_vm11, 1.0, %v6684_v61  ;;  %v1014_v35 = vpack.c.bf16 %v4319_v30, %v4318_v33  ;;  %v4324_v5 = vsel %vm854_vm10, 1.0, %v6684_v61  ;;  %v5053_v33 = vld [vmem:[%s6679_s10 + $0x8] sm:$0xff] }
  0xa0   : > { %v990_v37 = vpack.c.bf16 %v4271_v34, %v4270_v31  ;;  %v4957_v34 = vld [vmem:[%s5338_s17 + $0x8] sm:$0xff]  ;;  %3486 = vmatpush.bf16.msrb.mxu1 %v5053_v33 }
  0xa1   : > { %4355 = vmatmul.msk.bf16.gmra.mxu3 %vm1021_vm5, %v1013_v18 }
  0xa2   : > { %4331 = vmatmul.msk.bf16.gmra.mxu0 %vm1021_vm5, %v989_v20  ;;  %725 = vperm.xlu2 %5071, %v578_v19   ;;  %v1387_v19 = vld [vmem:[%s6674_s5] sm:$0xf] }
  0xa3   : > { %719 = vperm.xlu0 %5069, %v576_v21   ;;  %722 = vperm.xlu1 %5070, %v577_v22   ;;  %v2138_v20 = vsel %vm1118_vm0, %v1387_v19, 0 }
  0xa4   : > { %v768_v32 = vpop.permute.xlu0 %767  ;;  %v639_v1 = vpop.permute.xlu2 %638  ;;  %5058 = vmatpush.bf16.msra.mxu3 %v2138_v20  ;;  %2147 = vmatpush.bf16.msra.mxu2 %v2138_v20 }
  0xa5   : > { %v771_v40 = vpop.permute.xlu1 %770  ;;  %vm850_vm14 = vcmp.eq.s32.totalorder %v768_v32, %v5236_v55  ;;  %vm807_vm11 = vcmp.eq.s32.totalorder %v639_v1, %v5236_v55 }
  0xa6   : > { %vm851_vm15 = vcmp.eq.s32.totalorder %v771_v40, %v5236_v55  ;;  %v4320_v44 = vsel %vm850_vm14, 1.0, %v6684_v61  ;;  %v4277_v6 = vsel %vm807_vm11, 1.0, %v6684_v61 }
  0xa7   : > { %v4321_v45 = vsel %vm851_vm15, 1.0, %v6684_v61  ;;  %4650 = vmatmul.msk.bf16.vlgmr.msra.gmra.mxu2 %vm1021_vm5, %v4956_v24 }
  0xa8   : > { %v1015_v49 = vpack.c.bf16 %v4321_v45, %v4320_v44 }
  0xaa   : > { %734 = vperm.xlu2 %5071, %v581_v26  }
  0xab   : > { %728 = vperm.xlu0 %5069, %v579_v27   ;;  %731 = vperm.xlu1 %5070, %v580_v28  }
  0xac   : > { %v627_v41 = vpop.permute.xlu0 %626  ;;  %v642_v11 = vpop.permute.xlu2 %641 }
  0xad   : > { %vm803_vm1 = vcmp.eq.s32.totalorder %v627_v41, %v5236_v55  ;;  %v774_v47 = vpop.permute.xlu1 %773  ;;  %vm808_vm15 = vcmp.eq.s32.totalorder %v642_v11, %v5236_v55 }
  0xae   : > { %v4273_v46 = vsel %vm803_vm1, 1.0, %v6684_v61  ;;  %vm852_vm3 = vcmp.eq.s32.totalorder %v774_v47, %v5236_v55  ;;  %v4278_v16 = vsel %vm808_vm15, 1.0, %v6684_v61 }
  0xaf   : > { %v991_v50 = vpack.c.bf16 %v4273_v46, %v4272_v48  ;;  %v4322_v54 = vsel %vm852_vm3, 1.0, %v6684_v61  ;;  %v4958_v46 = vld [vmem:[%s5338_s17 + $0x10] sm:$0xff] }
  0xb0   : > { %v1016_v60 = vpack.c.bf16 %v4323_v58, %v4322_v54 }
  0xb1   : > { %4356 = vmatmul.msk.bf16.gmra.mxu3 %vm1021_vm5, %v1014_v35 }
  0xb2   : > { %4332 = vmatmul.msk.bf16.gmra.mxu0 %vm1021_vm5, %v990_v37  ;;  %743 = vperm.xlu2 %5071, %v584_v36   ;;  %v5012_v37 = vld [vmem:[%s5353_s19 + $0xc0] sm:$0xff] }
  0xb3   : > { %737 = vperm.xlu0 %5069, %v582_v38   ;;  %740 = vperm.xlu1 %5070, %v583_v39   ;;  %v4989_v38 = vld [vmem:[%s5353_s19 + $0x8] sm:$0xff] }
  0xb4   : > { %v630_v52 = vpop.permute.xlu0 %629  ;;  %v795_v23 = vpop.permute.xlu2 %794  ;;  %4491 = vmatmul.msk.bf16.gmra.mxu1 %vm1021_vm5, %v4989_v38 }
  0xb5   : > { %v633_v53 = vpop.permute.xlu1 %632  ;;  %vm804_vm4 = vcmp.eq.s32.totalorder %v630_v52, %v5236_v55  ;;  %v4990_v52 = vld [vmem:[%s5353_s19 + $0x10] sm:$0xff] }
  0xb6   : > { %vm805_vm6 = vcmp.eq.s32.totalorder %v633_v53, %v5236_v55  ;;  %v4274_v56 = vsel %vm804_vm4, 1.0, %v6684_v61  ;;  %vm859_vm4 = vcmp.eq.s32.totalorder %v795_v23, %v5236_v55 }
  0xb7   : > { %v4275_v57 = vsel %vm805_vm6, 1.0, %v6684_v61  ;;  %v4329_v28 = vsel %vm859_vm4, 1.0, %v6684_v61  ;;  %4651 = vmatmul.msk.bf16.gmra.mxu2 %vm1021_vm5, %v4957_v34 }
  0xb8   : > { %v992_v62 = vpack.c.bf16 %v4275_v57, %v4274_v56 }
  0xbb   : > { %746 = vperm.xlu0 %5069, %v585_v42  }
  0xbc   : > { %v783_v63 = vpop.permute.xlu0 %782  ;;  %v654_v35 = vpop.permute.xlu2 %653 }
  0xbd   : > { %v636_v0 = vpop.permute.xlu1 %635  ;;  %vm855_vm8 = vcmp.eq.s32.totalorder %v783_v63, %v5236_v55  ;;  %vm812_vm7 = vcmp.eq.s32.totalorder %v654_v35, %v5236_v55  ;;  %v4959_v63 = vld [vmem:[%s5338_s17 + $0x18] sm:$0xff] }
  0xbe   : > { %vm806_vm9 = vcmp.eq.s32.totalorder %v636_v0, %v5236_v55  ;;  %v4325_v2 = vsel %vm855_vm8, 1.0, %v6684_v61  ;;  %v4282_v39 = vsel %vm812_vm7, 1.0, %v6684_v61 }
  0xbf   : > { %v4276_v3 = vsel %vm806_vm9, 1.0, %v6684_v61  ;;  %v1017_v7 = vpack.c.bf16 %v4325_v2, %v4324_v5  ;;  %v4991_v5 = vld [vmem:[%s5353_s19 + $0x18] sm:$0xff] }
  0xc0   : > { %v993_v8 = vpack.c.bf16 %v4277_v6, %v4276_v3 }
  0xc1   : > { %4357 = vmatmul.msk.bf16.gmra.mxu3 %vm1021_vm5, %v1015_v49 }
  0xc2   : > { %4333 = vmatmul.msk.bf16.gmra.mxu0 %vm1021_vm5, %v991_v50 }
  0xc4   : > { %v786_v4 = vpop.permute.xlu0 %785  ;;  %v663_v47 = vpop.permute.xlu2 %662  ;;  %4492 = vmatmul.msk.bf16.gmra.mxu1 %vm1021_vm5, %v4990_v52  ;;  %v5017_v52 = vld [vmem:[%s5353_s19 + $0xe8] sm:$0xff] }
  0xc5   : > { %v789_v9 = vpop.permute.xlu1 %788  ;;  %vm856_vm12 = vcmp.eq.s32.totalorder %v786_v4, %v5236_v55  ;;  %vm815_vm9 = vcmp.eq.s32.totalorder %v663_v47, %v5236_v55  ;;  %v5014_v4 = vld [vmem:[%s5353_s19 + $0xd0] sm:$0xff] }
  0xc6   : > { %vm857_vm13 = vcmp.eq.s32.totalorder %v789_v9, %v5236_v55  ;;  %v4326_v12 = vsel %vm856_vm12, 1.0, %v6684_v61  ;;  %v4285_v53 = vsel %vm815_vm9, 1.0, %v6684_v61 }
  0xc7   : > { %v4327_v13 = vsel %vm857_vm13, 1.0, %v6684_v61  ;;  %4652 = vmatmul.msk.bf16.gmra.mxu2 %vm1021_vm5, %v4958_v46 }
  0xc8   : > { %v1018_v17 = vpack.c.bf16 %v4327_v13, %v4326_v12  ;;  %v4960_v12 = vld [vmem:[%s5338_s17 + $0x20] sm:$0xff] }
  0xcc   : > { %v645_v10 = vpop.permute.xlu0 %644  ;;  %v672_v13 = vpop.permute.xlu2 %671 }
  0xcd   : > { %vm809_vm14 = vcmp.eq.s32.totalorder %v645_v10, %v5236_v55  ;;  %v792_v15 = vpop.permute.xlu1 %791  ;;  %vm818_vm13 = vcmp.eq.s32.totalorder %v672_v13, %v5236_v55  ;;  %v5018_v13 = vld [vmem:[%s5353_s19 + $0xf0] sm:$0xff] }
  0xce   : > { %v4279_v14 = vsel %vm809_vm14, 1.0, %v6684_v61  ;;  %vm858_vm1 = vcmp.eq.s32.totalorder %v792_v15, %v5236_v55  ;;  %v4288_v19 = vsel %vm818_vm13, 1.0, %v6684_v61 }
  0xcf   : > { %v994_v18 = vpack.c.bf16 %v4279_v14, %v4278_v16  ;;  %v4328_v25 = vsel %vm858_vm1, 1.0, %v6684_v61 }
  0xd0   : > { %v1019_v30 = vpack.c.bf16 %v4329_v28, %v4328_v25 }
  0xd1   : > { %4358 = vmatmul.msk.bf16.gmra.mxu3 %vm1021_vm5, %v1016_v60 }
  0xd2   : > { %4334 = vmatmul.msk.bf16.gmra.mxu0 %vm1021_vm5, %v992_v62 }
  0xd4   : > { %v648_v21 = vpop.permute.xlu0 %647  ;;  %4493 = vmatmul.msk.bf16.gmra.mxu1 %vm1021_vm5, %v4991_v5 }
  0xd5   : > { %v651_v22 = vpop.permute.xlu1 %650  ;;  %vm810_vm2 = vcmp.eq.s32.totalorder %v648_v21, %v5236_v55 }
  0xd6   : > { %vm811_vm3 = vcmp.eq.s32.totalorder %v651_v22, %v5236_v55  ;;  %v4280_v26 = vsel %vm810_vm2, 1.0, %v6684_v61 }
  0xd7   : > { %v4281_v27 = vsel %vm811_vm3, 1.0, %v6684_v61  ;;  %4653 = vmatmul.msk.bf16.gmra.mxu2 %vm1021_vm5, %v4959_v63 }
  0xd8   : > { %v995_v31 = vpack.c.bf16 %v4281_v27, %v4280_v26  ;;  %v4961_v26 = vld [vmem:[%s5338_s17 + $0x28] sm:$0xff]  ;;  %v681_v27 = vpop.permute.xlu2 %680 }
  0xd9   : > { %vm821_vm15 = vcmp.eq.s32.totalorder %v681_v27, %v5236_v55 }
  0xda   : > { %v4291_v33 = vsel %vm821_vm15, 1.0, %v6684_v61 }
  0xdc   : > { %v657_v32 = vpop.permute.xlu0 %656 }
  0xdd   : > { %vm813_vm6 = vcmp.eq.s32.totalorder %v657_v32, %v5236_v55  ;;  %v660_v43 = vpop.permute.xlu1 %659  ;;  %v4993_v32 = vld [vmem:[%s5353_s19 + $0x28] sm:$0xff] }
  0xde   : > { %v4283_v36 = vsel %vm813_vm6, 1.0, %v6684_v61  ;;  %vm814_vm8 = vcmp.eq.s32.totalorder %v660_v43, %v5236_v55  ;;  %v4962_v43 = vld [vmem:[%s5338_s17 + $0x30] sm:$0xff] }
  0xdf   : > { %v996_v41 = vpack.c.bf16 %v4283_v36, %v4282_v39  ;;  %v4284_v49 = vsel %vm814_vm8, 1.0, %v6684_v61 }
  0xe0   : > { %v997_v56 = vpack.c.bf16 %v4285_v53, %v4284_v49  ;;  %v4994_v53 = vld [vmem:[%s5353_s19 + $0x30] sm:$0xff]  ;;  %v690_v5 = vpop.permute.xlu2 %689 }
  0xe1   : > { %4359 = vmatmul.msk.bf16.gmra.mxu3 %vm1021_vm5, %v1017_v7  ;;  %vm824_vm4 = vcmp.eq.s32.totalorder %v690_v5, %v5236_v55 }
  0xe2   : > { %4335 = vmatmul.msk.bf16.gmra.mxu0 %vm1021_vm5, %v993_v8 }
  0xe4   : > { %v666_v58 = vpop.permute.xlu0 %665 }
  0xe5   : > { %v669_v59 = vpop.permute.xlu1 %668  ;;  %vm816_vm10 = vcmp.eq.s32.totalorder %v666_v58, %v5236_v55 }
  0xe6   : > { %vm817_vm11 = vcmp.eq.s32.totalorder %v669_v59, %v5236_v55  ;;  %v4286_v1 = vsel %vm816_vm10, 1.0, %v6684_v61 }
  0xe7   : > { %v4287_v2 = vsel %vm817_vm11, 1.0, %v6684_v61  ;;  %4654 = vmatmul.msk.bf16.gmra.mxu2 %vm1021_vm5, %v4960_v12 }
  0xe8   : > { %v998_v7 = vpack.c.bf16 %v4287_v2, %v4286_v1 }
  0xec   : > { %v675_v9 = vpop.permute.xlu0 %674 }
  0xed   : > { %vm819_vm12 = vcmp.eq.s32.totalorder %v675_v9, %v5236_v55  ;;  %v678_v23 = vpop.permute.xlu1 %677 }
  0xee   : > { %v4289_v15 = vsel %vm819_vm12, 1.0, %v6684_v61  ;;  %vm820_vm14 = vcmp.eq.s32.totalorder %v678_v23, %v5236_v55 }
  0xef   : > { %v999_v21 = vpack.c.bf16 %v4289_v15, %v4288_v19  ;;  %v4290_v29 = vsel %vm820_vm14, 1.0, %v6684_v61  ;;  %v4995_v15 = vld [vmem:[%s5353_s19 + $0x38] sm:$0xff] }
  0xf0   : > { %v1000_v35 = vpack.c.bf16 %v4291_v33, %v4290_v29  ;;  %v699_v33 = vpop.permute.xlu2 %698 }
  0xf1   : > { %4360 = vmatmul.msk.bf16.gmra.mxu3 %vm1021_vm5, %v1018_v17  ;;  %v5015_v17 = vld [vmem:[%s5353_s19 + $0xd8] sm:$0xff]  ;;  %vm827_vm7 = vcmp.eq.s32.totalorder %v699_v33, %v5236_v55 }
  0xf2   : > { %4336 = vmatmul.msk.bf16.gmra.mxu0 %vm1021_vm5, %v994_v18  ;;  %v4992_v18 = vld [vmem:[%s5353_s19 + $0x20] sm:$0xff] }
  0xf3   : > { %4494 = vmatmul.msk.bf16.gmra.mxu1 %vm1021_vm5, %v4992_v18 }
  0xf5   : > { %v687_v38 = vpop.permute.xlu1 %686 }
  0xf6   : > { %vm823_vm2 = vcmp.eq.s32.totalorder %v687_v38, %v5236_v55 }
  0xf7   : > { %4655 = vmatmul.msk.bf16.gmra.mxu2 %vm1021_vm5, %v4961_v26  ;;  %v4293_v49 = vsel %vm823_vm2, 1.0, %v6684_v61 }
  0xfd   : > { %v696_v27 = vpop.permute.xlu1 %695 }
  0xfe   : > { %vm826_vm6 = vcmp.eq.s32.totalorder %v696_v27, %v5236_v55  ;;  %v4965_v27 = vld [vmem:[%s5338_s17 + $0x48] sm:$0xff] }
 0x101   : > { %4361 = vmatmul.msk.bf16.gmra.mxu3 %vm1021_vm5, %v1019_v30 }
 0x102   : > { %4337 = vmatmul.msk.bf16.gmra.mxu0 %vm1021_vm5, %v995_v31  ;;  %v5016_v31 = vld [vmem:[%s5353_s19 + $0xe0] sm:$0xff] }
 0x103   : > { %4495 = vmatmul.msk.bf16.gmra.mxu1 %vm1021_vm5, %v4993_v32  ;;  %v4964_v32 = vld [vmem:[%s5338_s17 + $0x40] sm:$0xff] }
 0x107   : > { %4656 = vmatmul.msk.bf16.gmra.mxu2 %vm1021_vm5, %v4962_v43  ;;  %v5019_v43 = vld [vmem:[%s5353_s19 + $0xf8] sm:$0xff] }
 0x10f   : > { %v5371_v40 = vpop.f32.mrf.mxu0 }
 0x111   : > { %4514 = vmatmul.msk.bf16.vlgmr.msrb.gmra.mxu3 %vm1021_vm5, %v5012_v37  ;;  %v684_v37 = vpop.permute.xlu0 %683 }
 0x112   : > { %4338 = vmatmul.msk.bf16.gmra.mxu0 %vm1021_vm5, %v996_v41  ;;  %vm822_vm1 = vcmp.eq.s32.totalorder %v684_v37, %v5236_v55  ;;  %v4296_v37 = vsel %vm826_vm6, 1.0, %v6684_v61 }
 0x113   : > { %v4292_v47 = vsel %vm822_vm1, 1.0, %v6684_v61  ;;  %4496 = vmatmul.msk.bf16.gmra.mxu1 %vm1021_vm5, %v4994_v53  ;;  %v4996_v53 = vld [vmem:[%s5353_s19 + $0x40] sm:$0xff] }
 0x114   : > { %v5376_v42 = vpop.f32.mrf.mxu3  ;;  %v1001_v58 = vpack.c.bf16 %v4293_v49, %v4292_v47  ;;  %v1721_v47 = vpop.f32.mrf.mxu1 }
 0x115   : > { %6705 = vst [vmem:[#allocation2_spill] sm:$0xff] %v5376_v42 }
 0x117   : > { %v5378_v44 = vpop.f32.mrf.mxu0 }
 0x119   : > { %v693_v63 = vpop.permute.xlu0 %692 }
 0x11a   : > { %vm825_vm3 = vcmp.eq.s32.totalorder %v693_v63, %v5236_v55 }
 0x11b   : > { %v4295_v9 = vsel %vm825_vm3, 1.0, %v6684_v61 }
 0x11c   : > { %v5386_v48 = vpop.f32.mrf.mxu3 }
 0x11d   : > { %6706 = vst [vmem:[#allocation3_spill] sm:$0xff] %v5386_v48  ;;  %v5007_v48 = vld [vmem:[%s5353_s19 + $0x98] sm:$0xff] }
 0x11f   : > { %v5394_v54 = vpop.f32.mrf.mxu0 }
 0x121   : > { %4515 = vmatmul.msk.bf16.gmra.mxu3 %vm1021_vm5, %v5013_v51  ;;  %v4998_v51 = vld [vmem:[%s5353_s19 + $0x50] sm:$0xff] }
 0x122   : > { %4339 = vmatmul.msk.bf16.gmra.mxu0 %vm1021_vm5, %v997_v56 }
 0x123   : > { %4497 = vmatmul.msk.bf16.gmra.mxu1 %vm1021_vm5, %v4995_v15  ;;  %v702_v15 = vpop.permute.xlu0 %701 }
 0x124   : > { %v5399_v57 = vpop.f32.mrf.mxu3 }
 0x125   : > { %6707 = vst [vmem:[#allocation4_spill] sm:$0xff] %v5399_v57 }
 0x127   : > { %v5401_v60 = vpop.f32.mrf.mxu0 }
 0x12a   : > { %v2149_v49 = vpop.f32.mrf.mxu2 }
 0x12c   : > { %v5409_v0 = vpop.f32.mrf.mxu3 }
 0x12d   : > { %6708 = vst [vmem:[#allocation5_spill] sm:$0xff] %v5409_v0  ;;  %v5006_v0 = vld [vmem:[%s5353_s19 + $0x90] sm:$0xff] }
 0x12f   : > { %v5417_v6 = vpop.f32.mrf.mxu0 }
 0x131   : > { %4516 = vmatmul.msk.bf16.gmra.mxu3 %vm1021_vm5, %v5014_v4  ;;  %v4963_v4 = vld [vmem:[%s5338_s17 + $0x38] sm:$0xff] }
 0x132   : > { %4340 = vmatmul.msk.bf16.gmra.mxu0 %vm1021_vm5, %v998_v7  ;;  %4657 = vmatmul.msk.bf16.gmra.mxu2 %vm1021_vm5, %v4963_v4 }
 0x133   : > { %4498 = vmatmul.msk.bf16.gmra.mxu1 %vm1021_vm5, %v4996_v53 }
 0x134   : > { %v5422_v8 = vpop.f32.mrf.mxu3 }
 0x135   : > { %6709 = vst [vmem:[#allocation6_spill] sm:$0xff] %v5422_v8 }
 0x137   : > { %v5424_v10 = vpop.f32.mrf.mxu0 }
 0x13c   : > { %v5432_v14 = vpop.f32.mrf.mxu3 }
 0x13d   : > { %6710 = vst [vmem:[#allocation7_spill] sm:$0xff] %v5432_v14 }
 0x13f   : > { %v5440_v20 = vpop.f32.mrf.mxu0 }
 0x141   : > { %4517 = vmatmul.msk.bf16.gmra.mxu3 %vm1021_vm5, %v5015_v17  ;;  %v4294_v17 = vsel %vm824_vm4, 1.0, %v6684_v61 }
 0x142   : > { %4341 = vmatmul.msk.bf16.gmra.mxu0 %vm1021_vm5, %v999_v21  ;;  %v1002_v19 = vpack.c.bf16 %v4295_v9, %v4294_v17  ;;  %v2373_v21 = vld [vmem:[%s6676_s7] sm:$0xf]  ;;  %4658 = vmatmul.msk.bf16.gmra.mxu2 %vm1021_vm5, %v4964_v32  ;;  %v1723_v9 = vpop.f32.mrf.mxu1 }
 0x143   : > { %v2631_v23 = vsel %vm1118_vm0, %v2373_v21, 0  ;;  %vm828_vm0 = vcmp.eq.s32.totalorder %v702_v15, %v5236_v55  ;;  %v5055_v15 = vld [vmem:[%s6681_s12 + $0x8] sm:$0xff] }
 0x144   : > { %v5445_v22 = vpop.f32.mrf.mxu3  ;;  %2640 = vmatpush.bf16.msrb.mxu3 %v2631_v23  ;;  %v4298_v33 = vsel %vm828_vm0, 1.0, %v6684_v61  ;;  %3867 = vmatpush.bf16.msrb.mxu2 %v5055_v15 }
 0x145   : > { %6711 = vst [vmem:[#allocation8_spill] sm:$0xff] %v5445_v22 }
 0x147   : > { %v5447_v24 = vpop.f32.mrf.mxu0 }
 0x14c   : > { %v5455_v28 = vpop.f32.mrf.mxu3 }
 0x14d   : > { %6712 = vst [vmem:[#allocation9_spill] sm:$0xff] %v5455_v28 }
 0x14f   : > { %v5463_v34 = vpop.f32.mrf.mxu0 }
 0x151   : > { %4518 = vmatmul.msk.bf16.gmra.mxu3 %vm1021_vm5, %v5016_v31  ;;  %v4999_v31 = vld [vmem:[%s5353_s19 + $0x58] sm:$0xff] }
 0x152   : > { %4342 = vmatmul.msk.bf16.gmra.mxu0 %vm1021_vm5, %v1000_v35  ;;  %4659 = vmatmul.msk.bf16.gmra.mxu2 %vm1021_vm5, %v4965_v27 }
 0x154   : > { %v5468_v36 = vpop.f32.mrf.mxu3 }
 0x155   : > { %6713 = vst [vmem:[#allocation10_spill] sm:$0xff] %v5468_v36 }
 0x157   : > { %v5470_v39 = vpop.f32.mrf.mxu0 }
 0x15c   : > { %v5478_v46 = vpop.f32.mrf.mxu3 }
 0x15d   : > { %6714 = vst [vmem:[#allocation11_spill] sm:$0xff] %v5478_v46 }
 0x15f   : > { %v5486_v56 = vpop.f32.mrf.mxu0 }
 0x161   : > { %4519 = vmatmul.msk.bf16.gmra.mxu3 %vm1021_vm5, %v5017_v52  ;;  %v5534_v52 = vadd.f32 %v2149_v49, %v1721_v47  ;;  %v4980_v47 = vld [vmem:[%s5338_s17 + $0xc0] sm:$0xff]  ;;  %v1726_v49 = vpop.f32.mrf.mxu1 }
 0x162   : > { %4343 = vmatmul.msk.bf16.gmra.mxu0 %vm1021_vm5, %v1001_v58  ;;  %v4297_v58 = vsel %vm827_vm7, 1.0, %v6684_v61 }
 0x163   : > { %v1003_v4 = vpack.c.bf16 %v4297_v58, %v4296_v37 }
 0x164   : > { %v5491_v59 = vpop.f32.mrf.mxu3 }
 0x165   : > { %6715 = vst [vmem:[#allocation12_spill] sm:$0xff] %v5491_v59 }
 0x167   : > { %v5493_v1 = vpop.f32.mrf.mxu0 }
 0x169   : > { %v1728_v27 = vpop.f32.mrf.mxu1 }
 0x16c   : > { %v5501_v7 = vpop.f32.mrf.mxu3 }
 0x16d   : > { %6716 = vst [vmem:[#allocation13_spill] sm:$0xff] %v5501_v7 }
 0x16f   : > { %v5509_v18 = vpop.f32.mrf.mxu0 }
 0x171   : > { %4520 = vmatmul.msk.bf16.gmra.mxu3 %vm1021_vm5, %v5018_v13  ;;  %v2151_v13 = vpop.f32.mrf.mxu2 }
 0x172   : > { %4344 = vmatmul.msk.bf16.gmra.mxu0 %vm1021_vm5, %v1002_v19  ;;  %v5545_v17 = vadd.f32 %v2151_v13, %v1723_v9  ;;  %v705_v19 = vpop.permute.xlu1 %704 }
 0x173   : > { %vm829_vm8 = vcmp.eq.s32.totalorder %v705_v19, %v5236_v55 }
 0x174   : > { %v5518_v26 = vpop.f32.mrf.mxu3  ;;  %v4299_v37 = vsel %vm829_vm8, 1.0, %v6684_v61  ;;  %vm3383_vm8 = vcmask 261120  }
 0x175   : > { %6717 = vst [vmem:[#allocation14_spill] sm:$0xff] %v5518_v26  ;;  %v1004_v13 = vpack.c.bf16 %v4299_v37, %v4298_v33  ;;  %v711_v33 = vpop.permute.xlu0 %710  ;;  %v5002_v26 = vld [vmem:[%s5353_s19 + $0x70] sm:$0xff] }
 0x176   : > { %vm831_vm9 = vcmp.eq.s32.totalorder %v711_v33, %v5236_v55 }
 0x177   : > { %v5520_v29 = vpop.f32.mrf.mxu0 }
 0x179   : > { %v2154_v53 = vpop.f32.mrf.mxu2 }
 0x17a   : > { %v5562_v58 = vadd.f32 %v2154_v53, %v1726_v49 }
 0x17c   : > { %v5528_v35 = vpop.f32.mrf.mxu3 }
 0x17d   : > { %6718 = vst [vmem:[#allocation15_spill] sm:$0xff] %v5528_v35 }
 0x17f   : > { %v5538_v63 = vpop.f32.mrf.mxu0 }
 0x181   : > { %4521 = vmatmul.msk.bf16.gmra.mxu3 %vm1021_vm5, %v5019_v43  ;;  %v2156_v49 = vpop.f32.mrf.mxu2  ;;  %v4301_v43 = vsel %vm831_vm9, 1.0, %v6684_v61  ;;  %vm4094_vm9 = vcmask 125952  }
 0x182   : > { %4345 = vmatmul.msk.bf16.gmra.mxu0 %vm1021_vm5, %v1003_v4  ;;  %v4997_v4 = vld [vmem:[%s5353_s19 + $0x48] sm:$0xff]  ;;  %v5575_v53 = vadd.f32 %v2156_v49, %v1728_v27  ;;  %v1731_v49 = vpop.f32.mrf.mxu1 }
 0x183   : > { %4499 = vmatmul.msk.bf16.gmra.mxu1 %vm1021_vm5, %v4997_v4  ;;  %v4966_v4 = vld [vmem:[%s5338_s17 + $0x50] sm:$0xff]  ;;  %v4981_v27 = vld [vmem:[%s5338_s17 + $0xc8] sm:$0xff] }
 0x184   : > { %v5543_v5 = vpop.f32.mrf.mxu3  ;;  %4660 = vmatmul.msk.bf16.gmra.mxu2 %vm1021_vm5, %v4966_v4 }
 0x185   : > { %6719 = vst [vmem:[#allocation16_spill] sm:$0xff] %v5543_v5 }
 0x187   : > { %v5547_v21 = vpop.f32.mrf.mxu0 }
 0x189   : > { %v2159_v38 = vpop.f32.mrf.mxu2 }
 0x18a   : > { %v5589_v12 = vadd.f32 %v2159_v38, %v1731_v49  ;;  %v714_v49 = vpop.permute.xlu1 %713 }
 0x18b   : > { %vm832_vm11 = vcmp.eq.s32.totalorder %v714_v49, %v5236_v55 }
 0x18c   : > { %v5555_v32 = vpop.f32.mrf.mxu3 }
 0x18d   : > { %6720 = vst [vmem:[#allocation17_spill] sm:$0xff] %v5555_v32 }
 0x18f   : > { %v5565_v9 = vpop.f32.mrf.mxu0 }
 0x191   : > { %4674 = vmatmul.msk.bf16.vlgmr.msra.gmra.mxu3 %vm1021_vm5, %v4980_v47  ;;  %v2161_v3 = vpop.f32.mrf.mxu2 }
 0x192   : > { %4346 = vmatmul.msk.bf16.gmra.mxu0 %vm1021_vm5, %v1004_v13  ;;  %v708_v13 = vpop.permute.xlu2 %707  ;;  %v723_v25 = vpop.permute.xlu1 %722 }
 0x193   : > { %vm830_vm10 = vcmp.eq.s32.totalorder %v708_v13, %v5236_v55  ;;  %4500 = vmatmul.msk.bf16.gmra.mxu1 %vm1021_vm5, %v4998_v51  ;;  %v1733_v13 = vpop.f32.mrf.mxu1  ;;  %vm835_vm14 = vcmp.eq.s32.totalorder %v723_v25, %v5236_v55 }
 0x194   : > { %v5573_v19 = vpop.f32.mrf.mxu3  ;;  %v4300_v30 = vsel %vm830_vm10, 1.0, %v6684_v61  ;;  %v5600_v38 = vadd.f32 %v2161_v3, %v1733_v13  ;;  %v4982_v3 = vld [vmem:[%s5338_s17 + $0xd0] sm:$0xff] }
 0x195   : > { %6721 = vst [vmem:[#allocation18_spill] sm:$0xff] %v5573_v19  ;;  %v1005_v33 = vpack.c.bf16 %v4301_v43, %v4300_v30  ;;  %v4967_v43 = vld [vmem:[%s5338_s17 + $0x58] sm:$0xff] }
 0x196   : > { %4661 = vmatmul.msk.bf16.gmra.mxu2 %vm1021_vm5, %v4967_v43 }
 0x197   : > { %v5577_v37 = vpop.f32.mrf.mxu0 }
 0x199   : > { %v2164_v47 = vpop.f32.mrf.mxu2 }
 0x19a   : > { %v717_v51 = vpop.permute.xlu2 %716 }
 0x19b   : > { %vm833_vm12 = vcmp.eq.s32.totalorder %v717_v51, %v5236_v55  ;;  %v1736_v13 = vpop.f32.mrf.mxu1 }
 0x19c   : > { %v5585_v15 = vpop.f32.mrf.mxu3  ;;  %v5614_v23 = vadd.f32 %v2164_v47, %v1736_v13  ;;  %v4303_v30 = vsel %vm833_vm12, 1.0, %v6684_v61  ;;  %v720_v47 = vpop.permute.xlu0 %719 }
 0x19d   : > { %6722 = vst [vmem:[#allocation19_spill] sm:$0xff] %v5585_v15  ;;  %vm834_vm13 = vcmp.eq.s32.totalorder %v720_v47, %v5236_v55  ;;  %v5001_v15 = vld [vmem:[%s5353_s19 + $0x68] sm:$0xff] }
 0x19f   : > { %v5593_v16 = vpop.f32.mrf.mxu0 }
 0x1a1   : > { %4675 = vmatmul.msk.bf16.gmra.mxu3 %vm1021_vm5, %v4981_v27  ;;  %v2166_v41 = vpop.f32.mrf.mxu2 }
 0x1a2   : > { %4347 = vmatmul.msk.bf16.gmra.mxu0 %vm1021_vm5, %v1005_v33  ;;  %v4302_v33 = vsel %vm832_vm11, 1.0, %v6684_v61 }
 0x1a3   : > { %v1006_v49 = vpack.c.bf16 %v4303_v30, %v4302_v33  ;;  %4501 = vmatmul.msk.bf16.gmra.mxu1 %vm1021_vm5, %v4999_v31  ;;  %v1738_v51 = vpop.f32.mrf.mxu1  ;;  %v4968_v31 = vld [vmem:[%s5338_s17 + $0x60] sm:$0xff] }
 0x1a4   : > { %v5598_v4 = vpop.f32.mrf.mxu3  ;;  %v5625_v13 = vadd.f32 %v2166_v41, %v1738_v51  ;;  %v4305_v41 = vsel %vm835_vm14, 1.0, %v6684_v61  ;;  %v5000_v30 = vld [vmem:[%s5353_s19 + $0x60] sm:$0xff] }
 0x1a5   : > { %6723 = vst [vmem:[#allocation20_spill] sm:$0xff] %v5598_v4 }
 0x1a6   : > { %4662 = vmatmul.msk.bf16.gmra.mxu2 %vm1021_vm5, %v4968_v31 }
 0x1a7   : > { %v5602_v50 = vpop.f32.mrf.mxu0 }
 0x1a9   : > { %v2169_v62 = vpop.f32.mrf.mxu2 }
 0x1ab   : > { %v1741_v51 = vpop.f32.mrf.mxu1 }
 0x1ac   : > { %v5610_v27 = vpop.f32.mrf.mxu3  ;;  %v5640_v45 = vadd.f32 %v2169_v62, %v1741_v51  ;;  %v6729_v51 = vmov 0.0  }
 0x1ad   : > { %6724 = vst [vmem:[#allocation21_spill] sm:$0xff] %v5610_v27  ;;  %v729_v27 = vpop.permute.xlu0 %728 }
 0x1ae   : > { %vm837_vm15 = vcmp.eq.s32.totalorder %v729_v27, %v5236_v55 }
 0x1af   : > { %v5618_v2 = vpop.f32.mrf.mxu0 }
 0x1b1   : > { %4676 = vmatmul.msk.bf16.gmra.mxu3 %vm1021_vm5, %v4982_v3  ;;  %v4304_v3 = vsel %vm834_vm13, 1.0, %v6684_v61  ;;  %v2171_v61 = vpop.f32.mrf.mxu2 }
 0x1b2   : > { %4348 = vmatmul.msk.bf16.gmra.mxu0 %vm1021_vm5, %v1006_v49  ;;  %v4983_v49 = vld [vmem:[%s5338_s17 + $0xd8] sm:$0xff]  ;;  %v1007_v47 = vpack.c.bf16 %v4305_v41, %v4304_v3  ;;  %v4969_v41 = vld [vmem:[%s5338_s17 + $0x68] sm:$0xff] }
 0x1b3   : > { %4502 = vmatmul.msk.bf16.gmra.mxu1 %vm1021_vm5, %v5000_v30  ;;  %v1743_v31 = vpop.f32.mrf.mxu1  ;;  %v5052_v30 = vld [vmem:[%s6679_s10] sm:$0xff] }
 0x1b4   : > { %v5623_v43 = vpop.f32.mrf.mxu3  ;;  %3487 = vmatpush.bf16.msrb.mxu1 %v5052_v30 }
 0x1b5   : > { %6725 = vst [vmem:[#allocation22_spill] sm:$0xff] %v5623_v43 }
 0x1b6   : > { %4663 = vmatmul.msk.bf16.gmra.mxu2 %vm1021_vm5, %v4969_v41 }
 0x1b7   : > { %v5627_v11 = vpop.f32.mrf.mxu0 }
 0x1b9   : > { %v2174_v3 = vpop.f32.mrf.mxu2 }
 0x1bc   : > { %v5635_v33 = vpop.f32.mrf.mxu3 }
 0x1bd   : > { %6726 = vst [vmem:[#allocation23_spill] sm:$0xff] %v5635_v33  ;;  %v5650_v33 = vadd.f32 %v2171_v61, %v1743_v31  ;;  %v4984_v31 = vld [vmem:[%s5338_s17 + $0xe0] sm:$0xff] }
 0x1bf   : > { %v5643_v43 = vpop.f32.mrf.mxu0 }
 0x1c1   : > { %4677 = vmatmul.msk.bf16.gmra.mxu3 %vm1021_vm5, %v4983_v49  ;;  %v726_v49 = vpop.permute.xlu2 %725 }
 0x1c2   : > { %4349 = vmatmul.msk.bf16.gmra.mxu0 %vm1021_vm5, %v1007_v47  ;;  %vm836_vm1 = vcmp.eq.s32.totalorder %v726_v49, %v5236_v55  ;;  %v4307_v47 = vsel %vm837_vm15, 1.0, %v6729_v51  ;;  %v2176_v49 = vpop.f32.mrf.mxu2 }
 0x1c3   : > { %v4306_v19 = vsel %vm836_vm1, 1.0, %v6729_v51  ;;  %4503 = vmatmul.msk.bf16.gmra.mxu1 %vm1021_vm5, %v5001_v15 }
 0x1c4   : > { %v5648_v25 = vpop.f32.mrf.mxu3  ;;  %v1008_v27 = vpack.c.bf16 %v4307_v47, %v4306_v19  ;;  %v4970_v47 = vld [vmem:[%s5338_s17 + $0x70] sm:$0xff] }
 0x1c5   : > { %6727 = vst [vmem:[#allocation24_spill] sm:$0xff] %v5648_v25  ;;  %v1746_v25 = vpop.f32.mrf.mxu1 }
 0x1c6   : > { %v5667_v4 = vadd.f32 %v2174_v3, %v1746_v25  ;;  %v732_v3 = vpop.permute.xlu1 %731  ;;  %4664 = vmatmul.msk.bf16.gmra.mxu2 %vm1021_vm5, %v4970_v47 }
 0x1c7   : > { %v5652_v62 = vpop.f32.mrf.mxu0  ;;  %vm838_vm2 = vcmp.eq.s32.totalorder %v732_v3, %v5236_v55 }
 0x1c9   : > { %v735_v15 = vpop.permute.xlu2 %734 }
 0x1ca   : > { %vm839_vm3 = vcmp.eq.s32.totalorder %v735_v15, %v5236_v55 }
 0x1cb   : > { %v4309_v19 = vsel %vm839_vm3, 1.0, %v6729_v51 }
 0x1cc   : > { %v5663_v61 = vpop.f32.mrf.mxu3 }
 0x1cd   : > { %6728 = vst [vmem:[#allocation25_spill] sm:$0xff] %v5663_v61  ;;  %v1748_v41 = vpop.f32.mrf.mxu1 }
 0x1ce   : > { %v5678_v25 = vadd.f32 %v2176_v49, %v1748_v41  ;;  %v4985_v41 = vld [vmem:[%s5338_s17 + $0xe8] sm:$0xff]  ;;  %v741_v59 = vpop.permute.xlu1 %740 }
 0x1cf   : > { %v5671_v5 = vpop.f32.mrf.mxu0  ;;  %vm841_vm6 = vcmp.eq.s32.totalorder %v741_v59, %v5236_v55 }
 0x1d1   : > { %4678 = vmatmul.msk.bf16.gmra.mxu3 %vm1021_vm5, %v4984_v31 }
 0x1d2   : > { %4350 = vmatmul.msk.bf16.gmra.mxu0 %vm1021_vm5, %v1008_v27  ;;  %v4308_v27 = vsel %vm838_vm2, 1.0, %v6729_v51 }
 0x1d3   : > { %v1009_v3 = vpack.c.bf16 %v4309_v19, %v4308_v27  ;;  %4504 = vmatmul.msk.bf16.gmra.mxu1 %vm1021_vm5, %v5002_v26  ;;  %v4971_v26 = vld [vmem:[%s5338_s17 + $0x78] sm:$0xff] }
 0x1d4   : > { %v5676_v30 = vpop.f32.mrf.mxu3  ;;  %v5003_v19 = vld [vmem:[%s5353_s19 + $0x78] sm:$0xff] }
 0x1d5   : > { %6730 = vst [vmem:[#allocation26_spill] sm:$0xff] %v5676_v30  ;;  %v1751_v49 = vpop.f32.mrf.mxu1  ;;  %v2179_v30 = vpop.f32.mrf.mxu2 }
 0x1d6   : > { %v5692_v32 = vadd.f32 %v2179_v30, %v1751_v49  ;;  %v738_v30 = vpop.permute.xlu0 %737  ;;  %4665 = vmatmul.msk.bf16.gmra.mxu2 %vm1021_vm5, %v4971_v26 }
 0x1d7   : > { %v5680_v61 = vpop.f32.mrf.mxu0  ;;  %vm840_vm4 = vcmp.eq.s32.totalorder %v738_v30, %v5236_v55 }
 0x1dc   : > { %v5688_v31 = vpop.f32.mrf.mxu3 }
 0x1dd   : > { %6731 = vst [vmem:[#allocation27_spill] sm:$0xff] %v5688_v31  ;;  %v1753_v15 = vpop.f32.mrf.mxu1  ;;  %v2181_v31 = vpop.f32.mrf.mxu2 }
 0x1de   : > { %v5703_v49 = vadd.f32 %v2181_v31, %v1753_v15  ;;  %v4311_v31 = vsel %vm841_vm6, 1.0, %v6729_v51 }
 0x1df   : > { %v5696_v35 = vpop.f32.mrf.mxu0 }
 0x1e1   : > { %4679 = vmatmul.msk.bf16.gmra.mxu3 %vm1021_vm5, %v4985_v41  ;;  %v4310_v41 = vsel %vm840_vm4, 1.0, %v6729_v51 }
 0x1e2   : > { %4351 = vmatmul.msk.bf16.gmra.mxu0 %vm1021_vm5, %v1009_v3  ;;  %v4986_v3 = vld [vmem:[%s5338_s17 + $0xf0] sm:$0xff]  ;;  %v1010_v30 = vpack.c.bf16 %v4311_v31, %v4310_v41  ;;  %v4972_v31 = vld [vmem:[%s5338_s17 + $0x80] sm:$0xff] }
 0x1e3   : > { %4505 = vmatmul.msk.bf16.gmra.mxu1 %vm1021_vm5, %v5003_v19  ;;  %v744_v19 = vpop.permute.xlu2 %743  ;;  %v5004_v41 = vld [vmem:[%s5353_s19 + $0x80] sm:$0xff] }
 0x1e4   : > { %v5701_v47 = vpop.f32.mrf.mxu3  ;;  %vm842_vm0 = vcmp.eq.s32.totalorder %v744_v19, %v5236_v55 }
 0x1e5   : > { %6732 = vst [vmem:[#allocation28_spill] sm:$0xff] %v5701_v47  ;;  %v1756_v15 = vpop.f32.mrf.mxu1  ;;  %v2184_v47 = vpop.f32.mrf.mxu2  ;;  %v4312_v8 = vsel %vm842_vm0, 1.0, %v6729_v51 }
 0x1e6   : > { %v5718_v36 = vadd.f32 %v2184_v47, %v1756_v15  ;;  %v747_v47 = vpop.permute.xlu0 %746  ;;  %4666 = vmatmul.msk.bf16.gmra.mxu2 %vm1021_vm5, %v4972_v31 }
 0x1e7   : > { %v5705_v7 = vpop.f32.mrf.mxu0  ;;  %vm843_vm7 = vcmp.eq.s32.totalorder %v747_v47, %v5236_v55 }
 0x1ec   : > { %v5713_v27 = vpop.f32.mrf.mxu3 }
 0x1ed   : > { %6733 = vst [vmem:[#allocation29_spill] sm:$0xff] %v5713_v27  ;;  %v1758_v26 = vpop.f32.mrf.mxu1  ;;  %v2186_v27 = vpop.f32.mrf.mxu2 }
 0x1ee   : > { %v5728_v22 = vadd.f32 %v2186_v27, %v1758_v26  ;;  %v4987_v27 = vld [vmem:[%s5338_s17 + $0xf8] sm:$0xff] }
 0x1ef   : > { %v5721_v46 = vpop.f32.mrf.mxu0 }
 0x1f1   : > { %4680 = vmatmul.msk.bf16.gmra.mxu3 %vm1021_vm5, %v4986_v3 }
 0x1f2   : > { %4352 = vmatmul.msk.bf16.gmra.mxu0 %vm1021_vm5, %v1010_v30  ;;  %v4313_v30 = vsel %vm843_vm7, 1.0, %v6729_v51 }
 0x1f3   : > { %v1011_v47 = vpack.c.bf16 %v4313_v30, %v4312_v8  ;;  %4506 = vmatmul.msk.bf16.gmra.mxu1 %vm1021_vm5, %v5004_v41  ;;  %v5020_v41 = vld [vmem:[%s5764_s15] sm:$0xff] }
 0x1f4   : > { %v5726_v59 = vpop.f32.mrf.mxu3 }
 0x1f5   : > { %6734 = vst [vmem:[#allocation30_spill] sm:$0xff] %v5726_v59  ;;  %v1761_v26 = vpop.f32.mrf.mxu1  ;;  %v2189_v59 = vpop.f32.mrf.mxu2 }
 0x1f6   : > { %v5742_v28 = vadd.f32 %v2189_v59, %v1761_v26  ;;  %v4973_v26 = vld [vmem:[%s5338_s17 + $0x88] sm:$0xff] }
 0x1f7   : > { %v5730_v15 = vpop.f32.mrf.mxu0  ;;  %4667 = vmatmul.msk.bf16.gmra.mxu2 %vm1021_vm5, %v4973_v26  ;;  %v6738_v26 = vpack.c.bf16 %v5378_v44, %v5371_v40  ;;  %v5021_v40 = vld [vmem:[%s5764_s15 + $0x8] sm:$0xff] }
 0x1fc   : > { %v5738_v3 = vpop.f32.mrf.mxu3 }
 0x1fd   : > { %6735 = vst [vmem:[#allocation31_spill] sm:$0xff] %v5738_v3  ;;  %v1763_v31 = vpop.f32.mrf.mxu1  ;;  %v2191_v19 = vpop.f32.mrf.mxu2 }
 0x1fe   : > { %v5753_v3 = vadd.f32 %v2191_v19, %v1763_v31  ;;  %v5005_v31 = vld [vmem:[%s5353_s19 + $0x88] sm:$0xff] }
 0x1ff   : > { %v5746_v14 = vpop.f32.mrf.mxu0 }
 0x201   : > { %4681 = vmatmul.msk.bf16.gmra.mxu3 %vm1021_vm5, %v4987_v27 }
 0x202   : > { %4353 = vmatmul.msk.bf16.gmra.mxu0 %vm1021_vm5, %v1011_v47 }
 0x203   : > { %4507 = vmatmul.msk.bf16.gmra.mxu1 %vm1021_vm5, %v5005_v31  ;;  %v4974_v31 = vld [vmem:[%s5338_s17 + $0x90] sm:$0xff] }
 0x204   : > { %v5751_v55 = vpop.f32.mrf.mxu3 }
 0x205   : > { %6736 = vst [vmem:[#allocation32_spill] sm:$0xff] %v5751_v55  ;;  %v1766_v30 = vpop.f32.mrf.mxu1  ;;  %v2194_v27 = vpop.f32.mrf.mxu2 }
 0x206   : > { %v5770_v47 = vadd.f32 %v2194_v27, %v1766_v30 }
 0x207   : > { %v5755_v59 = vpop.f32.mrf.mxu0  ;;  %4668 = vmatmul.msk.bf16.gmra.mxu2 %vm1021_vm5, %v4974_v31 }
 0x20c   : > { %v5767_v8 = vpop.f32.mrf.mxu3 }
 0x20d   : > { %6737 = vst [vmem:[#allocation33_spill] sm:$0xff] %v5767_v8  ;;  %v1768_v8 = vpop.f32.mrf.mxu1  ;;  %v2196_v55 = vpop.f32.mrf.mxu2 }
 0x20e   : > { %v5783_v57 = vadd.f32 %v2196_v55, %v1768_v8  ;;  %v6741_v8 = vpack.c.bf16 %v5401_v60, %v5394_v54  ;;  %v5022_v54 = vld [vmem:[%s5764_s15 + $0x10] sm:$0xff] }
 0x20f   : > { %v5773_v19 = vpop.f32.mrf.mxu0 }
 0x211   : > { %4810 = vmatmul.msk.bf16.vlgmr.msrb.gmra.mxu3 %vm1021_vm5, %v5020_v41 }
 0x212   : > { %4842 = vmatmul.msk.bf16.vlgmr.msrb.gmra.mxu0 %vm1021_vm5, %v6738_v26 }
 0x213   : > { %4508 = vmatmul.msk.bf16.gmra.mxu1 %vm1021_vm5, %v5006_v0  ;;  %v4975_v0 = vld [vmem:[%s5338_s17 + $0x98] sm:$0xff] }
 0x214   : > { %v5781_v51 = vpop.f32.mrf.mxu3 }
 0x215   : > { %6739 = vst [vmem:[#allocation34_spill] sm:$0xff] %v5781_v51  ;;  %v1771_v44 = vpop.f32.mrf.mxu1  ;;  %v2199_v26 = vpop.f32.mrf.mxu2 }
 0x216   : > { %v5794_v51 = vadd.f32 %v2199_v26, %v1771_v44 }
 0x217   : > { %v5785_v30 = vpop.f32.mrf.mxu0  ;;  %4669 = vmatmul.msk.bf16.gmra.mxu2 %vm1021_vm5, %v4975_v0 }
 0x21c   : > { %v5791_v41 = vpop.f32.mrf.mxu3 }
 0x21d   : > { %6740 = vst [vmem:[#allocation35_spill] sm:$0xff] %v5791_v41  ;;  %v1773_v27 = vpop.f32.mrf.mxu1  ;;  %v2201_v41 = vpop.f32.mrf.mxu2 }
 0x21e   : > { %v5807_v42 = vadd.f32 %v2201_v41, %v1773_v27  ;;  %v6746_v41 = vpack.c.bf16 %v5424_v10, %v5417_v6  ;;  %v5023_v6 = vld [vmem:[%s5764_s15 + $0x18] sm:$0xff] }
 0x21f   : > { %v5797_v55 = vpop.f32.mrf.mxu0 }
 0x220   : > { %6743 = vst [vmem:[#allocation37_spill] sm:$0xff] %v5807_v42 }
 0x221   : > { %4811 = vmatmul.msk.bf16.gmra.mxu3 %vm1021_vm5, %v5021_v40 }
 0x222   : > { %4843 = vmatmul.msk.bf16.gmra.mxu0 %vm1021_vm5, %v6741_v8 }
 0x223   : > { %4509 = vmatmul.msk.bf16.gmra.mxu1 %vm1021_vm5, %v5007_v48  ;;  %v4976_v48 = vld [vmem:[%s5338_s17 + $0xa0] sm:$0xff] }
 0x224   : > { %v5805_v31 = vpop.f32.mrf.mxu3 }
 0x225   : > { %6742 = vst [vmem:[#allocation36_spill] sm:$0xff] %v5805_v31  ;;  %v1776_v60 = vpop.f32.mrf.mxu1  ;;  %v2204_v8 = vpop.f32.mrf.mxu2 }
 0x226   : > { %v5818_v31 = vadd.f32 %v2204_v8, %v1776_v60 }
 0x227   : > { %v5809_v44 = vpop.f32.mrf.mxu0  ;;  %4670 = vmatmul.msk.bf16.gmra.mxu2 %vm1021_vm5, %v4976_v48 }
 0x228   : > { %6745 = vst [vmem:[#allocation39_spill] sm:$0xff] %v5818_v31  ;;  %v5008_v31 = vld [vmem:[%s5353_s19 + $0xa0] sm:$0xff] }
 0x22c   : > { %v5815_v40 = vpop.f32.mrf.mxu3 }
 0x22d   : > { %6744 = vst [vmem:[#allocation38_spill] sm:$0xff] %v5815_v40  ;;  %v1778_v26 = vpop.f32.mrf.mxu1  ;;  %v2206_v40 = vpop.f32.mrf.mxu2 }
 0x22e   : > { %v5831_v42 = vadd.f32 %v2206_v40, %v1778_v26  ;;  %v6750_v40 = vpack.c.bf16 %v5447_v24, %v5440_v20 }
 0x22f   : > { %v5821_v27 = vpop.f32.mrf.mxu0 }
 0x231   : > { %4812 = vmatmul.msk.bf16.gmra.mxu3 %vm1021_vm5, %v5022_v54 }
 0x232   : > { %4844 = vmatmul.msk.bf16.gmra.mxu0 %vm1021_vm5, %v6746_v41 }
 0x233   : > { %4510 = vmatmul.msk.bf16.gmra.mxu1 %vm1021_vm5, %v5008_v31 }
 0x234   : > { %v5829_v0 = vpop.f32.mrf.mxu3 }
 0x235   : > { %6747 = vst [vmem:[#allocation40_spill] sm:$0xff] %v5829_v0  ;;  %v1781_v10 = vpop.f32.mrf.mxu1  ;;  %v2209_v41 = vpop.f32.mrf.mxu2 }
 0x236   : > { %v5842_v0 = vadd.f32 %v2209_v41, %v1781_v10  ;;  %v6756_v41 = vpack.c.bf16 %v5470_v39, %v5463_v34  ;;  %v4978_v34 = vld [vmem:[%s5338_s17 + $0xb0] sm:$0xff] }
 0x237   : > { %v5833_v60 = vpop.f32.mrf.mxu0 }
 0x238   : > { %6749 = vst [vmem:[#allocation42_spill] sm:$0xff] %v5842_v0  ;;  %v4977_v0 = vld [vmem:[%s5338_s17 + $0xa8] sm:$0xff] }
 0x239   : > { %4671 = vmatmul.msk.bf16.gmra.mxu2 %vm1021_vm5, %v4977_v0  ;;  %v5054_v0 = vld [vmem:[%s6681_s12] sm:$0xff] }
 0x23a   : > { %3868 = vmatpush.bf16.msrb.mxu2 %v5054_v0 }
 0x23c   : > { %v5839_v54 = vpop.f32.mrf.mxu3 }
 0x23d   : > { %6748 = vst [vmem:[#allocation41_spill] sm:$0xff] %v5839_v54  ;;  %v5855_v8 = vpop.f32.mrf.mxu1  ;;  %v5857_v54 = vpop.f32.mrf.mxu2 }
 0x23e   : > { %6752 = vst [vmem:[#allocation44_spill] sm:$0xff] %v5855_v8 }
 0x23f   : > { %v5845_v26 = vpop.f32.mrf.mxu0  ;;  %6753 = vst [vmem:[#allocation45_spill] sm:$0xff] %v5857_v54 }
 0x241   : > { %4813 = vmatmul.msk.bf16.gmra.mxu3 %vm1021_vm5, %v5023_v6  ;;  %v5024_v6 = vld [vmem:[%s5764_s15 + $0x20] sm:$0xff] }
 0x242   : > { %4845 = vmatmul.msk.bf16.gmra.mxu0 %vm1021_vm5, %v6750_v40 }
 0x244   : > { %v5853_v48 = vpop.f32.mrf.mxu3 }
 0x245   : > { %6751 = vst [vmem:[#allocation43_spill] sm:$0xff] %v5853_v48  ;;  %v1786_v20 = vpop.f32.mrf.mxu1  ;;  %v2214_v24 = vpop.f32.mrf.mxu2  ;;  %v5009_v48 = vld [vmem:[%s5353_s19 + $0xa8] sm:$0xff] }
 0x246   : > { %v5868_v40 = vadd.f32 %v2214_v24, %v1786_v20  ;;  %4511 = vmatmul.msk.bf16.gmra.mxu1 %vm1021_vm5, %v5009_v48 }
 0x247   : > { %v5859_v10 = vpop.f32.mrf.mxu0 }
 0x248   : > { %6755 = vst [vmem:[#allocation47_spill] sm:$0xff] %v5868_v40 }
 0x249   : > { %4672 = vmatmul.msk.bf16.gmra.mxu2 %vm1021_vm5, %v4978_v34  ;;  %v6763_v34 = vpack.c.bf16 %v5493_v1, %v5486_v56  ;;  %v5026_v56 = vld [vmem:[%s5764_s15 + $0x30] sm:$0xff] }
 0x24c   : > { %v5865_v31 = vpop.f32.mrf.mxu3 }
 0x24d   : > { %6754 = vst [vmem:[#allocation46_spill] sm:$0xff] %v5865_v31  ;;  %v5884_v24 = vpop.f32.mrf.mxu1  ;;  %v5886_v31 = vpop.f32.mrf.mxu2 }
 0x24e   : > { %6758 = vst [vmem:[#allocation49_spill] sm:$0xff] %v5884_v24  ;;  %v5010_v24 = vld [vmem:[%s5353_s19 + $0xb0] sm:$0xff] }
 0x24f   : > { %v5871_v8 = vpop.f32.mrf.mxu0  ;;  %6759 = vst [vmem:[#allocation50_spill] sm:$0xff] %v5886_v31 }
 0x251   : > { %4814 = vmatmul.msk.bf16.gmra.mxu3 %vm1021_vm5, %v5024_v6 }
 0x252   : > { %4846 = vmatmul.msk.bf16.gmra.mxu0 %vm1021_vm5, %v6756_v41  ;;  %v5025_v41 = vld [vmem:[%s5764_s15 + $0x28] sm:$0xff] }
 0x254   : > { %v5882_v20 = vpop.f32.mrf.mxu3 }
 0x255   : > { %6757 = vst [vmem:[#allocation48_spill] sm:$0xff] %v5882_v20  ;;  %v1791_v40 = vpop.f32.mrf.mxu1  ;;  %v2219_v20 = vpop.f32.mrf.mxu2 }
 0x256   : > { %v5897_v0 = vadd.f32 %v2219_v20, %v1791_v40  ;;  %4512 = vmatmul.msk.bf16.gmra.mxu1 %vm1021_vm5, %v5010_v24  ;;  %v6769_v20 = vpack.c.bf16 %v5520_v29, %v5509_v18 }
 0x257   : > { %v5888_v48 = vpop.f32.mrf.mxu0 }
 0x258   : > { %6761 = vst [vmem:[#allocation52_spill] sm:$0xff] %v5897_v0  ;;  %v4979_v0 = vld [vmem:[%s5338_s17 + $0xb8] sm:$0xff] }
 0x259   : > { %4673 = vmatmul.msk.bf16.gmra.mxu2 %vm1021_vm5, %v4979_v0 }
 0x25c   : > { %v5894_v39 = vpop.f32.mrf.mxu3 }
 0x25d   : > { %6760 = vst [vmem:[#allocation51_spill] sm:$0xff] %v5894_v39  ;;  %v5910_v39 = vpop.f32.mrf.mxu1  ;;  %v5912_v31 = vpop.f32.mrf.mxu2 }
 0x25e   : > { %6765 = vst [vmem:[#allocation55_spill] sm:$0xff] %v5910_v39 }
 0x25f   : > { %v5900_v54 = vpop.f32.mrf.mxu0  ;;  %6766 = vst [vmem:[#allocation56_spill] sm:$0xff] %v5912_v31 }
 0x260   : > { %6762 = vst [vmem:[#allocation53_spill] sm:$0xff] %v5900_v54 }
 0x261   : > { %4815 = vmatmul.msk.bf16.gmra.mxu3 %vm1021_vm5, %v5025_v41 }
 0x262   : > { %4847 = vmatmul.msk.bf16.gmra.mxu0 %vm1021_vm5, %v6763_v34 }
 0x264   : > { %v5908_v6 = vpop.f32.mrf.mxu3 }
 0x265   : > { %6764 = vst [vmem:[#allocation54_spill] sm:$0xff] %v5908_v6  ;;  %v1796_v1 = vpop.f32.mrf.mxu1  ;;  %v2224_v41 = vpop.f32.mrf.mxu2  ;;  %v5011_v6 = vld [vmem:[%s5353_s19 + $0xb8] sm:$0xff] }
 0x266   : > { %v5923_v34 = vadd.f32 %v2224_v41, %v1796_v1  ;;  %4513 = vmatmul.msk.bf16.gmra.mxu1 %vm1021_vm5, %v5011_v6 }
 0x267   : > { %v5914_v40 = vpop.f32.mrf.mxu0 }
 0x268   : > { %6768 = vst [vmem:[#allocation58_spill] sm:$0xff] %v5923_v34 }
 0x26c   : > { %v5920_v24 = vpop.f32.mrf.mxu3 }
 0x26d   : > { %6767 = vst [vmem:[#allocation57_spill] sm:$0xff] %v5920_v24  ;;  %v5936_v24 = vpop.f32.mrf.mxu1  ;;  %v5938_v31 = vpop.f32.mrf.mxu2 }
 0x26e   : > { %6771 = vst [vmem:[#allocation60_spill] sm:$0xff] %v5936_v24 }
 0x26f   : > { %v5926_v39 = vpop.f32.mrf.mxu0  ;;  %6772 = vst [vmem:[#allocation61_spill] sm:$0xff] %v5938_v31 }
 0x271   : > { %4816 = vmatmul.msk.bf16.gmra.mxu3 %vm1021_vm5, %v5026_v56  ;;  %v5027_v56 = vld [vmem:[%s5764_s15 + $0x38] sm:$0xff] }
 0x272   : > { %4848 = vmatmul.msk.bf16.gmra.mxu0 %vm1021_vm5, %v6769_v20  ;;  %v6776_v20 = vpack.c.bf16 %v5547_v21, %v5538_v63 }
 0x274   : > { %v5934_v0 = vpop.f32.mrf.mxu3 }
 0x275   : > { %6770 = vst [vmem:[#allocation59_spill] sm:$0xff] %v5934_v0  ;;  %v1801_v34 = vpop.f32.mrf.mxu1  ;;  %v2229_v54 = vpop.f32.mrf.mxu2 }
 0x276   : > { %v5947_v18 = vadd.f32 %v2229_v54, %v1801_v34 }
 0x277   : > { %v5940_v1 = vpop.f32.mrf.mxu0 }
 0x278   : > { %6774 = vst [vmem:[#allocation63_spill] sm:$0xff] %v5947_v18  ;;  %v5028_v18 = vld [vmem:[%s5764_s15 + $0x40] sm:$0xff] }
 0x27c   : > { %v5944_v6 = vpop.f32.mrf.mxu3 }
 0x27d   : > { %6773 = vst [vmem:[#allocation62_spill] sm:$0xff] %v5944_v6  ;;  %v5958_v31 = vpop.f32.mrf.mxu1  ;;  %v5960_v41 = vpop.f32.mrf.mxu2 }
 0x27e   : > { %6778 = vst [vmem:[#allocation66_spill] sm:$0xff] %v5958_v31 }
 0x27f   : > { %v5949_v29 = vpop.f32.mrf.mxu0  ;;  %6779 = vst [vmem:[#allocation67_spill] sm:$0xff] %v5960_v41 }
 0x280   : > { %6775 = vst [vmem:[#allocation64_spill] sm:$0xff] %v5949_v29 }
 0x281   : > { %4817 = vmatmul.msk.bf16.gmra.mxu3 %vm1021_vm5, %v5027_v56 }
 0x282   : > { %4849 = vmatmul.msk.bf16.gmra.mxu0 %vm1021_vm5, %v6776_v20  ;;  %v6783_v20 = vpack.c.bf16 %v5577_v37, %v5565_v9  ;;  %v5029_v9 = vld [vmem:[%s5764_s15 + $0x48] sm:$0xff] }
 0x284   : > { %v5956_v0 = vpop.f32.mrf.mxu3 }
 0x285   : > { %6777 = vst [vmem:[#allocation65_spill] sm:$0xff] %v5956_v0  ;;  %v1806_v56 = vpop.f32.mrf.mxu1  ;;  %v2234_v24 = vpop.f32.mrf.mxu2 }
 0x286   : > { %v5969_v63 = vadd.f32 %v2234_v24, %v1806_v56  ;;  %v5984_v24 = vld [vmem:[%s6678_s9] ss:$0 sm:$0xff] }
 0x287   : > { %v5962_v6 = vpop.f32.mrf.mxu0 }
 0x288   : > { %6780 = vst [vmem:[#allocation68_spill] sm:$0xff] %v5962_v6 }
 0x289   : > { %6782 = vst [vmem:[#allocation70_spill] sm:$0xff] %v5969_v63 }
 0x28c   : > { %v5966_v34 = vpop.f32.mrf.mxu3 }
 0x28d   : > { %6781 = vst [vmem:[#allocation69_spill] sm:$0xff] %v5966_v34  ;;  %v5976_v41 = vpop.f32.mrf.mxu1  ;;  %v5978_v54 = vpop.f32.mrf.mxu2 }
 0x28e   : > { %6784 = vst [vmem:[#allocation71_spill] sm:$0xff] %v5976_v41 }
 0x28f   : > { %v2975_v21 = vpop.f32.mrf.mxu0  ;;  %6785 = vst [vmem:[#allocation72_spill] sm:$0xff] %v5978_v54 }
 0x291   : > { %4818 = vmatmul.msk.bf16.gmra.mxu3 %vm1021_vm5, %v5028_v18 }
 0x292   : > { %4850 = vmatmul.msk.bf16.gmra.mxu0 %vm1021_vm5, %v6783_v20 }
 0x294   : > { %v2642_v0 = vpop.f32.mrf.mxu3 }
 0x295   : > { %v2802_v34 = vadd.f32 %v2642_v0, %v5534_v52  ;;  %v1811_v37 = vpop.f32.mrf.mxu1  ;;  %v2239_v20 = vpop.f32.mrf.mxu2  ;;  %v6786_v0 = vpack.c.bf16 %v5602_v50, %v5593_v16  ;;  %v5030_v16 = vld [vmem:[%s5764_s15 + $0x50] sm:$0xff] }
 0x296   : > { %v5988_v63 = vadd.f32 %v2239_v20, %v1811_v37 }
 0x297   : > { %v2977_v31 = vpop.f32.mrf.mxu0  ;;  %v3135_v29 = vadd.f32 %v2975_v21, %v2802_v34 }
 0x299   : > { %v3203_v41 = vadd.f32 %v5984_v24, %v3135_v29 }
 0x29c   : > { %v2644_v18 = vpop.f32.mrf.mxu3 }
 0x29d   : > { %v2803_v56 = vadd.f32 %v2644_v18, %v5545_v17  ;;  %v3267_v17 = vmax.f32 %v3203_v41, 0.0  ;;  %v5997_v37 = vpop.f32.mrf.mxu1  ;;  %v5999_v29 = vpop.f32.mrf.mxu2 }
 0x29e   : > { %6787 = vst [vmem:[#allocation73_spill] sm:$0xff] %v5999_v29 }
 0x29f   : > { %v3136_v54 = vadd.f32 %v2977_v31, %v2803_v56  ;;  %v2980_v6 = vpop.f32.mrf.mxu0 }
 0x2a1   : > { %v3204_v52 = vadd.f32 %v5984_v24, %v3136_v54  ;;  %4819 = vmatmul.msk.bf16.gmra.mxu3 %vm1021_vm5, %v5029_v9 }
 0x2a2   : > { %4851 = vmatmul.msk.bf16.gmra.mxu0 %vm1021_vm5, %v6786_v0 }
 0x2a3   : > { %v3268_v34 = vmax.f32 %v3204_v52, 0.0 }
 0x2a4   : > { %v2647_v21 = vpop.f32.mrf.mxu3 }
 0x2a5   : > { %v3331_v18 = vpack.c.bf16 %v3268_v34, %v3267_v17  ;;  %v2804_v31 = vadd.f32 %v2647_v21, %v5562_v58  ;;  %v1816_v20 = vpop.f32.mrf.mxu1  ;;  %v2244_v41 = vpop.f32.mrf.mxu2  ;;  %v6788_v58 = vpack.c.bf16 %v5627_v11, %v5618_v2  ;;  %v5031_v11 = vld [vmem:[%s5764_s15 + $0x58] sm:$0xff] }
 0x2a6   : > { %v6005_v52 = vadd.f32 %v2244_v41, %v1816_v20 }
 0x2a7   : > { %v2982_v54 = vpop.f32.mrf.mxu0  ;;  %4882 = vmatmul.msk.bf16.vlgmr.msrb.gmra.mxu1 %vm3383_vm8, %v3331_v18  ;;  %v3137_v56 = vadd.f32 %v2980_v6, %v2804_v31 }
 0x2a9   : > { %v3205_v0 = vadd.f32 %v5984_v24, %v3137_v56 }
 0x2ac   : > { %v2649_v9 = vpop.f32.mrf.mxu3 }
 0x2ad   : > { %v2805_v50 = vadd.f32 %v2649_v9, %v5575_v53  ;;  %v3269_v53 = vmax.f32 %v3205_v0, 0.0  ;;  %v6014_v31 = vpop.f32.mrf.mxu1  ;;  %v6016_v9 = vpop.f32.mrf.mxu2 }
 0x2af   : > { %v3138_v17 = vadd.f32 %v2982_v54, %v2805_v50  ;;  %v2985_v34 = vpop.f32.mrf.mxu0 }
 0x2b1   : > { %v3206_v29 = vadd.f32 %v5984_v24, %v3138_v17  ;;  %4820 = vmatmul.msk.bf16.gmra.mxu3 %vm1021_vm5, %v5030_v16 }
 0x2b2   : > { %4852 = vmatmul.msk.bf16.gmra.mxu0 %vm1021_vm5, %v6788_v58 }
 0x2b3   : > { %v3270_v6 = vmax.f32 %v3206_v29, 0.0 }
 0x2b4   : > { %v2652_v21 = vpop.f32.mrf.mxu3 }
 0x2b5   : > { %v3332_v18 = vpack.c.bf16 %v3270_v6, %v3269_v53  ;;  %v2806_v54 = vadd.f32 %v2652_v21, %v5589_v12  ;;  %v1821_v2 = vpop.f32.mrf.mxu1  ;;  %v2249_v41 = vpop.f32.mrf.mxu2  ;;  %v6789_v12 = vpack.c.bf16 %v5652_v62, %v5643_v43  ;;  %v5032_v43 = vld [vmem:[%s5764_s15 + $0x60] sm:$0xff] }
 0x2b6   : > { %v6022_v0 = vadd.f32 %v2249_v41, %v1821_v2 }
 0x2b7   : > { %v2987_v56 = vpop.f32.mrf.mxu0  ;;  %4883 = vmatmul.msk.bf16.gmra.mxu1 %vm3383_vm8, %v3332_v18  ;;  %v3139_v50 = vadd.f32 %v2985_v34, %v2806_v54 }
 0x2b9   : > { %v3207_v29 = vadd.f32 %v5984_v24, %v3139_v50 }
 0x2bc   : > { %v2654_v16 = vpop.f32.mrf.mxu3 }
 0x2bd   : > { %v2807_v20 = vadd.f32 %v2654_v16, %v5600_v38  ;;  %v3271_v38 = vmax.f32 %v3207_v29, 0.0  ;;  %v6031_v18 = vpop.f32.mrf.mxu1  ;;  %v6033_v54 = vpop.f32.mrf.mxu2 }
 0x2bf   : > { %v3140_v17 = vadd.f32 %v2987_v56, %v2807_v20  ;;  %v2990_v58 = vpop.f32.mrf.mxu0 }
 0x2c1   : > { %v3208_v53 = vadd.f32 %v5984_v24, %v3140_v17  ;;  %4821 = vmatmul.msk.bf16.gmra.mxu3 %vm1021_vm5, %v5031_v11 }
 0x2c2   : > { %4853 = vmatmul.msk.bf16.gmra.mxu0 %vm1021_vm5, %v6789_v12 }
 0x2c3   : > { %v3272_v34 = vmax.f32 %v3208_v53, 0.0 }
 0x2c4   : > { %v2657_v6 = vpop.f32.mrf.mxu3 }
 0x2c5   : > { %v3333_v21 = vpack.c.bf16 %v3272_v34, %v3271_v38  ;;  %v2808_v56 = vadd.f32 %v2657_v6, %v5614_v23  ;;  %v1826_v62 = vpop.f32.mrf.mxu1  ;;  %v2254_v2 = vpop.f32.mrf.mxu2  ;;  %v6790_v23 = vpack.c.bf16 %v5680_v61, %v5671_v5  ;;  %v5033_v5 = vld [vmem:[%s5764_s15 + $0x68] sm:$0xff] }
 0x2c6   : > { %v6039_v41 = vadd.f32 %v2254_v2, %v1826_v62 }
 0x2c7   : > { %v2992_v50 = vpop.f32.mrf.mxu0  ;;  %4884 = vmatmul.msk.bf16.gmra.mxu1 %vm3383_vm8, %v3333_v21  ;;  %v3141_v16 = vadd.f32 %v2990_v58, %v2808_v56 }
 0x2c9   : > { %v3209_v29 = vadd.f32 %v5984_v24, %v3141_v16 }
 0x2cc   : > { %v2659_v20 = vpop.f32.mrf.mxu3 }
 0x2cd   : > { %v2809_v11 = vadd.f32 %v2659_v20, %v5625_v13  ;;  %v3273_v13 = vmax.f32 %v3209_v29, 0.0  ;;  %v6048_v6 = vpop.f32.mrf.mxu1  ;;  %v6050_v21 = vpop.f32.mrf.mxu2 }
 0x2cf   : > { %v3142_v17 = vadd.f32 %v2992_v50, %v2809_v11  ;;  %v2995_v53 = vpop.f32.mrf.mxu0 }
 0x2d1   : > { %v3210_v12 = vadd.f32 %v5984_v24, %v3142_v17  ;;  %4822 = vmatmul.msk.bf16.gmra.mxu3 %vm1021_vm5, %v5032_v43 }
 0x2d2   : > { %4854 = vmatmul.msk.bf16.gmra.mxu0 %vm1021_vm5, %v6790_v23 }
 0x2d3   : > { %v3274_v58 = vmax.f32 %v3210_v12, 0.0 }
 0x2d4   : > { %v2662_v38 = vpop.f32.mrf.mxu3 }
 0x2d5   : > { %v3334_v34 = vpack.c.bf16 %v3274_v58, %v3273_v13  ;;  %v2810_v56 = vadd.f32 %v2662_v38, %v5640_v45  ;;  %v1831_v61 = vpop.f32.mrf.mxu1  ;;  %v2259_v43 = vpop.f32.mrf.mxu2  ;;  %v6791_v45 = vpack.c.bf16 %v5705_v7, %v5696_v35  ;;  %v5034_v7 = vld [vmem:[%s5764_s15 + $0x70] sm:$0xff] }
 0x2d6   : > { %v6056_v62 = vadd.f32 %v2259_v43, %v1831_v61 }
 0x2d7   : > { %v2997_v50 = vpop.f32.mrf.mxu0  ;;  %4885 = vmatmul.msk.bf16.gmra.mxu1 %vm3383_vm8, %v3334_v34  ;;  %v3143_v16 = vadd.f32 %v2995_v53, %v2810_v56 }
 0x2d9   : > { %v3211_v2 = vadd.f32 %v5984_v24, %v3143_v16 }
 0x2dc   : > { %v2664_v20 = vpop.f32.mrf.mxu3 }
 0x2dd   : > { %v2811_v11 = vadd.f32 %v2664_v20, %v5650_v33  ;;  %v3275_v33 = vmax.f32 %v3211_v2, 0.0  ;;  %v6065_v58 = vpop.f32.mrf.mxu1  ;;  %v6067_v38 = vpop.f32.mrf.mxu2 }
 0x2df   : > { %v3144_v29 = vadd.f32 %v2997_v50, %v2811_v11  ;;  %v3000_v17 = vpop.f32.mrf.mxu0 }
 0x2e1   : > { %v3212_v12 = vadd.f32 %v5984_v24, %v3144_v29  ;;  %4823 = vmatmul.msk.bf16.gmra.mxu3 %vm1021_vm5, %v5033_v5 }
 0x2e2   : > { %4855 = vmatmul.msk.bf16.gmra.mxu0 %vm1021_vm5, %v6791_v45 }
 0x2e3   : > { %v3276_v53 = vmax.f32 %v3212_v12, 0.0 }
 0x2e4   : > { %v2667_v23 = vpop.f32.mrf.mxu3 }
 0x2e5   : > { %v3335_v13 = vpack.c.bf16 %v3276_v53, %v3275_v33  ;;  %v2812_v34 = vadd.f32 %v2667_v23, %v5667_v4  ;;  %v1836_v35 = vpop.f32.mrf.mxu1  ;;  %v2264_v11 = vpop.f32.mrf.mxu2  ;;  %v6792_v4 = vpack.c.bf16 %v5730_v15, %v5721_v46 }
 0x2e6   : > { %v6073_v5 = vadd.f32 %v2264_v11, %v1836_v35 }
 0x2e7   : > { %v3002_v56 = vpop.f32.mrf.mxu0  ;;  %4886 = vmatmul.msk.bf16.gmra.mxu1 %vm3383_vm8, %v3335_v13  ;;  %v3145_v50 = vadd.f32 %v3000_v17, %v2812_v34 }
 0x2e9   : > { %v3213_v61 = vadd.f32 %v5984_v24, %v3145_v50 }
 0x2ec   : > { %v2669_v16 = vpop.f32.mrf.mxu3 }
 0x2ed   : > { %v2813_v20 = vadd.f32 %v2669_v16, %v5678_v25  ;;  %v3277_v25 = vmax.f32 %v3213_v61, 0.0 }
 0x2ef   : > { %v3146_v43 = vadd.f32 %v3002_v56, %v2813_v20  ;;  %v3005_v2 = vpop.f32.mrf.mxu0  ;;  %v5035_v56 = vld [vmem:[%s5764_s15 + $0x78] sm:$0xff] }
 0x2f1   : > { %v3214_v29 = vadd.f32 %v5984_v24, %v3146_v43  ;;  %4824 = vmatmul.msk.bf16.gmra.mxu3 %vm1021_vm5, %v5034_v7 }
 0x2f2   : > { %4856 = vmatmul.msk.bf16.gmra.mxu0 %vm1021_vm5, %v6792_v4  ;;  %v5036_v4 = vld [vmem:[%s5764_s15 + $0x80] sm:$0xff] }
 0x2f3   : > { %v3278_v17 = vmax.f32 %v3214_v29, 0.0 }
 0x2f4   : > { %v2672_v12 = vpop.f32.mrf.mxu3 }
 0x2f5   : > { %v3336_v45 = vpack.c.bf16 %v3278_v17, %v3277_v25  ;;  %v2814_v33 = vadd.f32 %v2672_v12, %v5692_v32  ;;  %v6793_v32 = vpack.c.bf16 %v5755_v59, %v5746_v14 }
 0x2f7   : > { %v3007_v53 = vpop.f32.mrf.mxu0  ;;  %4887 = vmatmul.msk.bf16.gmra.mxu1 %vm3383_vm8, %v3336_v45  ;;  %v3147_v23 = vadd.f32 %v3005_v2, %v2814_v33 }
 0x2f9   : > { %v3215_v50 = vadd.f32 %v5984_v24, %v3147_v23 }
 0x2fb   : > { %v3279_v20 = vmax.f32 %v3215_v50, 0.0 }
 0x2fc   : > { %v2674_v13 = vpop.f32.mrf.mxu3 }
 0x2fd   : > { %v2815_v34 = vadd.f32 %v2674_v13, %v5703_v49 }
 0x2ff   : > { %v3148_v46 = vadd.f32 %v3007_v53, %v2815_v34  ;;  %v3010_v15 = vpop.f32.mrf.mxu0  ;;  %v6106_v34 = vpop.f32.mrf.mxu1 }
 0x301   : > { %v3216_v16 = vadd.f32 %v5984_v24, %v3148_v46  ;;  %4825 = vmatmul.msk.bf16.gmra.mxu3 %vm1021_vm5, %v5035_v56  ;;  %v5037_v46 = vld [vmem:[%s5764_s15 + $0x88] sm:$0xff] }
 0x302   : > { %4857 = vmatmul.msk.bf16.gmra.mxu0 %vm1021_vm5, %v6793_v32 }
 0x303   : > { %v3280_v7 = vmax.f32 %v3216_v16, 0.0 }
 0x304   : > { %v2677_v35 = vpop.f32.mrf.mxu3 }
 0x305   : > { %v3337_v11 = vpack.c.bf16 %v3280_v7, %v3279_v20  ;;  %v2816_v49 = vadd.f32 %v2677_v35, %v5718_v36  ;;  %v6794_v36 = vpack.c.bf16 %v5785_v30, %v5773_v19 }
 0x307   : > { %v3012_v61 = vpop.f32.mrf.mxu0  ;;  %4888 = vmatmul.msk.bf16.gmra.mxu1 %vm3383_vm8, %v3337_v11  ;;  %v3149_v43 = vadd.f32 %v3010_v15, %v2816_v49  ;;  %v6121_v49 = vld [vmem:[%s6680_s11] ss:$0 sm:$0xff] }
 0x309   : > { %v3217_v25 = vadd.f32 %v5984_v24, %v3149_v43 }
 0x30b   : > { %v3281_v12 = vmax.f32 %v3217_v25, 0.0  ;;  %v5038_v25 = vld [vmem:[%s5764_s15 + $0x90] sm:$0xff] }
 0x30c   : > { %v2679_v2 = vpop.f32.mrf.mxu3 }
 0x30d   : > { %v2817_v29 = vadd.f32 %v2679_v2, %v5728_v22 }
 0x30f   : > { %v3150_v17 = vadd.f32 %v3012_v61, %v2817_v29  ;;  %v3015_v14 = vpop.f32.mrf.mxu0 }
 0x311   : > { %v3218_v59 = vadd.f32 %v5984_v24, %v3150_v17  ;;  %4826 = vmatmul.msk.bf16.gmra.mxu3 %vm1021_vm5, %v5036_v4 }
 0x312   : > { %4858 = vmatmul.msk.bf16.gmra.mxu0 %vm1021_vm5, %v6794_v36 }
 0x313   : > { %v3282_v45 = vmax.f32 %v3218_v59, 0.0 }
 0x314   : > { %v2682_v33 = vpop.f32.mrf.mxu3 }
 0x315   : > { %v3338_v53 = vpack.c.bf16 %v3282_v45, %v3281_v12  ;;  %v2818_v22 = vadd.f32 %v2682_v33, %v5742_v28  ;;  %v6795_v28 = vpack.c.bf16 %v5809_v44, %v5797_v55  ;;  %v6796_v33 = vpack.c.bf16 %v5833_v60, %v5821_v27  ;;  %v6797_v60 = vld [vmem:[#allocation37_spill] sm:$0xff] }
 0x317   : > { %v3017_v23 = vpop.f32.mrf.mxu0  ;;  %4889 = vmatmul.msk.bf16.gmra.mxu1 %vm3383_vm8, %v3338_v53  ;;  %v3151_v13 = vadd.f32 %v3015_v14, %v2818_v22 }
 0x319   : > { %v3219_v19 = vadd.f32 %v5984_v24, %v3151_v13 }
 0x31b   : > { %v3283_v32 = vmax.f32 %v3219_v19, 0.0 }
 0x31c   : > { %v2684_v56 = vpop.f32.mrf.mxu3 }
 0x31d   : > { %v2819_v50 = vadd.f32 %v2684_v56, %v5753_v3 }
 0x31f   : > { %v3152_v30 = vadd.f32 %v3017_v23, %v2819_v50  ;;  %v3020_v15 = vpop.f32.mrf.mxu0 }
 0x321   : > { %v3220_v16 = vadd.f32 %v5984_v24, %v3152_v30  ;;  %4827 = vmatmul.msk.bf16.gmra.mxu3 %vm1021_vm5, %v5037_v46 }
 0x322   : > { %4859 = vmatmul.msk.bf16.gmra.mxu0 %vm1021_vm5, %v6795_v28  ;;  %v5039_v28 = vld [vmem:[%s5764_s15 + $0x98] sm:$0xff] }
 0x323   : > { %v3284_v20 = vmax.f32 %v3220_v16, 0.0 }
 0x324   : > { %v2687_v7 = vpop.f32.mrf.mxu3  ;;  %v3489_v35 = vpop.f32.mrf.mxu1 }
 0x325   : > { %v3339_v3 = vpack.c.bf16 %v3284_v20, %v3283_v32  ;;  %v2820_v11 = vadd.f32 %v2687_v7, %v5770_v47  ;;  %v3490_v55 = vadd.f32 %v6121_v49, %v3489_v35 }
 0x327   : > { %v3022_v61 = vpop.f32.mrf.mxu0  ;;  %4890 = vmatmul.msk.bf16.gmra.mxu1 %vm3383_vm8, %v3339_v3  ;;  %v3153_v43 = vadd.f32 %v3020_v15, %v2820_v11  ;;  %v3649_v17 = vmax.f32 %v3490_v55, 0.0 }
 0x329   : > { %v3221_v47 = vadd.f32 %v5984_v24, %v3153_v43 }
 0x32c   : > { %v2689_v44 = vpop.f32.mrf.mxu3  ;;  %v3491_v2 = vpop.f32.mrf.mxu1 }
 0x32d   : > { %v2821_v29 = vadd.f32 %v2689_v44, %v5783_v57  ;;  %v3492_v4 = vadd.f32 %v6121_v49, %v3491_v2  ;;  %v3285_v57 = vmax.f32 %v3221_v47, 0.0 }
 0x32f   : > { %v3154_v14 = vadd.f32 %v3022_v61, %v2821_v29  ;;  %v3650_v59 = vmax.f32 %v3492_v4, 0.0  ;;  %v3025_v36 = vpop.f32.mrf.mxu0  ;;  %v6798_v61 = vpack.c.bf16 %v5859_v10, %v5845_v26  ;;  %v6799_v4 = vld [vmem:[#allocation39_spill] sm:$0xff] }
 0x331   : > { %v3222_v12 = vadd.f32 %v5984_v24, %v3154_v14  ;;  %v3713_v45 = vpack.c.bf16 %v3650_v59, %v3649_v17  ;;  %4828 = vmatmul.msk.bf16.gmra.mxu3 %vm1021_vm5, %v5038_v25 }
 0x332   : > { %4860 = vmatmul.msk.bf16.gmra.mxu0 %vm1021_vm5, %v6796_v33 }
 0x333   : > { %v3286_v53 = vmax.f32 %v3222_v12, 0.0  ;;  %4922 = vmatmul.msk.bf16.vlgmr.msrb.gmra.mxu2 %vm3383_vm8, %v3713_v45  ;;  %v5040_v12 = vld [vmem:[%s5764_s15 + $0xa0] sm:$0xff] }
 0x334   : > { %v2692_v22 = vpop.f32.mrf.mxu3  ;;  %v3494_v23 = vpop.f32.mrf.mxu1 }
 0x335   : > { %v3340_v13 = vpack.c.bf16 %v3286_v53, %v3285_v57  ;;  %v2822_v56 = vadd.f32 %v2692_v22, %v5794_v51  ;;  %v3495_v19 = vadd.f32 %v6121_v49, %v3494_v23 }
 0x337   : > { %v3027_v50 = vpop.f32.mrf.mxu0  ;;  %4891 = vmatmul.msk.bf16.gmra.mxu1 %vm3383_vm8, %v3340_v13  ;;  %v3155_v46 = vadd.f32 %v3025_v36, %v2822_v56  ;;  %v3651_v20 = vmax.f32 %v3495_v19, 0.0  ;;  %v6800_v56 = vpack.c.bf16 %v5888_v48, %v5871_v8 }
 0x339   : > { %v3223_v32 = vadd.f32 %v5984_v24, %v3155_v46 }
 0x33b   : > { %v3287_v43 = vmax.f32 %v3223_v32, 0.0 }
 0x33c   : > { %v2694_v30 = vpop.f32.mrf.mxu3  ;;  %v3496_v27 = vpop.f32.mrf.mxu1 }
 0x33d   : > { %v2823_v15 = vadd.f32 %v2694_v30, %v6797_v60  ;;  %v3497_v16 = vadd.f32 %v6121_v49, %v3496_v27  ;;  %v6801_v27 = vld [vmem:[#allocation42_spill] sm:$0xff] }
 0x33f   : > { %v3156_v7 = vadd.f32 %v3027_v50, %v2823_v15  ;;  %v3652_v35 = vmax.f32 %v3497_v16, 0.0  ;;  %v3030_v3 = vpop.f32.mrf.mxu0  ;;  %v6802_v16 = vld [vmem:[#allocation44_spill] sm:$0xff] }
 0x341   : > { %v3224_v51 = vadd.f32 %v5984_v24, %v3156_v7  ;;  %v3714_v11 = vpack.c.bf16 %v3652_v35, %v3651_v20  ;;  %4829 = vmatmul.msk.bf16.gmra.mxu3 %vm1021_vm5, %v5039_v28  ;;  %v6803_v28 = vld [vmem:[#allocation45_spill] sm:$0xff] }
 0x342   : > { %4861 = vmatmul.msk.bf16.gmra.mxu0 %vm1021_vm5, %v6798_v61  ;;  %v2212_v32 = vadd.f32 %v6803_v28, %v6802_v16  ;;  %v6809_v16 = vpack.c.bf16 %v5940_v1, %v5926_v39 }
 0x343   : > { %v3288_v55 = vmax.f32 %v3224_v51, 0.0  ;;  %4923 = vmatmul.msk.bf16.gmra.mxu2 %vm3383_vm8, %v3714_v11  ;;  %v5041_v51 = vld [vmem:[%s5764_s15 + $0xa8] sm:$0xff] }
 0x344   : > { %v2697_v44 = vpop.f32.mrf.mxu3  ;;  %v3499_v2 = vpop.f32.mrf.mxu1 }
 0x345   : > { %v3341_v29 = vpack.c.bf16 %v3288_v55, %v3287_v43  ;;  %v2824_v25 = vadd.f32 %v2697_v44, %v6799_v4  ;;  %v3500_v14 = vadd.f32 %v6121_v49, %v3499_v2  ;;  %v6804_v4 = vld [vmem:[#allocation53_spill] sm:$0xff] }
 0x347   : > { %v3032_v47 = vpop.f32.mrf.mxu0  ;;  %4892 = vmatmul.msk.bf16.gmra.mxu1 %vm3383_vm8, %v3341_v29  ;;  %v3157_v17 = vadd.f32 %v3030_v3, %v2824_v25  ;;  %v3653_v33 = vmax.f32 %v3500_v14, 0.0  ;;  %v6805_v25 = vpack.c.bf16 %v5914_v40, %v6804_v4 }
 0x349   : > { %v3225_v45 = vadd.f32 %v5984_v24, %v3157_v17 }
 0x34c   : > { %v2699_v59 = vpop.f32.mrf.mxu3  ;;  %v3501_v26 = vpop.f32.mrf.mxu1 }
 0x34d   : > { %v2825_v10 = vadd.f32 %v2699_v59, %v5831_v42  ;;  %v3502_v36 = vadd.f32 %v6121_v49, %v3501_v26  ;;  %v3289_v42 = vmax.f32 %v3225_v45, 0.0  ;;  %v6807_v45 = vld [vmem:[#allocation49_spill] sm:$0xff] }
 0x34f   : > { %v3158_v57 = vadd.f32 %v3032_v47, %v2825_v10  ;;  %v3654_v53 = vmax.f32 %v3502_v36, 0.0  ;;  %v3035_v22 = vpop.f32.mrf.mxu0  ;;  %v6806_v10 = vld [vmem:[#allocation47_spill] sm:$0xff] }
 0x351   : > { %v3226_v23 = vadd.f32 %v5984_v24, %v3158_v57  ;;  %v3715_v13 = vpack.c.bf16 %v3654_v53, %v3653_v33  ;;  %4830 = vmatmul.msk.bf16.gmra.mxu3 %vm1021_vm5, %v5040_v12  ;;  %v6808_v33 = vld [vmem:[#allocation50_spill] sm:$0xff] }
 0x352   : > { %4862 = vmatmul.msk.bf16.gmra.mxu0 %vm1021_vm5, %v6800_v56  ;;  %v2217_v57 = vadd.f32 %v6808_v33, %v6807_v45 }
 0x353   : > { %v3290_v50 = vmax.f32 %v3226_v23, 0.0  ;;  %4924 = vmatmul.msk.bf16.gmra.mxu2 %vm3383_vm8, %v3715_v13 }
 0x354   : > { %v2702_v46 = vpop.f32.mrf.mxu3  ;;  %v3504_v19 = vpop.f32.mrf.mxu1 }
 0x355   : > { %v3342_v30 = vpack.c.bf16 %v3290_v50, %v3289_v42  ;;  %v2826_v60 = vadd.f32 %v2702_v46, %v6801_v27  ;;  %v3505_v8 = vadd.f32 %v6121_v49, %v3504_v19  ;;  %v5042_v42 = vld [vmem:[%s5764_s15 + $0xb0] sm:$0xff] }
 0x357   : > { %v3037_v15 = vpop.f32.mrf.mxu0  ;;  %4893 = vmatmul.msk.bf16.gmra.mxu1 %vm3383_vm8, %v3342_v30  ;;  %v3159_v20 = vadd.f32 %v3035_v22, %v2826_v60  ;;  %v3655_v61 = vmax.f32 %v3505_v8, 0.0 }
 0x359   : > { %v3227_v11 = vadd.f32 %v5984_v24, %v3159_v20 }
 0x35b   : > { %v3291_v47 = vmax.f32 %v3227_v11, 0.0  ;;  %v6812_v11 = vld [vmem:[#allocation56_spill] sm:$0xff] }
 0x35c   : > { %v2704_v48 = vpop.f32.mrf.mxu3  ;;  %v3506_v7 = vpop.f32.mrf.mxu1 }
 0x35d   : > { %v2827_v35 = vadd.f32 %v2704_v48, %v2212_v32  ;;  %v3507_v3 = vadd.f32 %v6121_v49, %v3506_v7  ;;  %v6810_v7 = vld [vmem:[#allocation52_spill] sm:$0xff] }
 0x35f   : > { %v3160_v43 = vadd.f32 %v3037_v15, %v2827_v35  ;;  %v3656_v55 = vmax.f32 %v3507_v3, 0.0  ;;  %v3040_v44 = vpop.f32.mrf.mxu0 }
 0x361   : > { %v3228_v2 = vadd.f32 %v5984_v24, %v3160_v43  ;;  %v3716_v29 = vpack.c.bf16 %v3656_v55, %v3655_v61  ;;  %4831 = vmatmul.msk.bf16.gmra.mxu3 %vm1021_vm5, %v5041_v51  ;;  %v6811_v51 = vld [vmem:[#allocation55_spill] sm:$0xff] }
 0x362   : > { %4863 = vmatmul.msk.bf16.gmra.mxu0 %vm1021_vm5, %v6805_v25  ;;  %v2222_v61 = vadd.f32 %v6812_v11, %v6811_v51  ;;  %v6820_v51 = vld [vmem:[#allocation2_spill] sm:$0xff] }
 0x363   : > { %v3292_v17 = vmax.f32 %v3228_v2, 0.0  ;;  %4925 = vmatmul.msk.bf16.gmra.mxu2 %vm3383_vm8, %v3716_v29  ;;  %v5043_v29 = vld [vmem:[%s5764_s15 + $0xb8] sm:$0xff] }
 0x364   : > { %v2707_v14 = vpop.f32.mrf.mxu3  ;;  %v3509_v59 = vpop.f32.mrf.mxu1 }
 0x365   : > { %v3343_v26 = vpack.c.bf16 %v3292_v17, %v3291_v47  ;;  %v2828_v36 = vadd.f32 %v2707_v14, %v6806_v10  ;;  %v3510_v40 = vadd.f32 %v6121_v49, %v3509_v59  ;;  %v6813_v10 = vld [vmem:[#allocation68_spill] sm:$0xff] }
 0x367   : > { %v3042_v12 = vpop.f32.mrf.mxu0  ;;  %4894 = vmatmul.msk.bf16.gmra.mxu1 %vm3383_vm8, %v3343_v26  ;;  %v3161_v53 = vadd.f32 %v3040_v44, %v2828_v36  ;;  %v3657_v46 = vmax.f32 %v3510_v40, 0.0  ;;  %v6814_v36 = vld [vmem:[#allocation64_spill] sm:$0xff] }
 0x369   : > { %v3229_v50 = vadd.f32 %v5984_v24, %v3161_v53 }
 0x36b   : > { %v3293_v28 = vmax.f32 %v3229_v50, 0.0 }
 0x36c   : > { %v2709_v22 = vpop.f32.mrf.mxu3  ;;  %v3511_v23 = vpop.f32.mrf.mxu1 }
 0x36d   : > { %v2829_v13 = vadd.f32 %v2709_v22, %v2217_v57  ;;  %v3512_v56 = vadd.f32 %v6121_v49, %v3511_v23  ;;  %v6816_v22 = vld [vmem:[#allocation58_spill] sm:$0xff] }
 0x36f   : > { %v3162_v19 = vadd.f32 %v3042_v12, %v2829_v13  ;;  %v3658_v30 = vmax.f32 %v3512_v56, 0.0  ;;  %v3045_v27 = vpop.f32.mrf.mxu0  ;;  %v6815_v12 = vpack.c.bf16 %v6813_v10, %v6814_v36  ;;  %v6817_v56 = vld [vmem:[#allocation60_spill] sm:$0xff] }
 0x371   : > { %v3230_v60 = vadd.f32 %v5984_v24, %v3162_v19  ;;  %v3717_v15 = vpack.c.bf16 %v3658_v30, %v3657_v46  ;;  %4832 = vmatmul.msk.bf16.gmra.mxu3 %vm1021_vm5, %v5042_v42  ;;  %v6818_v42 = vld [vmem:[#allocation61_spill] sm:$0xff] }
 0x372   : > { %4864 = vmatmul.msk.bf16.gmra.mxu0 %vm1021_vm5, %v6809_v16  ;;  %v2227_v50 = vadd.f32 %v6818_v42, %v6817_v56  ;;  %v5044_v16 = vld [vmem:[%s5764_s15 + $0xc0] sm:$0xff]  ;;  %v6826_v56 = vld [vmem:[#allocation4_spill] sm:$0xff] }
 0x373   : > { %v3294_v32 = vmax.f32 %v3230_v60, 0.0  ;;  %4926 = vmatmul.msk.bf16.gmra.mxu2 %vm3383_vm8, %v3717_v15 }
 0x374   : > { %v2712_v20 = vpop.f32.mrf.mxu3  ;;  %v3514_v8 = vpop.f32.mrf.mxu1 }
 0x375   : > { %v3344_v48 = vpack.c.bf16 %v3294_v32, %v3293_v28  ;;  %v2830_v35 = vadd.f32 %v2712_v20, %v6810_v7  ;;  %v3515_v39 = vadd.f32 %v6121_v49, %v3514_v8 }
 0x377   : > { %v3047_v3 = vpop.f32.mrf.mxu0  ;;  %4895 = vmatmul.msk.bf16.gmra.mxu1 %vm3383_vm8, %v3344_v48  ;;  %v3163_v43 = vadd.f32 %v3045_v27, %v2830_v35  ;;  %v3659_v25 = vmax.f32 %v3515_v39, 0.0 }
 0x379   : > { %v3231_v4 = vadd.f32 %v5984_v24, %v3163_v43 }
 0x37b   : > { %v3295_v45 = vmax.f32 %v3231_v4, 0.0  ;;  %v6823_v4 = vld [vmem:[#allocation66_spill] sm:$0xff] }
 0x37c   : > { %v2714_v1 = vpop.f32.mrf.mxu3  ;;  %v3516_v55 = vpop.f32.mrf.mxu1 }
 0x37d   : > { %v2831_v44 = vadd.f32 %v2714_v1, %v2222_v61  ;;  %v3517_v2 = vadd.f32 %v6121_v49, %v3516_v55 }
 0x37f   : > { %v3164_v47 = vadd.f32 %v3047_v3, %v2831_v44  ;;  %v3660_v17 = vmax.f32 %v3517_v2, 0.0  ;;  %v3050_v14 = vpop.f32.mrf.mxu0  ;;  %v6819_v3 = vld [vmem:[#allocation3_spill] sm:$0xff] }
 0x380   : > { %v6821_v11 = vpack.c.bf16 %v6819_v3, %v6820_v51  ;;  %v6822_v44 = vld [vmem:[#allocation63_spill] sm:$0xff] }
 0x381   : > { %v3232_v59 = vadd.f32 %v5984_v24, %v3164_v47  ;;  %v3718_v26 = vpack.c.bf16 %v3660_v17, %v3659_v25  ;;  %4833 = vmatmul.msk.bf16.gmra.mxu3 %vm1021_vm5, %v5043_v29  ;;  %v6824_v25 = vld [vmem:[#allocation67_spill] sm:$0xff] }
 0x382   : > { %4865 = vmatmul.msk.bf16.gmra.mxu0 %vm1021_vm5, %v6815_v12  ;;  %v2232_v47 = vadd.f32 %v6824_v25, %v6823_v4  ;;  %v5045_v12 = vld [vmem:[%s5764_s15 + $0xc8] sm:$0xff]  ;;  %v6832_v25 = vld [vmem:[#allocation6_spill] sm:$0xff] }
 0x383   : > { %v3296_v33 = vmax.f32 %v3232_v59, 0.0  ;;  %4927 = vmatmul.msk.bf16.gmra.mxu2 %vm3383_vm8, %v3718_v26  ;;  %v6831_v4 = vld [vmem:[#allocation7_spill] sm:$0xff] }
 0x384   : > { %v2717_v57 = vpop.f32.mrf.mxu3  ;;  %v3519_v53 = vpop.f32.mrf.mxu1 }
 0x385   : > { %v3345_v40 = vpack.c.bf16 %v3296_v33, %v3295_v45  ;;  %v2832_v23 = vadd.f32 %v2717_v57, %v6816_v22  ;;  %v3520_v19 = vadd.f32 %v6121_v49, %v3519_v53 }
 0x387   : > { %v3052_v13 = vpop.f32.mrf.mxu0  ;;  %4896 = vmatmul.msk.bf16.gmra.mxu1 %vm3383_vm8, %v3345_v40  ;;  %v3165_v46 = vadd.f32 %v3050_v14, %v2832_v23  ;;  %v3661_v32 = vmax.f32 %v3520_v19, 0.0 }
 0x389   : > { %v3233_v28 = vadd.f32 %v5984_v24, %v3165_v46 }
 0x38b   : > { %v3297_v61 = vmax.f32 %v3233_v28, 0.0  ;;  %v6829_v28 = vld [vmem:[#allocation71_spill] sm:$0xff] }
 0x38c   : > { %v2719_v30 = vpop.f32.mrf.mxu3  ;;  %v3521_v27 = vpop.f32.mrf.mxu1 }
 0x38d   : > { %v2833_v60 = vadd.f32 %v2719_v30, %v2227_v50  ;;  %v3522_v15 = vadd.f32 %v6121_v49, %v3521_v27 }
 0x38f   : > { %v3166_v20 = vadd.f32 %v3052_v13, %v2833_v60  ;;  %v3662_v8 = vmax.f32 %v3522_v15, 0.0  ;;  %v3055_v48 = vpop.f32.mrf.mxu0  ;;  %v6825_v13 = vld [vmem:[#allocation5_spill] sm:$0xff]  ;;  %v6828_v60 = vld [vmem:[#allocation70_spill] sm:$0xff] }
 0x390   : > { %v6827_v42 = vpack.c.bf16 %v6825_v13, %v6826_v56 }
 0x391   : > { %v3234_v7 = vadd.f32 %v5984_v24, %v3166_v20  ;;  %v3719_v35 = vpack.c.bf16 %v3662_v8, %v3661_v32  ;;  %4834 = vmatmul.msk.bf16.gmra.mxu3 %vm1021_vm5, %v5044_v16  ;;  %v6830_v32 = vld [vmem:[#allocation72_spill] sm:$0xff] }
 0x392   : > { %4866 = vmatmul.msk.bf16.gmra.mxu0 %vm1021_vm5, %v6821_v11  ;;  %v2237_v20 = vadd.f32 %v6830_v32, %v6829_v28  ;;  %v5046_v11 = vld [vmem:[%s5764_s15 + $0xd0] sm:$0xff] }
 0x393   : > { %v3298_v43 = vmax.f32 %v3234_v7, 0.0  ;;  %4928 = vmatmul.msk.bf16.gmra.mxu2 %vm3383_vm8, %v3719_v35 }
 0x394   : > { %v2722_v39 = vpop.f32.mrf.mxu3  ;;  %v3524_v1 = vpop.f32.mrf.mxu1 }
 0x395   : > { %v3346_v55 = vpack.c.bf16 %v3298_v43, %v3297_v61  ;;  %v2834_v2 = vadd.f32 %v2722_v39, %v6822_v44  ;;  %v3525_v14 = vadd.f32 %v6121_v49, %v3524_v1  ;;  %v6246_v61 = vpop.f32.mrf.mxu2 }
 0x397   : > { %v3057_v29 = vpop.f32.mrf.mxu0  ;;  %4897 = vmatmul.msk.bf16.gmra.mxu1 %vm3383_vm8, %v3346_v55  ;;  %v3167_v17 = vadd.f32 %v3055_v48, %v2834_v2  ;;  %v3663_v33 = vmax.f32 %v3525_v14, 0.0 }
 0x399   : > { %v3235_v45 = vadd.f32 %v5984_v24, %v3167_v17 }
 0x39b   : > { %v3299_v50 = vmax.f32 %v3235_v45, 0.0 }
 0x39c   : > { %v2724_v59 = vpop.f32.mrf.mxu3  ;;  %v3526_v26 = vpop.f32.mrf.mxu1 }
 0x39d   : > { %v2835_v10 = vadd.f32 %v2724_v59, %v2232_v47  ;;  %v3527_v36 = vadd.f32 %v6121_v49, %v3526_v26  ;;  %v6833_v47 = vpack.c.bf16 %v6831_v4, %v6832_v25  ;;  %v6259_v59 = vld [vmem:[%s6682_s13] ss:$0 sm:$0xff]  ;;  %v2247_v4 = vadd.f32 %v6016_v9, %v6014_v31 }
 0x39f   : > { %v3168_v57 = vadd.f32 %v3057_v29, %v2835_v10  ;;  %v3664_v53 = vmax.f32 %v3527_v36, 0.0  ;;  %v3060_v40 = vpop.f32.mrf.mxu0 }
 0x3a1   : > { %v3236_v22 = vadd.f32 %v5984_v24, %v3168_v57  ;;  %v3720_v23 = vpack.c.bf16 %v3664_v53, %v3663_v33  ;;  %4835 = vmatmul.msk.bf16.gmra.mxu3 %vm1021_vm5, %v5045_v12 }
 0x3a2   : > { %4867 = vmatmul.msk.bf16.gmra.mxu0 %vm1021_vm5, %v6827_v42 }
 0x3a3   : > { %v3300_v46 = vmax.f32 %v3236_v22, 0.0  ;;  %4929 = vmatmul.msk.bf16.gmra.mxu2 %vm3383_vm8, %v3720_v23  ;;  %v6834_v22 = vld [vmem:[#allocation73_spill] sm:$0xff] }
 0x3a4   : > { %v2727_v19 = vpop.f32.mrf.mxu3  ;;  %v3529_v30 = vpop.f32.mrf.mxu1  ;;  %v2242_v23 = vadd.f32 %v6834_v22, %v5997_v37  ;;  %v6838_v22 = vld [vmem:[#allocation11_spill] sm:$0xff] }
 0x3a5   : > { %v3347_v27 = vpack.c.bf16 %v3300_v46, %v3299_v50  ;;  %v2836_v15 = vadd.f32 %v2727_v19, %v6828_v60  ;;  %v3530_v48 = vadd.f32 %v6121_v49, %v3529_v30  ;;  %v5047_v46 = vld [vmem:[%s5764_s15 + $0xd8] sm:$0xff] }
 0x3a7   : > { %v3062_v16 = vpop.f32.mrf.mxu0  ;;  %4898 = vmatmul.msk.bf16.gmra.mxu1 %vm3383_vm8, %v3347_v27  ;;  %v3169_v8 = vadd.f32 %v3060_v40, %v2836_v15  ;;  %v3665_v39 = vmax.f32 %v3530_v48, 0.0  ;;  %v6836_v48 = vld [vmem:[#allocation8_spill] sm:$0xff] }
 0x3a9   : > { %v3237_v43 = vadd.f32 %v5984_v24, %v3169_v8  ;;  %v6835_v8 = vld [vmem:[#allocation9_spill] sm:$0xff] }
 0x3ab   : > { %v3301_v17 = vmax.f32 %v3237_v43, 0.0 }
 0x3ac   : > { %v2729_v7 = vpop.f32.mrf.mxu3  ;;  %v3531_v35 = vpop.f32.mrf.mxu1 }
 0x3ad   : > { %v2837_v3 = vadd.f32 %v2729_v7, %v2237_v20  ;;  %v3532_v51 = vadd.f32 %v6121_v49, %v3531_v35  ;;  %v6837_v7 = vpack.c.bf16 %v6835_v8, %v6836_v48 }
 0x3af   : > { %v3170_v1 = vadd.f32 %v3062_v16, %v2837_v3  ;;  %v3666_v55 = vmax.f32 %v3532_v51, 0.0  ;;  %v3065_v44 = vpop.f32.mrf.mxu0 }
 0x3b1   : > { %v3238_v2 = vadd.f32 %v5984_v24, %v3170_v1  ;;  %v3721_v29 = vpack.c.bf16 %v3666_v55, %v3665_v39  ;;  %4836 = vmatmul.msk.bf16.gmra.mxu3 %vm1021_vm5, %v5046_v11 }
 0x3b2   : > { %4868 = vmatmul.msk.bf16.gmra.mxu0 %vm1021_vm5, %v6833_v47 }
 0x3b3   : > { %v3302_v14 = vmax.f32 %v3238_v2, 0.0  ;;  %4930 = vmatmul.msk.bf16.gmra.mxu2 %vm3383_vm8, %v3721_v29 }
 0x3b4   : > { %v2732_v26 = vpop.f32.mrf.mxu3  ;;  %v3534_v10 = vpop.f32.mrf.mxu1 }
 0x3b5   : > { %v3348_v36 = vpack.c.bf16 %v3302_v14, %v3301_v17  ;;  %v2838_v45 = vadd.f32 %v2732_v26, %v5988_v63  ;;  %v3535_v40 = vadd.f32 %v6121_v49, %v3534_v10 }
 0x3b6   : > { %v3870_v12 = vpop.f32.mrf.mxu2 }
 0x3b7   : > { %v3067_v33 = vpop.f32.mrf.mxu0  ;;  %v3871_v57 = vadd.f32 %v6259_v59, %v3870_v12  ;;  %4899 = vmatmul.msk.bf16.gmra.mxu1 %vm3383_vm8, %v3348_v36  ;;  %v3171_v13 = vadd.f32 %v3065_v44, %v2838_v45  ;;  %v3667_v19 = vmax.f32 %v3535_v40, 0.0 }
 0x3b9   : > { %v4030_v53 = vpack.c.bf16 %v3871_v57, %v3871_v57  ;;  %v3239_v27 = vadd.f32 %v5984_v24, %v3171_v13 }
 0x3bb   : > { %4095 = vst.msk [vmem:[%s6268_s27] sm:$0xf] %vm4094_vm9, %v4030_v53  ;;  %v3303_v35 = vmax.f32 %v3239_v27, 0.0 }
 0x3bc   : > { %v2734_v63 = vpop.f32.mrf.mxu3  ;;  %v3536_v56 = vpop.f32.mrf.mxu1 }
 0x3bd   : > { %v2839_v42 = vadd.f32 %v2734_v63, %v2242_v23  ;;  %v3537_v50 = vadd.f32 %v6121_v49, %v3536_v56  ;;  %v6839_v23 = vld [vmem:[#allocation10_spill] sm:$0xff] }
 0x3be   : > { %v3872_v30 = vpop.f32.mrf.mxu2  ;;  %v6840_v13 = vpack.c.bf16 %v6838_v22, %v6839_v23  ;;  %v6343_v22 = vld [vmem:[%s6678_s9] ss:$0 sm:$0xff] }
 0x3bf   : > { %v3172_v60 = vadd.f32 %v3067_v33, %v2839_v42  ;;  %v3668_v15 = vmax.f32 %v3537_v50, 0.0  ;;  %v3070_v16 = vpop.f32.mrf.mxu0  ;;  %v3873_v28 = vadd.f32 %v6259_v59, %v3872_v30 }
 0x3c1   : > { %v3240_v37 = vadd.f32 %v5984_v24, %v3172_v60  ;;  %v3722_v32 = vpack.c.bf16 %v3668_v15, %v3667_v19  ;;  %v4031_v20 = vpack.c.bf16 %v3873_v28, %v3873_v28  ;;  %4837 = vmatmul.msk.bf16.gmra.mxu3 %vm1021_vm5, %v5047_v46  ;;  %v2252_v28 = vadd.f32 %v6033_v54, %v6031_v18 }
 0x3c2   : > { %4869 = vmatmul.msk.bf16.gmra.mxu0 %vm1021_vm5, %v6837_v7 }
 0x3c3   : > { %v3304_v3 = vmax.f32 %v3240_v37, 0.0  ;;  %4096 = vst.msk [vmem:[%s6268_s27 + $0x4] sm:$0xf] %vm4094_vm9, %v4031_v20  ;;  %4931 = vmatmul.msk.bf16.gmra.mxu2 %vm3383_vm8, %v3722_v32 }
 0x3c4   : > { %v2737_v51 = vpop.f32.mrf.mxu3  ;;  %v3539_v11 = vpop.f32.mrf.mxu1 }
 0x3c5   : > { %v3349_v43 = vpack.c.bf16 %v3304_v3, %v3303_v35  ;;  %v2840_v1 = vadd.f32 %v2737_v51, %v6005_v52  ;;  %v3540_v29 = vadd.f32 %v6121_v49, %v3539_v11  ;;  %v5048_v52 = vld [vmem:[%s5764_s15 + $0xe0] sm:$0xff] }
 0x3c6   : > { %v3875_v39 = vpop.f32.mrf.mxu2 }
 0x3c7   : > { %v3072_v55 = vpop.f32.mrf.mxu0  ;;  %v3876_v44 = vadd.f32 %v6259_v59, %v3875_v39  ;;  %4900 = vmatmul.msk.bf16.gmra.mxu1 %vm3383_vm8, %v3349_v43  ;;  %v3173_v25 = vadd.f32 %v3070_v16, %v2840_v1  ;;  %v3669_v10 = vmax.f32 %v3540_v29, 0.0 }
 0x3c9   : > { %v4032_v2 = vpack.c.bf16 %v3876_v44, %v3876_v44  ;;  %v3241_v12 = vadd.f32 %v5984_v24, %v3173_v25  ;;  %v6842_v44 = vld [vmem:[#allocation12_spill] sm:$0xff] }
 0x3cb   : > { %4097 = vst.msk [vmem:[%s6268_s27 + $0x8] sm:$0xf] %vm4094_vm9, %v4032_v2  ;;  %v3305_v63 = vmax.f32 %v3241_v12, 0.0  ;;  %v2257_v12 = vadd.f32 %v6050_v21, %v6048_v6 }
 0x3cc   : > { %v2739_v47 = vpop.f32.mrf.mxu3  ;;  %v3541_v17 = vpop.f32.mrf.mxu1 }
 0x3cd   : > { %v2841_v14 = vadd.f32 %v2739_v47, %v2247_v4  ;;  %v3542_v26 = vadd.f32 %v6121_v49, %v3541_v17 }
 0x3ce   : > { %v3877_v36 = vpop.f32.mrf.mxu2 }
 0x3cf   : > { %v3174_v45 = vadd.f32 %v3072_v55, %v2841_v14  ;;  %v3670_v33 = vmax.f32 %v3542_v26, 0.0  ;;  %v3075_v57 = vpop.f32.mrf.mxu0  ;;  %v3878_v53 = vadd.f32 %v6259_v59, %v3877_v36  ;;  %v6841_v55 = vld [vmem:[#allocation13_spill] sm:$0xff] }
 0x3d0   : > { %v6843_v2 = vpack.c.bf16 %v6841_v55, %v6842_v44 }
 0x3d1   : > { %v3242_v31 = vadd.f32 %v5984_v24, %v3174_v45  ;;  %v3723_v9 = vpack.c.bf16 %v3670_v33, %v3669_v10  ;;  %v4033_v40 = vpack.c.bf16 %v3878_v53, %v3878_v53  ;;  %4838 = vmatmul.msk.bf16.gmra.mxu3 %vm1021_vm5, %v5048_v52 }
 0x3d2   : > { %4870 = vmatmul.msk.bf16.gmra.mxu0 %vm1021_vm5, %v6840_v13 }
 0x3d3   : > { %v3306_v56 = vmax.f32 %v3242_v31, 0.0  ;;  %4098 = vst.msk [vmem:[%s6268_s27 + $0xc] sm:$0xf] %vm4094_vm9, %v4033_v40  ;;  %4932 = vmatmul.msk.bf16.gmra.mxu2 %vm3383_vm8, %v3723_v9 }
 0x3d4   : > { %v2742_v42 = vpop.f32.mrf.mxu3  ;;  %v3544_v50 = vpop.f32.mrf.mxu1 }
 0x3d5   : > { %v3350_v46 = vpack.c.bf16 %v3306_v56, %v3305_v63  ;;  %v2842_v30 = vadd.f32 %v2742_v42, %v6022_v0  ;;  %v3545_v16 = vadd.f32 %v6121_v49, %v3544_v50  ;;  %v5049_v0 = vld [vmem:[%s5764_s15 + $0xe8] sm:$0xff] }
 0x3d6   : > { %v3880_v19 = vpop.f32.mrf.mxu2 }
 0x3d7   : > { %v3077_v27 = vpop.f32.mrf.mxu0  ;;  %v3881_v60 = vadd.f32 %v6259_v59, %v3880_v19  ;;  %4901 = vmatmul.msk.bf16.gmra.mxu1 %vm3383_vm8, %v3350_v46  ;;  %v3175_v37 = vadd.f32 %v3075_v57, %v2842_v30  ;;  %v3671_v7 = vmax.f32 %v3545_v16, 0.0  ;;  %v6844_v46 = vld [vmem:[#allocation15_spill] sm:$0xff]  ;;  %v6845_v19 = vld [vmem:[#allocation14_spill] sm:$0xff] }
 0x3d8   : > { %v6846_v30 = vpack.c.bf16 %v6844_v46, %v6845_v19 }
 0x3d9   : > { %v4034_v15 = vpack.c.bf16 %v3881_v60, %v3881_v60  ;;  %v3243_v3 = vadd.f32 %v5984_v24, %v3175_v37 }
 0x3db   : > { %4099 = vst.msk [vmem:[%s6268_s27 + $0x10] sm:$0xf] %vm4094_vm9, %v4034_v15  ;;  %v3307_v29 = vmax.f32 %v3243_v3, 0.0 }
 0x3dc   : > { %v2744_v32 = vpop.f32.mrf.mxu3  ;;  %v3546_v20 = vpop.f32.mrf.mxu1 }
 0x3dd   : > { %v2843_v8 = vadd.f32 %v2744_v32, %v2252_v28  ;;  %v3547_v48 = vadd.f32 %v6121_v49, %v3546_v20 }
 0x3de   : > { %v3882_v35 = vpop.f32.mrf.mxu2 }
 0x3df   : > { %v3176_v51 = vadd.f32 %v3077_v27, %v2843_v8  ;;  %v3672_v11 = vmax.f32 %v3547_v48, 0.0  ;;  %v3080_v43 = vpop.f32.mrf.mxu0  ;;  %v3883_v39 = vadd.f32 %v6259_v59, %v3882_v35 }
 0x3e1   : > { %v3244_v18 = vadd.f32 %v5984_v24, %v3176_v51  ;;  %v3724_v54 = vpack.c.bf16 %v3672_v11, %v3671_v7  ;;  %v4035_v1 = vpack.c.bf16 %v3883_v39, %v3883_v39  ;;  %4839 = vmatmul.msk.bf16.gmra.mxu3 %vm1021_vm5, %v5049_v0  ;;  %v2262_v7 = vadd.f32 %v6067_v38, %v6065_v58 }
 0x3e2   : > { %4871 = vmatmul.msk.bf16.gmra.mxu0 %vm1021_vm5, %v6843_v2 }
 0x3e3   : > { %v3308_v4 = vmax.f32 %v3244_v18, 0.0  ;;  %4100 = vst.msk [vmem:[%s6268_s27 + $0x14] sm:$0xf] %vm4094_vm9, %v4035_v1  ;;  %4933 = vmatmul.msk.bf16.gmra.mxu2 %vm3383_vm8, %v3724_v54 }
 0x3e4   : > { %v2747_v25 = vpop.f32.mrf.mxu3  ;;  %v3549_v47 = vpop.f32.mrf.mxu1 }
 0x3e5   : > { %v3351_v24 = vpack.c.bf16 %v3308_v4, %v3307_v29  ;;  %v2844_v14 = vadd.f32 %v2747_v25, %v6039_v41  ;;  %v3550_v36 = vadd.f32 %v6121_v49, %v3549_v47  ;;  %v5050_v41 = vld [vmem:[%s5764_s15 + $0xf0] sm:$0xff]  ;;  %v6847_v4 = vld [vmem:[#allocation17_spill] sm:$0xff] }
 0x3e6   : > { %v3885_v17 = vpop.f32.mrf.mxu2  ;;  %v6848_v25 = vld [vmem:[#allocation16_spill] sm:$0xff] }
 0x3e7   : > { %v3082_v26 = vpop.f32.mrf.mxu0  ;;  %v3886_v52 = vadd.f32 %v6259_v59, %v3885_v17  ;;  %4902 = vmatmul.msk.bf16.gmra.mxu1 %vm3383_vm8, %v3351_v24  ;;  %v3177_v45 = vadd.f32 %v3080_v43, %v2844_v14  ;;  %v3673_v9 = vmax.f32 %v3550_v36, 0.0  ;;  %v6849_v47 = vpack.c.bf16 %v6847_v4, %v6848_v25 }
 0x3e9   : > { %v4036_v10 = vpack.c.bf16 %v3886_v52, %v3886_v52  ;;  %v3245_v23 = vadd.f32 %v6343_v22, %v3177_v45 }
 0x3eb   : > { %4101 = vst.msk [vmem:[%s6268_s27 + $0x18] sm:$0xf] %vm4094_vm9, %v4036_v10  ;;  %v3309_v27 = vmax.f32 %v3245_v23, 0.0 }
 0x3ec   : > { %v2749_v33 = vpop.f32.mrf.mxu3  ;;  %v3551_v57 = vpop.f32.mrf.mxu1 }
 0x3ed   : > { %v2845_v53 = vadd.f32 %v2749_v33, %v2257_v12  ;;  %v3552_v31 = vadd.f32 %v6121_v49, %v3551_v57 }
 0x3ee   : > { %v3887_v40 = vpop.f32.mrf.mxu2 }
 0x3ef   : > { %v3178_v6 = vadd.f32 %v3082_v26, %v2845_v53  ;;  %v3674_v21 = vmax.f32 %v3552_v31, 0.0  ;;  %v3085_v13 = vpop.f32.mrf.mxu0  ;;  %v3888_v63 = vadd.f32 %v6259_v59, %v3887_v40  ;;  %v2267_v53 = vadd.f32 %v6246_v61, %v6106_v34 }
 0x3f1   : > { %v3246_v56 = vadd.f32 %v6343_v22, %v3178_v6  ;;  %v3725_v42 = vpack.c.bf16 %v3674_v21, %v3673_v9  ;;  %v4037_v50 = vpack.c.bf16 %v3888_v63, %v3888_v63  ;;  %4840 = vmatmul.msk.bf16.gmra.mxu3 %vm1021_vm5, %v5050_v41 }
 0x3f2   : > { %4872 = vmatmul.msk.bf16.gmra.mxu0 %vm1021_vm5, %v6846_v30 }
 0x3f3   : > { %v3310_v60 = vmax.f32 %v3246_v56, 0.0  ;;  %4102 = vst.msk [vmem:[%s6268_s27 + $0x1c] sm:$0xf] %vm4094_vm9, %v4037_v50  ;;  %4934 = vmatmul.msk.bf16.gmra.mxu2 %vm3383_vm8, %v3725_v42 }
 0x3f4   : > { %v2752_v15 = vpop.f32.mrf.mxu3  ;;  %v3554_v16 = vpop.f32.mrf.mxu1 }
 0x3f5   : > { %v3352_v28 = vpack.c.bf16 %v3310_v60, %v3309_v27  ;;  %v2846_v32 = vadd.f32 %v2752_v15, %v6056_v62  ;;  %v3555_v0 = vadd.f32 %v6121_v49, %v3554_v16  ;;  %v5051_v62 = vld [vmem:[%s5764_s15 + $0xf8] sm:$0xff]  ;;  %v6850_v60 = vld [vmem:[#allocation18_spill] sm:$0xff] }
 0x3f6   : > { %v3890_v37 = vpop.f32.mrf.mxu2  ;;  %v6851_v15 = vld [vmem:[#allocation34_spill] sm:$0xff] }
 0x3f7   : > { %v3087_v20 = vpop.f32.mrf.mxu0  ;;  %v3891_v8 = vadd.f32 %v6259_v59, %v3890_v37  ;;  %4903 = vmatmul.msk.bf16.gmra.mxu1 %vm3383_vm8, %v3352_v28  ;;  %v3179_v35 = vadd.f32 %v3085_v13, %v2846_v32  ;;  %v3675_v39 = vmax.f32 %v3555_v0, 0.0  ;;  %v2270_v16 = vadd.f32 %v6851_v15, %v6850_v60 }
 0x3f9   : > { %v4038_v48 = vpack.c.bf16 %v3891_v8, %v3891_v8  ;;  %v3247_v54 = vadd.f32 %v6343_v22, %v3179_v35  ;;  %v6853_v35 = vld [vmem:[#allocation35_spill] sm:$0xff] }
 0x3fb   : > { %4103 = vst.msk [vmem:[%s6268_s27 + $0x20] sm:$0xf] %vm4094_vm9, %v4038_v48  ;;  %v3311_v24 = vmax.f32 %v3247_v54, 0.0 }
 0x3fc   : > { %v2754_v3 = vpop.f32.mrf.mxu3  ;;  %v3556_v51 = vpop.f32.mrf.mxu1 }
 0x3fd   : > { %v2847_v11 = vadd.f32 %v2754_v3, %v2262_v7  ;;  %v3557_v43 = vadd.f32 %v6121_v49, %v3556_v51  ;;  %v6852_v7 = vld [vmem:[#allocation19_spill] sm:$0xff] }
 0x3fe   : > { %v3892_v18 = vpop.f32.mrf.mxu2  ;;  %v2272_v3 = vadd.f32 %v6853_v35, %v6852_v7 }
 0x3ff   : > { %v3180_v1 = vadd.f32 %v3087_v20, %v2847_v11  ;;  %v3676_v55 = vmax.f32 %v3557_v43, 0.0  ;;  %v3090_v44 = vpop.f32.mrf.mxu0  ;;  %v3893_v2 = vadd.f32 %v6259_v59, %v3892_v18 }
 0x401   : > { %v3248_v58 = vadd.f32 %v6343_v22, %v3180_v1  ;;  %v3726_v38 = vpack.c.bf16 %v3676_v55, %v3675_v39  ;;  %v4039_v29 = vpack.c.bf16 %v3893_v2, %v3893_v2  ;;  %4841 = vmatmul.msk.bf16.gmra.mxu3 %vm1021_vm5, %v5051_v62 }
 0x402   : > { %4873 = vmatmul.msk.bf16.gmra.mxu0 %vm1021_vm5, %v6849_v47 }
 0x403   : > { %v3312_v17 = vmax.f32 %v3248_v58, 0.0  ;;  %4104 = vst.msk [vmem:[%s6268_s27 + $0x24] sm:$0xf] %vm4094_vm9, %v4039_v29  ;;  %4935 = vmatmul.msk.bf16.gmra.mxu2 %vm3383_vm8, %v3726_v38 }
 0x404   : > { %v2757_v14 = vpop.f32.mrf.mxu3  ;;  %v3559_v26 = vpop.f32.mrf.mxu1 }
 0x405   : > { %v3353_v52 = vpack.c.bf16 %v3312_v17, %v3311_v24  ;;  %v2848_v36 = vadd.f32 %v2757_v14, %v6073_v5  ;;  %v3560_v57 = vadd.f32 %v6121_v49, %v3559_v26  ;;  %v6854_v14 = vld [vmem:[#allocation20_spill] sm:$0xff] }
 0x406   : > { %v3895_v10 = vpop.f32.mrf.mxu2  ;;  %v6855_v26 = vld [vmem:[#allocation36_spill] sm:$0xff] }
 0x407   : > { %v3092_v12 = vpop.f32.mrf.mxu0  ;;  %v3896_v45 = vadd.f32 %v6259_v59, %v3895_v10  ;;  %4904 = vmatmul.msk.bf16.gmra.mxu1 %vm3383_vm8, %v3353_v52  ;;  %v3181_v31 = vadd.f32 %v3090_v44, %v2848_v36  ;;  %v3677_v23 = vmax.f32 %v3560_v57, 0.0  ;;  %v2275_v52 = vadd.f32 %v6855_v26, %v6854_v14 }
 0x409   : > { %v4040_v33 = vpack.c.bf16 %v3896_v45, %v3896_v45  ;;  %v3249_v21 = vadd.f32 %v6343_v22, %v3181_v31  ;;  %v6856_v31 = vld [vmem:[#allocation21_spill] sm:$0xff] }
 0x40b   : > { %4105 = vst.msk [vmem:[%s6268_s27 + $0x28] sm:$0xf] %vm4094_vm9, %v4040_v33  ;;  %v3313_v46 = vmax.f32 %v3249_v21, 0.0 }
 0x40c   : > { %v2759_v41 = vpop.f32.mrf.mxu3  ;;  %v3561_v9 = vpop.f32.mrf.mxu1 }
 0x40d   : > { %v2849_v40 = vadd.f32 %v2759_v41, %v2267_v53  ;;  %v3562_v5 = vadd.f32 %v6121_v49, %v3561_v9  ;;  %v6857_v41 = vld [vmem:[#allocation38_spill] sm:$0xff] }
 0x40e   : > { %v3897_v6 = vpop.f32.mrf.mxu2  ;;  %v2277_v9 = vadd.f32 %v6857_v41, %v6856_v31 }
 0x40f   : > { %v3182_v13 = vadd.f32 %v3092_v12, %v2849_v40  ;;  %v3678_v63 = vmax.f32 %v3562_v5, 0.0  ;;  %v3095_v56 = vpop.f32.mrf.mxu0  ;;  %v3898_v42 = vadd.f32 %v6259_v59, %v3897_v6 }
 0x411   : > { %v3250_v34 = vadd.f32 %v6343_v22, %v3182_v13  ;;  %v3727_v61 = vpack.c.bf16 %v3678_v63, %v3677_v23  ;;  %v4041_v50 = vpack.c.bf16 %v3898_v42, %v3898_v42 }
 0x413   : > { %v3314_v19 = vmax.f32 %v3250_v34, 0.0  ;;  %4106 = vst.msk [vmem:[%s6268_s27 + $0x2c] sm:$0xf] %vm4094_vm9, %v4041_v50  ;;  %4936 = vmatmul.msk.bf16.gmra.mxu2 %vm3383_vm8, %v3727_v61 }
 0x414   : > { %v2762_v30 = vpop.f32.mrf.mxu3  ;;  %v3564_v27 = vpop.f32.mrf.mxu1 }
 0x415   : > { %v3354_v28 = vpack.c.bf16 %v3314_v19, %v3313_v46  ;;  %v2850_v32 = vadd.f32 %v2762_v30, %v2270_v16  ;;  %v3565_v0 = vadd.f32 %v6121_v49, %v3564_v27 }
 0x416   : > { %v3900_v37 = vpop.f32.mrf.mxu2 }
 0x417   : > { %v3097_v20 = vpop.f32.mrf.mxu0  ;;  %v3901_v8 = vadd.f32 %v6259_v59, %v3900_v37  ;;  %4905 = vmatmul.msk.bf16.gmra.mxu1 %vm3383_vm8, %v3354_v28  ;;  %v3183_v51 = vadd.f32 %v3095_v56, %v2850_v32  ;;  %v3679_v18 = vmax.f32 %v3565_v0, 0.0  ;;  %v6858_v28 = vld [vmem:[#allocation22_spill] sm:$0xff]  ;;  %v6859_v37 = vld [vmem:[#allocation40_spill] sm:$0xff] }
 0x418   : > { %v2280_v32 = vadd.f32 %v6859_v37, %v6858_v28 }
 0x419   : > { %v4042_v48 = vpack.c.bf16 %v3901_v8, %v3901_v8  ;;  %v3251_v1 = vadd.f32 %v6343_v22, %v3183_v51  ;;  %v6860_v51 = vld [vmem:[#allocation23_spill] sm:$0xff] }
 0x41b   : > { %4107 = vst.msk [vmem:[%s6268_s27 + $0x30] sm:$0xf] %vm4094_vm9, %v4042_v48  ;;  %v3315_v25 = vmax.f32 %v3251_v1, 0.0  ;;  %v6436_v1 = vld [vmem:[%s6680_s11] ss:$0 sm:$0xff] }
 0x41c   : > { %v2764_v11 = vpop.f32.mrf.mxu3  ;;  %v3566_v43 = vpop.f32.mrf.mxu1 }
 0x41d   : > { %v2851_v62 = vadd.f32 %v2764_v11, %v2272_v3  ;;  %v3567_v39 = vadd.f32 %v6121_v49, %v3566_v43  ;;  %v6861_v11 = vld [vmem:[#allocation41_spill] sm:$0xff] }
 0x41e   : > { %v3902_v54 = vpop.f32.mrf.mxu2  ;;  %v2282_v43 = vadd.f32 %v6861_v11, %v6860_v51 }
 0x41f   : > { %v3184_v55 = vadd.f32 %v3097_v20, %v2851_v62  ;;  %v3680_v44 = vmax.f32 %v3567_v39, 0.0  ;;  %v3100_v2 = vpop.f32.mrf.mxu0  ;;  %v3903_v58 = vadd.f32 %v6259_v59, %v3902_v54 }
 0x421   : > { %v3252_v38 = vadd.f32 %v6343_v22, %v3184_v55  ;;  %v3728_v29 = vpack.c.bf16 %v3680_v44, %v3679_v18  ;;  %v4043_v4 = vpack.c.bf16 %v3903_v58, %v3903_v58 }
 0x423   : > { %v3316_v47 = vmax.f32 %v3252_v38, 0.0  ;;  %4108 = vst.msk [vmem:[%s6268_s27 + $0x34] sm:$0xf] %vm4094_vm9, %v4043_v4  ;;  %4937 = vmatmul.msk.bf16.gmra.mxu2 %vm3383_vm8, %v3728_v29 }
 0x424   : > { %v2767_v24 = vpop.f32.mrf.mxu3  ;;  %v3569_v17 = vpop.f32.mrf.mxu1 }
 0x425   : > { %v3355_v10 = vpack.c.bf16 %v3316_v47, %v3315_v25  ;;  %v2852_v12 = vadd.f32 %v2767_v24, %v2275_v52  ;;  %v3570_v53 = vadd.f32 %v6121_v49, %v3569_v17 }
 0x426   : > { %v3905_v36 = vpop.f32.mrf.mxu2 }
 0x427   : > { %v3102_v45 = vpop.f32.mrf.mxu0  ;;  %v3906_v33 = vadd.f32 %v6259_v59, %v3905_v36  ;;  %4906 = vmatmul.msk.bf16.gmra.mxu1 %vm3383_vm8, %v3355_v10  ;;  %v3185_v40 = vadd.f32 %v3100_v2, %v2852_v12  ;;  %v3681_v13 = vmax.f32 %v3570_v53, 0.0  ;;  %v6862_v10 = vld [vmem:[#allocation24_spill] sm:$0xff]  ;;  %v6863_v36 = vld [vmem:[#allocation43_spill] sm:$0xff] }
 0x428   : > { %v2285_v12 = vadd.f32 %v6863_v36, %v6862_v10 }
 0x429   : > { %v4044_v57 = vpack.c.bf16 %v3906_v33, %v3906_v33  ;;  %v3253_v56 = vadd.f32 %v6343_v22, %v3185_v40  ;;  %v6864_v40 = vld [vmem:[#allocation25_spill] sm:$0xff] }
 0x42b   : > { %4109 = vst.msk [vmem:[%s6268_s27 + $0x38] sm:$0xf] %vm4094_vm9, %v4044_v57  ;;  %v3317_v27 = vmax.f32 %v3253_v56, 0.0 }
 0x42c   : > { %v2769_v5 = vpop.f32.mrf.mxu3  ;;  %v3571_v23 = vpop.f32.mrf.mxu1 }
 0x42d   : > { %v2853_v6 = vadd.f32 %v2769_v5, %v2277_v9  ;;  %v3572_v21 = vadd.f32 %v6121_v49, %v3571_v23  ;;  %v6865_v5 = vld [vmem:[#allocation46_spill] sm:$0xff] }
 0x42e   : > { %v3907_v63 = vpop.f32.mrf.mxu2  ;;  %v2287_v23 = vadd.f32 %v6865_v5, %v6864_v40 }
 0x42f   : > { %v3186_v42 = vadd.f32 %v3102_v45, %v2853_v6  ;;  %v3682_v34 = vmax.f32 %v3572_v21, 0.0  ;;  %v3105_v61 = vpop.f32.mrf.mxu0  ;;  %v3908_v50 = vadd.f32 %v6259_v59, %v3907_v63 }
 0x431   : > { %v3254_v46 = vadd.f32 %v6343_v22, %v3186_v42  ;;  %v3729_v19 = vpack.c.bf16 %v3682_v34, %v3681_v13  ;;  %v4045_v30 = vpack.c.bf16 %v3908_v50, %v3908_v50 }
 0x433   : > { %v3318_v60 = vmax.f32 %v3254_v46, 0.0  ;;  %4110 = vst.msk [vmem:[%s6268_s27 + $0x3c] sm:$0xf] %vm4094_vm9, %v4045_v30  ;;  %4938 = vmatmul.msk.bf16.gmra.mxu2 %vm3383_vm8, %v3729_v19 }
 0x434   : > { %v2772_v15 = vpop.f32.mrf.mxu3  ;;  %v3574_v16 = vpop.f32.mrf.mxu1 }
 0x435   : > { %v3356_v20 = vpack.c.bf16 %v3318_v60, %v3317_v27  ;;  %v2854_v48 = vadd.f32 %v2772_v15, %v2280_v32  ;;  %v3575_v3 = vadd.f32 %v6121_v49, %v3574_v16 }
 0x436   : > { %v3910_v8 = vpop.f32.mrf.mxu2 }
 0x437   : > { %v3107_v0 = vpop.f32.mrf.mxu0  ;;  %v3911_v7 = vadd.f32 %v6259_v59, %v3910_v8  ;;  %4907 = vmatmul.msk.bf16.gmra.mxu1 %vm3383_vm8, %v3356_v20  ;;  %v3187_v62 = vadd.f32 %v3105_v61, %v2854_v48  ;;  %v3683_v44 = vmax.f32 %v3575_v3, 0.0  ;;  %v6866_v20 = vld [vmem:[#allocation26_spill] sm:$0xff]  ;;  %v6867_v8 = vld [vmem:[#allocation48_spill] sm:$0xff] }
 0x438   : > { %v2290_v48 = vadd.f32 %v6867_v8, %v6866_v20 }
 0x439   : > { %v4046_v35 = vpack.c.bf16 %v3911_v7, %v3911_v7  ;;  %v3255_v49 = vadd.f32 %v6343_v22, %v3187_v62  ;;  %v6868_v62 = vld [vmem:[#allocation27_spill] sm:$0xff] }
 0x43b   : > { %4111 = vst.msk [vmem:[%s6268_s27 + $0x40] sm:$0xf] %vm4094_vm9, %v4046_v35  ;;  %v3319_v17 = vmax.f32 %v3255_v49, 0.0 }
 0x43c   : > { %v2774_v39 = vpop.f32.mrf.mxu3  ;;  %v3576_v18 = vpop.f32.mrf.mxu1 }
 0x43d   : > { %v2855_v54 = vadd.f32 %v2774_v39, %v2282_v43  ;;  %v3577_v55 = vadd.f32 %v6436_v1, %v3576_v18  ;;  %v6869_v39 = vld [vmem:[#allocation51_spill] sm:$0xff] }
 0x43e   : > { %v3912_v2 = vpop.f32.mrf.mxu2  ;;  %v2292_v18 = vadd.f32 %v6869_v39, %v6868_v62 }
 0x43f   : > { %v3188_v58 = vadd.f32 %v3107_v0, %v2855_v54  ;;  %v3684_v38 = vmax.f32 %v3577_v55, 0.0  ;;  %v3110_v29 = vpop.f32.mrf.mxu0  ;;  %v3913_v4 = vadd.f32 %v6259_v59, %v3912_v2 }
 0x441   : > { %v3256_v25 = vadd.f32 %v6343_v22, %v3188_v58  ;;  %v3730_v47 = vpack.c.bf16 %v3684_v38, %v3683_v44  ;;  %v4047_v24 = vpack.c.bf16 %v3913_v4, %v3913_v4 }
 0x443   : > { %v3320_v14 = vmax.f32 %v3256_v25, 0.0  ;;  %4112 = vst.msk [vmem:[%s6268_s27 + $0x44] sm:$0xf] %vm4094_vm9, %v4047_v24  ;;  %4939 = vmatmul.msk.bf16.gmra.mxu2 %vm3383_vm8, %v3730_v47 }
 0x444   : > { %v2777_v26 = vpop.f32.mrf.mxu3  ;;  %v3579_v52 = vpop.f32.mrf.mxu1 }
 0x445   : > { %v3357_v45 = vpack.c.bf16 %v3320_v14, %v3319_v17  ;;  %v2856_v57 = vadd.f32 %v2777_v26, %v2285_v12  ;;  %v3580_v9 = vadd.f32 %v6436_v1, %v3579_v52 }
 0x446   : > { %v3915_v33 = vpop.f32.mrf.mxu2 }
 0x447   : > { %v3112_v53 = vpop.f32.mrf.mxu0  ;;  %v3916_v31 = vadd.f32 %v6259_v59, %v3915_v33  ;;  %4908 = vmatmul.msk.bf16.gmra.mxu1 %vm3383_vm8, %v3357_v45  ;;  %v3189_v6 = vadd.f32 %v3110_v29, %v2856_v57  ;;  %v3685_v42 = vmax.f32 %v3580_v9, 0.0  ;;  %v6870_v45 = vld [vmem:[#allocation28_spill] sm:$0xff]  ;;  %v6871_v33 = vld [vmem:[#allocation54_spill] sm:$0xff] }
 0x448   : > { %v2295_v57 = vadd.f32 %v6871_v33, %v6870_v45 }
 0x449   : > { %v4048_v41 = vpack.c.bf16 %v3916_v31, %v3916_v31  ;;  %v3257_v61 = vadd.f32 %v6343_v22, %v3189_v6  ;;  %v6872_v6 = vld [vmem:[#allocation29_spill] sm:$0xff] }
 0x44b   : > { %4113 = vst.msk [vmem:[%s6268_s27 + $0x48] sm:$0xf] %vm4094_vm9, %v4048_v41  ;;  %v3321_v16 = vmax.f32 %v3257_v61, 0.0 }
 0x44c   : > { %v2779_v21 = vpop.f32.mrf.mxu3  ;;  %v3581_v13 = vpop.f32.mrf.mxu1 }
 0x44d   : > { %v2857_v63 = vadd.f32 %v2779_v21, %v2287_v23  ;;  %v3582_v56 = vadd.f32 %v6436_v1, %v3581_v13  ;;  %v6873_v21 = vld [vmem:[#allocation57_spill] sm:$0xff] }
 0x44e   : > { %v3917_v34 = vpop.f32.mrf.mxu2  ;;  %v2297_v13 = vadd.f32 %v6873_v21, %v6872_v6 }
 0x44f   : > { %v3190_v50 = vadd.f32 %v3112_v53, %v2857_v63  ;;  %v3686_v46 = vmax.f32 %v3582_v56, 0.0  ;;  %v3115_v19 = vpop.f32.mrf.mxu0  ;;  %v3918_v30 = vadd.f32 %v6259_v59, %v3917_v34 }
 0x451   : > { %v3258_v27 = vadd.f32 %v6343_v22, %v3190_v50  ;;  %v3731_v60 = vpack.c.bf16 %v3686_v46, %v3685_v42  ;;  %v4049_v15 = vpack.c.bf16 %v3918_v30, %v3918_v30 }
 0x453   : > { %v3322_v28 = vmax.f32 %v3258_v27, 0.0  ;;  %4114 = vst.msk [vmem:[%s6268_s27 + $0x4c] sm:$0xf] %vm4094_vm9, %v4049_v15  ;;  %4940 = vmatmul.msk.bf16.gmra.mxu2 %vm3383_vm8, %v3731_v60 }
 0x454   : > { %v2782_v37 = vpop.f32.mrf.mxu3  ;;  %v3584_v32 = vpop.f32.mrf.mxu1 }
 0x455   : > { %v3358_v0 = vpack.c.bf16 %v3322_v28, %v3321_v16  ;;  %v2858_v35 = vadd.f32 %v2782_v37, %v2290_v48  ;;  %v3585_v43 = vadd.f32 %v6436_v1, %v3584_v32 }
 0x456   : > { %v3920_v7 = vpop.f32.mrf.mxu2 }
 0x457   : > { %v3117_v3 = vpop.f32.mrf.mxu0  ;;  %v3921_v51 = vadd.f32 %v6259_v59, %v3920_v7  ;;  %4909 = vmatmul.msk.bf16.gmra.mxu1 %vm3383_vm8, %v3358_v0  ;;  %v3191_v54 = vadd.f32 %v3115_v19, %v2858_v35  ;;  %v3687_v58 = vmax.f32 %v3585_v43, 0.0  ;;  %v6874_v0 = vld [vmem:[#allocation30_spill] sm:$0xff]  ;;  %v6875_v7 = vld [vmem:[#allocation59_spill] sm:$0xff] }
 0x458   : > { %v2300_v35 = vadd.f32 %v6875_v7, %v6874_v0 }
 0x459   : > { %v4050_v11 = vpack.c.bf16 %v3921_v51, %v3921_v51  ;;  %v3259_v29 = vadd.f32 %v6343_v22, %v3191_v54  ;;  %v6876_v54 = vld [vmem:[#allocation31_spill] sm:$0xff] }
 0x45b   : > { %4115 = vst.msk [vmem:[%s6268_s27 + $0x50] sm:$0xf] %vm4094_vm9, %v4050_v11  ;;  %v3323_v52 = vmax.f32 %v3259_v29, 0.0 }
 0x45c   : > { %v2784_v55 = vpop.f32.mrf.mxu3  ;;  %v3586_v44 = vpop.f32.mrf.mxu1 }
 0x45d   : > { %v2859_v2 = vadd.f32 %v2784_v55, %v2292_v18  ;;  %v3587_v49 = vadd.f32 %v6436_v1, %v3586_v44  ;;  %v6877_v55 = vld [vmem:[#allocation62_spill] sm:$0xff] }
 0x45e   : > { %v3922_v38 = vpop.f32.mrf.mxu2  ;;  %v2302_v44 = vadd.f32 %v6877_v55, %v6876_v54 }
 0x45f   : > { %v3192_v4 = vadd.f32 %v3117_v3, %v2859_v2  ;;  %v3688_v25 = vmax.f32 %v3587_v49, 0.0  ;;  %v3120_v47 = vpop.f32.mrf.mxu0  ;;  %v3923_v24 = vadd.f32 %v6259_v59, %v3922_v38 }
 0x461   : > { %v3260_v17 = vadd.f32 %v6343_v22, %v3192_v4  ;;  %v3732_v14 = vpack.c.bf16 %v3688_v25, %v3687_v58  ;;  %v4051_v26 = vpack.c.bf16 %v3923_v24, %v3923_v24 }
 0x463   : > { %v3324_v10 = vmax.f32 %v3260_v17, 0.0  ;;  %4116 = vst.msk [vmem:[%s6268_s27 + $0x54] sm:$0xf] %vm4094_vm9, %v4051_v26  ;;  %4941 = vmatmul.msk.bf16.gmra.mxu2 %vm3383_vm8, %v3732_v14 }
 0x464   : > { %v2787_v36 = vpop.f32.mrf.mxu3  ;;  %v3589_v12 = vpop.f32.mrf.mxu1 }
 0x465   : > { %v3359_v53 = vpack.c.bf16 %v3324_v10, %v3323_v52  ;;  %v2860_v41 = vadd.f32 %v2787_v36, %v2295_v57  ;;  %v3590_v23 = vadd.f32 %v6436_v1, %v3589_v12 }
 0x466   : > { %v3925_v31 = vpop.f32.mrf.mxu2 }
 0x467   : > { %v3122_v9 = vpop.f32.mrf.mxu0  ;;  %v3926_v40 = vadd.f32 %v6259_v59, %v3925_v31  ;;  %4910 = vmatmul.msk.bf16.gmra.mxu1 %vm3383_vm8, %v3359_v53  ;;  %v3193_v63 = vadd.f32 %v3120_v47, %v2860_v41  ;;  %v3689_v50 = vmax.f32 %v3590_v23, 0.0  ;;  %v6878_v53 = vld [vmem:[#allocation32_spill] sm:$0xff]  ;;  %v6879_v31 = vld [vmem:[#allocation65_spill] sm:$0xff] }
 0x468   : > { %v2305_v41 = vadd.f32 %v6879_v31, %v6878_v53 }
 0x469   : > { %v4052_v5 = vpack.c.bf16 %v3926_v40, %v3926_v40  ;;  %v3261_v19 = vadd.f32 %v6343_v22, %v3193_v63  ;;  %v6881_v63 = vld [vmem:[#allocation69_spill] sm:$0xff] }
 0x46b   : > { %4117 = vst.msk [vmem:[%s6268_s27 + $0x58] sm:$0xf] %vm4094_vm9, %v4052_v5  ;;  %v3325_v32 = vmax.f32 %v3261_v19, 0.0 }
 0x46c   : > { %v2789_v56 = vpop.f32.mrf.mxu3  ;;  %v3591_v42 = vpop.f32.mrf.mxu1 }
 0x46d   : > { %v2861_v34 = vadd.f32 %v2789_v56, %v2297_v13  ;;  %v3592_v61 = vadd.f32 %v6436_v1, %v3591_v42  ;;  %v6880_v13 = vld [vmem:[#allocation33_spill] sm:$0xff] }
 0x46e   : > { %v3927_v46 = vpop.f32.mrf.mxu2  ;;  %v2307_v56 = vadd.f32 %v6881_v63, %v6880_v13 }
 0x46f   : > { %v3194_v30 = vadd.f32 %v3122_v9, %v2861_v34  ;;  %v3690_v27 = vmax.f32 %v3592_v61, 0.0  ;;  %v3125_v60 = vpop.f32.mrf.mxu0  ;;  %v3928_v15 = vadd.f32 %v6259_v59, %v3927_v46 }
 0x471   : > { %v3262_v16 = vadd.f32 %v6343_v22, %v3194_v30  ;;  %v3733_v28 = vpack.c.bf16 %v3690_v27, %v3689_v50  ;;  %v4053_v37 = vpack.c.bf16 %v3928_v15, %v3928_v15 }
 0x473   : > { %v3326_v20 = vmax.f32 %v3262_v16, 0.0  ;;  %4118 = vst.msk [vmem:[%s6268_s27 + $0x5c] sm:$0xf] %vm4094_vm9, %v4053_v37  ;;  %4942 = vmatmul.msk.bf16.gmra.mxu2 %vm3383_vm8, %v3733_v28 }
 0x474   : > { %v2792_v8 = vpop.f32.mrf.mxu3  ;;  %v3594_v48 = vpop.f32.mrf.mxu1 }
 0x475   : > { %v3360_v3 = vpack.c.bf16 %v3326_v20, %v3325_v32  ;;  %v2862_v11 = vadd.f32 %v2792_v8, %v2300_v35  ;;  %v3595_v18 = vadd.f32 %v6436_v1, %v3594_v48 }
 0x476   : > { %v3930_v51 = vpop.f32.mrf.mxu2 }
 0x477   : > { %v3931_v43 = vadd.f32 %v6259_v59, %v3930_v51  ;;  %4911 = vmatmul.msk.bf16.gmra.mxu1 %vm3383_vm8, %v3360_v3  ;;  %v3127_v62 = vpop.f32.mrf.mxu0  ;;  %v3195_v2 = vadd.f32 %v3125_v60, %v2862_v11  ;;  %v3691_v4 = vmax.f32 %v3595_v18, 0.0 }
 0x479   : > { %v4054_v39 = vpack.c.bf16 %v3931_v43, %v3931_v43  ;;  %v3263_v47 = vadd.f32 %v6343_v22, %v3195_v2 }
 0x47b   : > { %4119 = vst.msk [vmem:[%s6268_s27 + $0x60] sm:$0xf] %vm4094_vm9, %v4054_v39  ;;  %v3327_v36 = vmax.f32 %v3263_v47, 0.0 }
 0x47c   : > { %v2794_v49 = vpop.f32.mrf.mxu3  ;;  %v3596_v58 = vpop.f32.mrf.mxu1 }
 0x47d   : > { %v2863_v38 = vadd.f32 %v2794_v49, %v2302_v44  ;;  %v3597_v29 = vadd.f32 %v6436_v1, %v3596_v58 }
 0x47e   : > { %v3932_v25 = vpop.f32.mrf.mxu2 }
 0x47f   : > { %v3196_v24 = vadd.f32 %v3127_v62, %v2863_v38  ;;  %v3692_v17 = vmax.f32 %v3597_v29, 0.0  ;;  %v3933_v14 = vadd.f32 %v6259_v59, %v3932_v25  ;;  %v3130_v45 = vpop.f32.mrf.mxu0 }
 0x481   : > { %v3264_v26 = vadd.f32 %v6343_v22, %v3196_v24  ;;  %v3734_v52 = vpack.c.bf16 %v3692_v17, %v3691_v4  ;;  %v4055_v10 = vpack.c.bf16 %v3933_v14, %v3933_v14 }
 0x483   : > { %v3328_v12 = vmax.f32 %v3264_v26, 0.0  ;;  %4120 = vst.msk [vmem:[%s6268_s27 + $0x64] sm:$0xf] %vm4094_vm9, %v4055_v10  ;;  %4943 = vmatmul.msk.bf16.gmra.mxu2 %vm3383_vm8, %v3734_v52 }
 0x484   : > { %v2797_v33 = vpop.f32.mrf.mxu3  ;;  %v3599_v57 = vpop.f32.mrf.mxu1 }
 0x485   : > { %v3361_v9 = vpack.c.bf16 %v3328_v12, %v3327_v36  ;;  %v2864_v5 = vadd.f32 %v2797_v33, %v2305_v41  ;;  %v3600_v21 = vadd.f32 %v6436_v1, %v3599_v57 }
 0x486   : > { %v3935_v40 = vpop.f32.mrf.mxu2 }
 0x487   : > { %v3936_v23 = vadd.f32 %v6259_v59, %v3935_v40  ;;  %4912 = vmatmul.msk.bf16.gmra.mxu1 %vm3383_vm8, %v3361_v9  ;;  %v3197_v42 = vadd.f32 %v3130_v45, %v2864_v5  ;;  %v3693_v19 = vmax.f32 %v3600_v21, 0.0  ;;  %v3132_v30 = vpop.f32.mrf.mxu0 }
 0x489   : > { %v4056_v6 = vpack.c.bf16 %v3936_v23, %v3936_v23  ;;  %v3265_v60 = vadd.f32 %v6343_v22, %v3197_v42 }
 0x48b   : > { %4121 = vst.msk [vmem:[%s6268_s27 + $0x68] sm:$0xf] %vm4094_vm9, %v4056_v6  ;;  %v3329_v8 = vmax.f32 %v3265_v60, 0.0 }
 0x48c   : > { %v2799_v34 = vpop.f32.mrf.mxu3  ;;  %v3601_v61 = vpop.f32.mrf.mxu1 }
 0x48d   : > { %v2865_v50 = vadd.f32 %v2799_v34, %v2307_v56  ;;  %v3602_v46 = vadd.f32 %v6436_v1, %v3601_v61 }
 0x48e   : > { %v3937_v27 = vpop.f32.mrf.mxu2 }
 0x48f   : > { %v3198_v15 = vadd.f32 %v3132_v30, %v2865_v50  ;;  %v3694_v16 = vmax.f32 %v3602_v46, 0.0  ;;  %v3938_v28 = vadd.f32 %v6259_v59, %v3937_v27 }
 0x491   : > { %v3266_v37 = vadd.f32 %v6343_v22, %v3198_v15  ;;  %v3735_v32 = vpack.c.bf16 %v3694_v16, %v3693_v19  ;;  %v4057_v20 = vpack.c.bf16 %v3938_v28, %v3938_v28  ;;  %v6561_v19 = vld [vmem:[%s6682_s13] ss:$0 sm:$0xff] }
 0x493   : > { %v3330_v48 = vmax.f32 %v3266_v37, 0.0  ;;  %4122 = vst.msk [vmem:[%s6268_s27 + $0x6c] sm:$0xf] %vm4094_vm9, %v4057_v20  ;;  %4944 = vmatmul.msk.bf16.gmra.mxu2 %vm3383_vm8, %v3735_v32 }
 0x494   : > { %v3604_v0 = vpop.f32.mrf.mxu1 }
 0x495   : > { %v3362_v7 = vpack.c.bf16 %v3330_v48, %v3329_v8  ;;  %v3605_v11 = vadd.f32 %v6436_v1, %v3604_v0 }
 0x496   : > { %v3940_v35 = vpop.f32.mrf.mxu2 }
 0x497   : > { %v3941_v3 = vadd.f32 %v6259_v59, %v3940_v35  ;;  %4913 = vmatmul.msk.bf16.gmra.mxu1 %vm3383_vm8, %v3362_v7  ;;  %v3695_v39 = vmax.f32 %v3605_v11, 0.0 }
 0x499   : > { %v4058_v51 = vpack.c.bf16 %v3941_v3, %v3941_v3 }
 0x49b   : > { %4123 = vst.msk [vmem:[%s6268_s27 + $0x70] sm:$0xf] %vm4094_vm9, %v4058_v51 }
 0x49c   : > { %v3606_v22 = vpop.f32.mrf.mxu1 }
 0x49d   : > { %v3607_v43 = vadd.f32 %v6436_v1, %v3606_v22 }
 0x49e   : > { %v3942_v62 = vpop.f32.mrf.mxu2 }
 0x49f   : > { %v3696_v18 = vmax.f32 %v3607_v43, 0.0  ;;  %v3943_v54 = vadd.f32 %v6259_v59, %v3942_v62 }
 0x4a1   : > { %v3736_v55 = vpack.c.bf16 %v3696_v18, %v3695_v39  ;;  %v4059_v44 = vpack.c.bf16 %v3943_v54, %v3943_v54 }
 0x4a3   : > { %4124 = vst.msk [vmem:[%s6268_s27 + $0x74] sm:$0xf] %vm4094_vm9, %v4059_v44  ;;  %4945 = vmatmul.msk.bf16.gmra.mxu2 %vm3383_vm8, %v3736_v55 }
 0x4a4   : > { %v3609_v2 = vpop.f32.mrf.mxu1 }
 0x4a5   : > { %v3610_v29 = vadd.f32 %v6436_v1, %v3609_v2 }
 0x4a6   : > { %v3945_v49 = vpop.f32.mrf.mxu2 }
 0x4a7   : > { %v3946_v58 = vadd.f32 %v6259_v59, %v3945_v49  ;;  %v3697_v24 = vmax.f32 %v3610_v29, 0.0 }
 0x4a9   : > { %v4060_v38 = vpack.c.bf16 %v3946_v58, %v3946_v58 }
 0x4ab   : > { %4125 = vst.msk [vmem:[%s6268_s27 + $0x78] sm:$0xf] %vm4094_vm9, %v4060_v38 }
 0x4ac   : > { %v3611_v4 = vpop.f32.mrf.mxu1 }
 0x4ad   : > { %v3612_v25 = vadd.f32 %v6436_v1, %v3611_v4 }
 0x4ae   : > { %v3947_v47 = vpop.f32.mrf.mxu2 }
 0x4af   : > { %v3698_v17 = vmax.f32 %v3612_v25, 0.0  ;;  %v3948_v14 = vadd.f32 %v6259_v59, %v3947_v47 }
 0x4b1   : > { %v3737_v26 = vpack.c.bf16 %v3698_v17, %v3697_v24  ;;  %v4061_v52 = vpack.c.bf16 %v3948_v14, %v3948_v14 }
 0x4b3   : > { %4126 = vst.msk [vmem:[%s6268_s27 + $0x7c] sm:$0xf] %vm4094_vm9, %v4061_v52  ;;  %4946 = vmatmul.msk.bf16.gmra.mxu2 %vm3383_vm8, %v3737_v26 }
 0x4b4   : > { %v3614_v10 = vpop.f32.mrf.mxu1 }
 0x4b5   : > { %v3615_v33 = vadd.f32 %v6436_v1, %v3614_v10 }
 0x4b6   : > { %v3950_v36 = vpop.f32.mrf.mxu2 }
 0x4b7   : > { %v3951_v12 = vadd.f32 %v6259_v59, %v3950_v36  ;;  %v3699_v41 = vmax.f32 %v3615_v33, 0.0 }
 0x4b9   : > { %v4062_v45 = vpack.c.bf16 %v3951_v12, %v3951_v12 }
 0x4bb   : > { %4127 = vst.msk [vmem:[%s6268_s27 + $0x80] sm:$0xf] %vm4094_vm9, %v4062_v45 }
 0x4bc   : > { %v3616_v57 = vpop.f32.mrf.mxu1 }
 0x4bd   : > { %v3617_v53 = vadd.f32 %v6436_v1, %v3616_v57 }
 0x4be   : > { %v3952_v31 = vpop.f32.mrf.mxu2 }
 0x4bf   : > { %v3700_v9 = vmax.f32 %v3617_v53, 0.0  ;;  %v3953_v40 = vadd.f32 %v6259_v59, %v3952_v31 }
 0x4c1   : > { %v3738_v5 = vpack.c.bf16 %v3700_v9, %v3699_v41  ;;  %v4063_v23 = vpack.c.bf16 %v3953_v40, %v3953_v40 }
 0x4c3   : > { %4128 = vst.msk [vmem:[%s6268_s27 + $0x84] sm:$0xf] %vm4094_vm9, %v4063_v23  ;;  %4947 = vmatmul.msk.bf16.gmra.mxu2 %vm3383_vm8, %v3738_v5 }
 0x4c4   : > { %v3619_v6 = vpop.f32.mrf.mxu1 }
 0x4c5   : > { %v3620_v56 = vadd.f32 %v6436_v1, %v3619_v6 }
 0x4c6   : > { %v3955_v21 = vpop.f32.mrf.mxu2 }
 0x4c7   : > { %v3956_v13 = vadd.f32 %v6259_v59, %v3955_v21  ;;  %v3701_v50 = vmax.f32 %v3620_v56, 0.0 }
 0x4c9   : > { %v4064_v63 = vpack.c.bf16 %v3956_v13, %v3956_v13 }
 0x4cb   : > { %4129 = vst.msk [vmem:[%s6268_s27 + $0x88] sm:$0xf] %vm4094_vm9, %v4064_v63 }
 0x4cc   : > { %v3621_v42 = vpop.f32.mrf.mxu1 }
 0x4cd   : > { %v3622_v34 = vadd.f32 %v6436_v1, %v3621_v42 }
 0x4ce   : > { %v3957_v61 = vpop.f32.mrf.mxu2 }
 0x4cf   : > { %v3702_v46 = vmax.f32 %v3622_v34, 0.0  ;;  %v3958_v30 = vadd.f32 %v6561_v19, %v3957_v61 }
 0x4d1   : > { %v3739_v59 = vpack.c.bf16 %v3702_v46, %v3701_v50  ;;  %v4065_v27 = vpack.c.bf16 %v3958_v30, %v3958_v30 }
 0x4d3   : > { %4130 = vst.msk [vmem:[%s6268_s27 + $0x8c] sm:$0xf] %vm4094_vm9, %v4065_v27  ;;  %4948 = vmatmul.msk.bf16.gmra.mxu2 %vm3383_vm8, %v3739_v59 }
 0x4d4   : > { %v3624_v60 = vpop.f32.mrf.mxu1 }
 0x4d5   : > { %v3625_v37 = vadd.f32 %v6436_v1, %v3624_v60 }
 0x4d6   : > { %v3960_v15 = vpop.f32.mrf.mxu2 }
 0x4d7   : > { %v3961_v16 = vadd.f32 %v6561_v19, %v3960_v15  ;;  %v3703_v48 = vmax.f32 %v3625_v37, 0.0 }
 0x4d9   : > { %v4066_v28 = vpack.c.bf16 %v3961_v16, %v3961_v16 }
 0x4db   : > { %4131 = vst.msk [vmem:[%s6268_s27 + $0x90] sm:$0xf] %vm4094_vm9, %v4066_v28 }
 0x4dc   : > { %v3626_v32 = vpop.f32.mrf.mxu1 }
 0x4dd   : > { %v3627_v20 = vadd.f32 %v6436_v1, %v3626_v32 }
 0x4de   : > { %v3962_v8 = vpop.f32.mrf.mxu2 }
 0x4df   : > { %v3704_v0 = vmax.f32 %v3627_v20, 0.0  ;;  %v3963_v7 = vadd.f32 %v6561_v19, %v3962_v8 }
 0x4e1   : > { %v3740_v35 = vpack.c.bf16 %v3704_v0, %v3703_v48  ;;  %v4067_v3 = vpack.c.bf16 %v3963_v7, %v3963_v7 }
 0x4e3   : > { %4132 = vst.msk [vmem:[%s6268_s27 + $0x94] sm:$0xf] %vm4094_vm9, %v4067_v3  ;;  %4949 = vmatmul.msk.bf16.gmra.mxu2 %vm3383_vm8, %v3740_v35 }
 0x4e4   : > { %v3629_v51 = vpop.f32.mrf.mxu1 }
 0x4e5   : > { %v3630_v62 = vadd.f32 %v6436_v1, %v3629_v51 }
 0x4e6   : > { %v3965_v11 = vpop.f32.mrf.mxu2 }
 0x4e7   : > { %v3966_v22 = vadd.f32 %v6561_v19, %v3965_v11  ;;  %v3705_v55 = vmax.f32 %v3630_v62, 0.0 }
 0x4e9   : > { %v4068_v43 = vpack.c.bf16 %v3966_v22, %v3966_v22 }
 0x4eb   : > { %4133 = vst.msk [vmem:[%s6268_s27 + $0x98] sm:$0xf] %vm4094_vm9, %v4068_v43 }
 0x4ec   : > { %v3631_v39 = vpop.f32.mrf.mxu1 }
 0x4ed   : > { %v3632_v18 = vadd.f32 %v6436_v1, %v3631_v39 }
 0x4ee   : > { %v3967_v54 = vpop.f32.mrf.mxu2 }
 0x4ef   : > { %v3706_v44 = vmax.f32 %v3632_v18, 0.0  ;;  %v3968_v2 = vadd.f32 %v6561_v19, %v3967_v54 }
 0x4f1   : > { %v3741_v49 = vpack.c.bf16 %v3706_v44, %v3705_v55  ;;  %v4069_v58 = vpack.c.bf16 %v3968_v2, %v3968_v2 }
 0x4f3   : > { %4134 = vst.msk [vmem:[%s6268_s27 + $0x9c] sm:$0xf] %vm4094_vm9, %v4069_v58  ;;  %4950 = vmatmul.msk.bf16.gmra.mxu2 %vm3383_vm8, %v3741_v49 }
 0x4f4   : > { %v3634_v38 = vpop.f32.mrf.mxu1 }
 0x4f5   : > { %v3635_v47 = vadd.f32 %v6436_v1, %v3634_v38 }
 0x4f6   : > { %v3970_v29 = vpop.f32.mrf.mxu2 }
 0x4f7   : > { %v3971_v4 = vadd.f32 %v6561_v19, %v3970_v29  ;;  %v3707_v26 = vmax.f32 %v3635_v47, 0.0 }
 0x4f9   : > { %v4070_v25 = vpack.c.bf16 %v3971_v4, %v3971_v4 }
 0x4fb   : > { %4135 = vst.msk [vmem:[%s6268_s27 + $0xa0] sm:$0xf] %vm4094_vm9, %v4070_v25 }
 0x4fc   : > { %v3636_v24 = vpop.f32.mrf.mxu1 }
 0x4fd   : > { %v3637_v17 = vadd.f32 %v6436_v1, %v3636_v24 }
 0x4fe   : > { %v3972_v14 = vpop.f32.mrf.mxu2 }
 0x4ff   : > { %v3708_v52 = vmax.f32 %v3637_v17, 0.0  ;;  %v3973_v10 = vadd.f32 %v6561_v19, %v3972_v14 }
 0x501   : > { %v3742_v36 = vpack.c.bf16 %v3708_v52, %v3707_v26  ;;  %v4071_v12 = vpack.c.bf16 %v3973_v10, %v3973_v10 }
 0x503   : > { %4136 = vst.msk [vmem:[%s6268_s27 + $0xa4] sm:$0xf] %vm4094_vm9, %v4071_v12  ;;  %4951 = vmatmul.msk.bf16.gmra.mxu2 %vm3383_vm8, %v3742_v36 }
 0x504   : > { %v3639_v45 = vpop.f32.mrf.mxu1 }
 0x505   : > { %v3640_v31 = vadd.f32 %v6436_v1, %v3639_v45 }
 0x506   : > { %v3975_v33 = vpop.f32.mrf.mxu2 }
 0x507   : > { %v3976_v57 = vadd.f32 %v6561_v19, %v3975_v33  ;;  %v3709_v5 = vmax.f32 %v3640_v31, 0.0 }
 0x509   : > { %v4072_v53 = vpack.c.bf16 %v3976_v57, %v3976_v57 }
 0x50b   : > { %4137 = vst.msk [vmem:[%s6268_s27 + $0xa8] sm:$0xf] %vm4094_vm9, %v4072_v53 }
 0x50c   : > { %v3641_v41 = vpop.f32.mrf.mxu1 }
 0x50d   : > { %v3642_v9 = vadd.f32 %v6436_v1, %v3641_v41 }
 0x50e   : > { %v3977_v40 = vpop.f32.mrf.mxu2 }
 0x50f   : > { %v3710_v23 = vmax.f32 %v3642_v9, 0.0  ;;  %v3978_v6 = vadd.f32 %v6561_v19, %v3977_v40 }
 0x511   : > { %v3743_v21 = vpack.c.bf16 %v3710_v23, %v3709_v5  ;;  %v4073_v13 = vpack.c.bf16 %v3978_v6, %v3978_v6 }
 0x513   : > { %4138 = vst.msk [vmem:[%s6268_s27 + $0xac] sm:$0xf] %vm4094_vm9, %v4073_v13  ;;  %4952 = vmatmul.msk.bf16.gmra.mxu2 %vm3383_vm8, %v3743_v21 }
 0x514   : > { %v3644_v63 = vpop.f32.mrf.mxu1 }
 0x515   : > { %v3645_v61 = vadd.f32 %v6436_v1, %v3644_v63 }
 0x516   : > { %v3980_v56 = vpop.f32.mrf.mxu2 }
 0x517   : > { %v3981_v42 = vadd.f32 %v6561_v19, %v3980_v56  ;;  %v3711_v59 = vmax.f32 %v3645_v61, 0.0 }
 0x519   : > { %v4074_v34 = vpack.c.bf16 %v3981_v42, %v3981_v42 }
 0x51b   : > { %4139 = vst.msk [vmem:[%s6268_s27 + $0xb0] sm:$0xf] %vm4094_vm9, %v4074_v34 }
 0x51c   : > { %v3646_v50 = vpop.f32.mrf.mxu1 }
 0x51d   : > { %v3647_v46 = vadd.f32 %v6436_v1, %v3646_v50 }
 0x51e   : > { %v3982_v30 = vpop.f32.mrf.mxu2 }
 0x51f   : > { %v3712_v27 = vmax.f32 %v3647_v46, 0.0  ;;  %v3983_v60 = vadd.f32 %v6561_v19, %v3982_v30 }
 0x521   : > { %v3744_v15 = vpack.c.bf16 %v3712_v27, %v3711_v59  ;;  %v4075_v16 = vpack.c.bf16 %v3983_v60, %v3983_v60 }
 0x523   : > { %4140 = vst.msk [vmem:[%s6268_s27 + $0xb4] sm:$0xf] %vm4094_vm9, %v4075_v16  ;;  %4953 = vmatmul.msk.bf16.gmra.mxu2 %vm3383_vm8, %v3744_v15 }
 0x526   : > { %v3985_v28 = vpop.f32.mrf.mxu2 }
 0x527   : > { %v3986_v37 = vadd.f32 %v6561_v19, %v3985_v28 }
 0x529   : > { %v4076_v32 = vpack.c.bf16 %v3986_v37, %v3986_v37 }
 0x52b   : > { %4141 = vst.msk [vmem:[%s6268_s27 + $0xb8] sm:$0xf] %vm4094_vm9, %v4076_v32 }
 0x52e   : > { %v3987_v1 = vpop.f32.mrf.mxu2 }
 0x52f   : > { %v3988_v20 = vadd.f32 %v6561_v19, %v3987_v1 }
 0x531   : > { %v4077_v8 = vpack.c.bf16 %v3988_v20, %v3988_v20 }
 0x533   : > { %4142 = vst.msk [vmem:[%s6268_s27 + $0xbc] sm:$0xf] %vm4094_vm9, %v4077_v8 }
 0x536   : > { %v3990_v48 = vpop.f32.mrf.mxu2 }
 0x537   : > { %v3991_v0 = vadd.f32 %v6561_v19, %v3990_v48 }
 0x539   : > { %v4078_v7 = vpack.c.bf16 %v3991_v0, %v3991_v0 }
 0x53b   : > { %4143 = vst.msk [vmem:[%s6268_s27 + $0xc0] sm:$0xf] %vm4094_vm9, %v4078_v7 }
 0x53e   : > { %v3992_v35 = vpop.f32.mrf.mxu2 }
 0x53f   : > { %v3993_v3 = vadd.f32 %v6561_v19, %v3992_v35 }
 0x541   : > { %v4079_v51 = vpack.c.bf16 %v3993_v3, %v3993_v3 }
 0x543   : > { %4144 = vst.msk [vmem:[%s6268_s27 + $0xc4] sm:$0xf] %vm4094_vm9, %v4079_v51 }
 0x546   : > { %v3995_v11 = vpop.f32.mrf.mxu2 }
 0x547   : > { %v3996_v22 = vadd.f32 %v6561_v19, %v3995_v11 }
 0x549   : > { %v4080_v43 = vpack.c.bf16 %v3996_v22, %v3996_v22 }
 0x54b   : > { %4145 = vst.msk [vmem:[%s6268_s27 + $0xc8] sm:$0xf] %vm4094_vm9, %v4080_v43 }
 0x54e   : > { %v3997_v62 = vpop.f32.mrf.mxu2 }
 0x54f   : > { %v3998_v39 = vadd.f32 %v6561_v19, %v3997_v62 }
 0x551   : > { %v4081_v18 = vpack.c.bf16 %v3998_v39, %v3998_v39 }
 0x553   : > { %4146 = vst.msk [vmem:[%s6268_s27 + $0xcc] sm:$0xf] %vm4094_vm9, %v4081_v18 }
 0x556   : > { %v4000_v54 = vpop.f32.mrf.mxu2 }
 0x557   : > { %v4001_v55 = vadd.f32 %v6561_v19, %v4000_v54 }
 0x559   : > { %v4082_v44 = vpack.c.bf16 %v4001_v55, %v4001_v55 }
 0x55b   : > { %4147 = vst.msk [vmem:[%s6268_s27 + $0xd0] sm:$0xf] %vm4094_vm9, %v4082_v44 }
 0x55e   : > { %v4002_v2 = vpop.f32.mrf.mxu2 }
 0x55f   : > { %v4003_v49 = vadd.f32 %v6561_v19, %v4002_v2 }
 0x561   : > { %v4083_v58 = vpack.c.bf16 %v4003_v49, %v4003_v49 }
 0x563   : > { %4148 = vst.msk [vmem:[%s6268_s27 + $0xd4] sm:$0xf] %vm4094_vm9, %v4083_v58 }
 0x566   : > { %v4005_v38 = vpop.f32.mrf.mxu2 }
 0x567   : > { %v4006_v29 = vadd.f32 %v6561_v19, %v4005_v38 }
 0x569   : > { %v4084_v4 = vpack.c.bf16 %v4006_v29, %v4006_v29 }
 0x56b   : > { %4149 = vst.msk [vmem:[%s6268_s27 + $0xd8] sm:$0xf] %vm4094_vm9, %v4084_v4 }
 0x56e   : > { %v4007_v25 = vpop.f32.mrf.mxu2 }
 0x56f   : > { %v4008_v47 = vadd.f32 %v6561_v19, %v4007_v25 }
 0x571   : > { %v4085_v24 = vpack.c.bf16 %v4008_v47, %v4008_v47 }
 0x573   : > { %4150 = vst.msk [vmem:[%s6268_s27 + $0xdc] sm:$0xf] %vm4094_vm9, %v4085_v24 }
 0x576   : > { %v4010_v17 = vpop.f32.mrf.mxu2 }
 0x577   : > { %v4011_v14 = vadd.f32 %v6561_v19, %v4010_v17 }
 0x579   : > { %v4086_v26 = vpack.c.bf16 %v4011_v14, %v4011_v14 }
 0x57b   : > { %4151 = vst.msk [vmem:[%s6268_s27 + $0xe0] sm:$0xf] %vm4094_vm9, %v4086_v26 }
 0x57e   : > { %v4012_v52 = vpop.f32.mrf.mxu2 }
 0x57f   : > { %v4013_v10 = vadd.f32 %v6561_v19, %v4012_v52 }
 0x581   : > { %v4087_v36 = vpack.c.bf16 %v4013_v10, %v4013_v10 }
 0x583   : > { %4152 = vst.msk [vmem:[%s6268_s27 + $0xe4] sm:$0xf] %vm4094_vm9, %v4087_v36 }
 0x586   : > { %v4015_v12 = vpop.f32.mrf.mxu2 }
 0x587   : > { %v4016_v45 = vadd.f32 %v6561_v19, %v4015_v12 }
 0x589   : > { %v4088_v33 = vpack.c.bf16 %v4016_v45, %v4016_v45 }
 0x58b   : > { %4153 = vst.msk [vmem:[%s6268_s27 + $0xe8] sm:$0xf] %vm4094_vm9, %v4088_v33 }
 0x58e   : > { %v4017_v57 = vpop.f32.mrf.mxu2 }
 0x58f   : > { %v4018_v53 = vadd.f32 %v6561_v19, %v4017_v57 }
 0x591   : > { %v4089_v31 = vpack.c.bf16 %v4018_v53, %v4018_v53 }
 0x593   : > { %4154 = vst.msk [vmem:[%s6268_s27 + $0xec] sm:$0xf] %vm4094_vm9, %v4089_v31 }
 0x596   : > { %v4020_v41 = vpop.f32.mrf.mxu2 }
 0x597   : > { %v4021_v9 = vadd.f32 %v6561_v19, %v4020_v41 }
 0x599   : > { %v4090_v40 = vpack.c.bf16 %v4021_v9, %v4021_v9 }
 0x59b   : > { %4155 = vst.msk [vmem:[%s6268_s27 + $0xf0] sm:$0xf] %vm4094_vm9, %v4090_v40 }
 0x59e   : > { %v4022_v5 = vpop.f32.mrf.mxu2 }
 0x59f   : > { %v4023_v23 = vadd.f32 %v6561_v19, %v4022_v5 }
 0x5a1   : > { %v4091_v6 = vpack.c.bf16 %v4023_v23, %v4023_v23 }
 0x5a3   : > { %4156 = vst.msk [vmem:[%s6268_s27 + $0xf4] sm:$0xf] %vm4094_vm9, %v4091_v6 }
 0x5a6   : > { %v4025_v21 = vpop.f32.mrf.mxu2 }
 0x5a7   : > { %v4026_v13 = vadd.f32 %v6561_v19, %v4025_v21 }
 0x5a9   : > { %v4092_v63 = vpack.c.bf16 %v4026_v13, %v4026_v13 }
 0x5ab   : > { %4157 = vst.msk [vmem:[%s6268_s27 + $0xf8] sm:$0xf] %vm4094_vm9, %v4092_v63 }
 0x5ae   : > { %v4027_v56 = vpop.f32.mrf.mxu2 }
 0x5af   : > { %v4028_v42 = vadd.f32 %v6561_v19, %v4027_v56 }
 0x5b1   : > { %v4093_v34 = vpack.c.bf16 %v4028_v42, %v4028_v42 }
 0x5b3   : > { %4158 = vst.msk [vmem:[%s6268_s27 + $0xfc] sm:$0xf] %vm4094_vm9, %v4093_v34 }
 0x5b4 PF: > { %s24_s29 = sadd.s32 1, %s5084_s29  }
 0x5b5   : > { %p21_p4 = scmp.ge.s32.totalorder %s24_s29, 4  }
 0x5b7   :  { %23 = sbr.rel (!%p21_p4) target bundleno = 1 (0x1), region = 115 }

</bundles_post_ra>
